<compile_context>
chip_gen: v7x
topology: tpu7x:2x2x1
jax: 0.10.0
libtpu: 0.0.40
codegen_flags: <defaults>
</compile_context>

<pallas_src>
import jax
import jax.numpy as jnp
from jax import lax
from jax.experimental import pallas as pl
from jax.experimental.pallas import tpu as pltpu

F32 = jnp.float32
HEADS = 4

# fixed problem sizes for this script (slab layouts / kernel slices use them)
N_DRUG, N_DIS = 16, 16
DRUG_IN, DIS_IN = 24, 20
HID, OUT = 32, 128          # GCN/GAT hidden and output dims (linear_1 forces 128)
N_MOL = 24                  # total molecule atoms in the batch
BPAD = 8                    # padded batch rows for the conv / MLP head


# ----------------------------- fused kernel ----------------------------------

def fused_forward_kernel(run_ref, gcn_ref, gat_ref, conv1_ref, conv2_ref, out_ref):
    # ---- unpack the runtime slab (built per call in the wrapper) ----
    Xc = run_ref[0:32, 0:64]            # block-diag node features [32,64]
    Ac = run_ref[32:64, 0:32]           # block-diag normalized adjacency
    selA = run_ref[64:80, 0:32]         # (sel @ A_hat) rows: drug 0:8, dis 8:16
    memb = run_ref[80:80 + N_MOL, 0:HID]            # molecule node embeddings
    nmask = run_ref[104:104 + N_MOL, 0:N_MOL]       # 0 / -1e30 attention mask
    mpool = run_ref[128:136, 0:N_MOL]               # padded global_mean_pool
    rw2 = run_ref[136:138, 0:16]                    # conv-BN batch row weights

    # ---- fused drug + disease GCN (block-diagonal) ----
    W1c = gcn_ref[0:64, 0:64]
    W2c = gcn_ref[64:128, 0:64]
    W3c = gcn_ref[128:192, 0:256]
    b1c = gcn_ref[192:193, 0:64]
    b2c = gcn_ref[200:201, 0:64]
    b3c = gcn_ref[208:209, 0:256]

    r_ix = lax.broadcasted_iota(jnp.int32, (32, 64), 0)
    c_ix = lax.broadcasted_iota(jnp.int32, (32, 64), 1)
    own = jnp.where((r_ix < N_DRUG) == (c_ix < 2 * HID - HID + HID // 1 - 32 + 32),
                    0.0, 0.0)  # placeholder (overwritten below, keeps linter calm)
    own = jnp.where((r_ix < N_DRUG) == (c_ix < HID), 1.0 / 16.0, 0.0)
    # owner mask: drug rows own cols 0:32, dis rows own cols 32:64 (weight 1/16)
    own = jnp.where((r_ix < 16) == (c_ix < 32), 1.0 / 16.0, 0.0)

    def bn_relu_owner(h):
        # per-branch BatchNorm over nodes (only the owning 16 rows per column)
        mean = jnp.sum(own * h, axis=0, keepdims=True)
        d = h - mean
        var = jnp.sum(own * d * d, axis=0, keepdims=True)
        return jnp.maximum(d * lax.rsqrt(var + 1e-5), 0.0)

    h = jnp.dot(Ac, jnp.dot(Xc, W1c, preferred_element_type=F32),
                preferred_element_type=F32) + b1c
    h = bn_relu_owner(h)
    h = jnp.dot(Ac, jnp.dot(h, W2c, preferred_element_type=F32),
                preferred_element_type=F32) + b2c
    h = bn_relu_owner(h)
    t = jnp.dot(selA, h, preferred_element_type=F32)              # [16, 64]
    gout = jnp.dot(t, W3c, preferred_element_type=F32) + b3c      # [16, 256]
    drug_f1 = gout[0:8, 0:128]
    dis_f = gout[8:16, 128:256]

    # ---- molecular GAT (3 layers, batched-head softmax) ----
    def bn_relu_rows(x):
        mean = jnp.mean(x, axis=0, keepdims=True)
        d = x - mean
        var = jnp.mean(d * d, axis=0, keepdims=True)
        return jnp.maximum(d * lax.rsqrt(var + 1e-5), 0.0)

    def gat_attn(x, w, src_m, dst_m):
        xp = jnp.dot(x, w, preferred_element_type=F32)            # [N, H*dh]
        s_src = lax.dot_general(src_m, xp, (((1,), (1,)), ((), ())),
                                preferred_element_type=F32)       # [H, N]
        s_dst = lax.dot_general(dst_m, xp, (((1,), (1,)), ((), ())),
                                preferred_element_type=F32)       # [H, N]
        e = s_dst[:, :, None] + s_src[:, None, :]                 # [H, N, N]
        e = jnp.where(e > 0, e, 0.2 * e) + nmask[None, :, :]      # LeakyReLU + mask
        e = e - jnp.max(e, axis=2, keepdims=True)
        p = jnp.exp(e)
        attn = p * pl.reciprocal(jnp.sum(p, axis=2, keepdims=True), approx=True)
        return xp, attn

    def gat_hidden(x, w, src_m, dst_m, b):
        xp, attn = gat_attn(x, w, src_m, dst_m)
        acc = jnp.zeros((N_MOL, HID), F32)
        for hh in range(HEADS):
            acc = acc + jnp.dot(attn[hh], xp[:, hh * HID:(hh + 1) * HID],
                                preferred_element_type=F32)
        return bn_relu_rows(acc * (1.0 / HEADS) + b)

    g = gat_hidden(memb, gat_ref[0:32, 0:128], gat_ref[32:36, 0:128],
                   gat_ref[40:44, 0:128], gat_ref[48:49, 0:HID])
    g = gat_hidden(g, gat_ref[56:88, 0:128], gat_ref[88:92, 0:128],
                   gat_ref[96:100, 0:128], gat_ref[104:105, 0:HID])
    # last layer: fold global_mean_pool in front of the aggregation matmuls
    xp3, attn3 = gat_attn(g, gat_ref[112:144, 0:512], gat_ref[144:148, 0:512],
                          gat_ref[152:156, 0:512])
    acc = jnp.zeros((BPAD, OUT), F32)
    for hh in range(HEADS):
        pa = jnp.dot(mpool, attn3[hh], preferred_element_type=F32)      # [8, N]
        acc = acc + jnp.dot(pa, xp3[:, hh * OUT:(hh + 1) * OUT],
                            preferred_element_type=F32)
    drug_f2 = acc * (1.0 / HEADS) + gat_ref[160:161, 0:128]             # [8, 128]

    # ---- conv blocks (matmul form, [B, C*L] layout) + MLP head ----
    fea = jnp.concatenate([drug_f1, drug_f2, dis_f], axis=1)            # [8, 384]

    def conv_block(x, me, mo, brep, kmat):
        pooled = jnp.maximum(jnp.dot(x, me, preferred_element_type=F32),
                             jnp.dot(x, mo, preferred_element_type=F32)) + brep
        stacked = jnp.concatenate([pooled, pooled * pooled], axis=0)    # [16, W]
        stats = jnp.dot(jnp.dot(rw2, stacked, preferred_element_type=F32),
                        kmat, preferred_element_type=F32)               # [2, W]
        mean_c = stats[0:1, :]
        var_c = jnp.maximum(stats[1:2, :] - mean_c * mean_c, 0.0)
        return jnp.maximum((pooled - mean_c) * lax.rsqrt(var_c + 1e-5), 0.0)

    fea = conv_block(fea, conv1_ref[0:384, 0:384], conv1_ref[384:768, 0:384],
                     conv1_ref[1152:1153, 0:384], conv1_ref[768:1152, 0:384])
    fea = conv_block(fea, conv2_ref[0:384, 0:192], conv2_ref[384:768, 0:192],
                     conv2_ref[960:961, 0:192], conv2_ref[768:960, 0:192])

    h1 = jnp.maximum(
        jnp.dot(fea, conv2_ref[968:1160, 0:128], preferred_element_type=F32)
        + conv2_ref[1160:1161, 0:128], 0.0)
    out_ref[...] = (jnp.dot(h1, conv2_ref[1168:1296, 0:128],
                            preferred_element_type=F32)
                    + conv2_ref[1296:1297, 0:128])                      # [8, 128]


# ----------------------------- parameter preparation --------------------------

def _conv_operands(w, b, length):
    # Conv1d(k=3, pad=1, stride=1) + MaxPool(2,2) as matmul matrices in the
    # [B, C*L] layout (column index = channel*L + position).
    cout, cin, ktaps = w.shape
    lh = length // 2
    ar = jnp.arange(lh)
    se = jnp.zeros((length, lh), F32).at[2 * ar, ar].set(1.0)
    so = jnp.zeros((length, lh), F32).at[2 * ar + 1, ar].set(1.0)
    me = jnp.zeros((cin * length, cout * lh), F32)
    mo = jnp.zeros((cin * length, cout * lh), F32)
    for kt in range(ktaps):
        sk = jnp.eye(length, k=1 - kt, dtype=F32)   # input pos l' = out pos + kt - 1
        ak = w[:, :, kt].T                          # [cin, cout]
        me = me + jnp.kron(ak, sk @ se)
        mo = mo + jnp.kron(ak, sk @ so)
    brep = jnp.repeat(b, lh).reshape(1, cout * lh)
    kmat = jnp.kron(jnp.eye(cout, dtype=F32), jnp.ones((lh, lh), F32) / lh)
    return me, mo, brep, kmat


def _build_gcn_slab(drug_stack, dis_stack):
    (dw1, db1), (dw2, db2), (dw3, db3) = drug_stack
    (sw1, sb1), (sw2, sb2), (sw3, sb3) = dis_stack
    s = jnp.zeros((216, 256), F32)
    # W1 block-diagonal [64,64]
    s = s.at[0:DRUG_IN, 0:HID].set(dw1)
    s = s.at[DRUG_IN:DRUG_IN + DIS_IN, HID:2 * HID].set(sw1)
    # W2 block-diagonal [64,64]
    s = s.at[64:64 + HID, 0:HID].set(dw2)
    s = s.at[64 + HID:64 + 2 * HID, HID:2 * HID].set(sw2)
    # W3 block-diagonal [64,256]
    s = s.at[128:128 + HID, 0:OUT].set(dw3)
    s = s.at[128 + HID:128 + 2 * HID, OUT:2 * OUT].set(sw3)
    # biases
    s = s.at[192, 0:HID].set(db1).at[192, HID:2 * HID].set(sb1)
    s = s.at[200, 0:HID].set(db2).at[200, HID:2 * HID].set(sb2)
    s = s.at[208, 0:OUT].set(db3).at[208, OUT:2 * OUT].set(sb3)
    return s


def _build_gat_slab(gat_params):
    s = jnp.zeros((168, 512), F32)
    offs = (0, 56, 112)
    dhs = (HID, HID, OUT)
    for lp, off, dh in zip(gat_params, offs, dhs):
        s = s.at[off:off + HID, 0:HEADS * dh].set(lp["w"])
        for h in range(HEADS):
            s = s.at[off + 32 + h, h * dh:(h + 1) * dh].set(lp["asrc"][h])
            s = s.at[off + 40 + h, h * dh:(h + 1) * dh].set(lp["adst"][h])
        s = s.at[off + 48, 0:dh].set(lp["b"])
    return s


def _build_conv1_slab(w, b):
    me, mo, brep, kmat = _conv_operands(w, b, 128)      # 384-wide
    s = jnp.zeros((1160, 384), F32)
    s = s.at[0:384].set(me).at[384:768].set(mo)
    s = s.at[768:1152].set(kmat).at[1152:1153].set(brep)
    return s


def _build_conv2lin_slab(w, b, l1w, l1b, l2w, l2b):
    me, mo, brep, kmat = _conv_operands(w, b, 64)       # 192-wide
    s = jnp.zeros((1304, 192), F32)
    s = s.at[0:384, 0:192].set(me).at[384:768, 0:192].set(mo)
    s = s.at[768:960, 0:192].set(kmat).at[960, 0:192].set(brep[0])
    s = s.at[968:1160, 0:128].set(l1w)
    s = s.at[1160, 0:128].set(l1b)
    s = s.at[1168:1296, 0:1].set(l2w)                   # [128,1] in col 0
    s = s.at[1296, 0].set(l2b[0])
    return s


def prepare_params(params):
    """One-time transform of raw parameters into 4 kernel-ready slabs."""
    return dict(
        emb0=params["emb0"], emb1=params["emb1"],
        gcn_slab=_build_gcn_slab(params["drug_gcn"], params["dis_gcn"]),
        gat_slab=_build_gat_slab(params["gat"]),
        conv1_slab=_build_conv1_slab(params["conv1_w"], params["conv1_b"]),
        conv2lin_slab=_build_conv2lin_slab(params["conv2_w"], params["conv2_b"],
                                           params["lin1_w"], params["lin1_b"],
                                           params["lin2_w"], params["lin2_b"]),
    )


# ----------------------------- forward ---------------------------------------

def my_model_forward(prep, drug_x, drug_adj, drug_idx, dis_x, dis_adj, dis_idx,
                     mol_x, mol_mask, mol_pool):
    batch = drug_idx.shape[0]

    # TODO(synk): AtomEncoder integer-embedding gather stays in XLA glue (no
    # clean tiny-gather Pallas equivalent at this size).
    mol_emb = prep["emb0"][mol_x[:, 0]] + prep["emb1"][mol_x[:, 1]]
    neg_mask = jnp.where(mol_mask > 0.5, 0.0, -1e30).astype(F32)

    # ---- runtime slab (one DMA for all per-call tensors) ----
    run = jnp.zeros((144, 64), F32)
    run = run.at[0:N_DRUG, 0:DRUG_IN].set(drug_x)
    run = run.at[N_DRUG:32, DRUG_IN:DRUG_IN + DIS_IN].set(dis_x)
    run = run.at[32:32 + N_DRUG, 0:N_DRUG].set(drug_adj)
    run = run.at[48:48 + N_DIS, N_DRUG:N_DRUG + N_DIS].set(dis_adj)
    run = run.at[64:64 + batch, 0:N_DRUG].set(drug_adj[drug_idx])   # drug_sel @ A
    run = run.at[72:72 + batch, N_DRUG:32].set(dis_adj[dis_idx])    # dis_sel @ A
    run = run.at[80:80 + N_MOL, 0:HID].set(mol_emb)
    run = run.at[104:104 + N_MOL, 0:N_MOL].set(neg_mask)
    run = run.at[128:128 + batch, 0:N_MOL].set(mol_pool)
    run = run.at[136, 0:batch].set(jnp.full((batch,), 1.0 / batch, F32))
    run = run.at[137, 8:8 + batch].set(jnp.full((batch,), 1.0 / batch, F32))

    out = pl.pallas_call(
        fused_forward_kernel,
        out_shape=jax.ShapeDtypeStruct((BPAD, 128), F32),
        in_specs=[pl.BlockSpec(memory_space=pltpu.MemorySpace.VMEM)] * 5,
        out_specs=pl.BlockSpec(memory_space=pltpu.MemorySpace.VMEM),
        compiler_params=pltpu.CompilerParams(vmem_limit_bytes=32 * 1024 * 1024),
        cost_estimate=pl.CostEstimate(flops=12_000_000, transcendentals=10_000,
                                      bytes_accessed=3_600_000),
    )(run, prep["gcn_slab"], prep["gat_slab"], prep["conv1_slab"],
      prep["conv2lin_slab"])
    return out[:batch, :1]                                          # [B, 1]


# ----------------------------- graph glue (plain JAX) -------------------------

def gcn_norm_adj(edge_index, n):
    src, dst = edge_index[0], edge_index[1]
    a = jnp.zeros((n, n), F32).at[dst, src].add(1.0)
    a = a + jnp.eye(n, dtype=F32)                  # add self loops
    deg = jnp.sum(a, axis=1)
    dinv = lax.rsqrt(jnp.maximum(deg, 1e-12))
    return a * dinv[:, None] * dinv[None, :]


def gat_adj_mask(edge_index, n):
    src, dst = edge_index[0], edge_index[1]
    m = jnp.zeros((n, n), F32).at[dst, src].set(1.0)
    return jnp.maximum(m, jnp.eye(n, dtype=F32))   # self loops


# ----------------------------- parameters -------------------------------------

def init_params(key):
    keys = iter(jax.random.split(key, 64))

    def nrm(shape, scale=0.1):
        return jax.random.normal(next(keys), shape, dtype=F32) * scale

    def gcn_stack(in_dim):      # num_layers = 3
        return [(nrm((in_dim, HID)), nrm((HID,))),
                (nrm((HID, HID)), nrm((HID,))),
                (nrm((HID, OUT)), nrm((OUT,)))]

    def gat_params(in_dim, out_dim):
        return dict(w=nrm((in_dim, HEADS * out_dim)),
                    asrc=nrm((HEADS, out_dim)), adst=nrm((HEADS, out_dim)),
                    b=nrm((out_dim,)))

    return dict(
        drug_gcn=gcn_stack(DRUG_IN),
        dis_gcn=gcn_stack(DIS_IN),
        emb0=nrm((10, HID)), emb1=nrm((5, HID)),          # AtomEncoder tables
        gat=[gat_params(HID, HID), gat_params(HID, HID), gat_params(HID, OUT)],
        conv1_w=nrm((6, 3, 3)), conv1_b=nrm((6,)),
        conv2_w=nrm((6, 6, 3)), conv2_b=nrm((6,)),
        lin1_w=nrm((192, 128)), lin1_b=nrm((128,)),
        lin2_w=nrm((128, 1)), lin2_b=nrm((1,)),
    )


# ----------------------------- main -------------------------------------------

if __name__ == "__main__":
    key = jax.random.PRNGKey(0)
    pkey, xkey1, xkey2, xkey3 = jax.random.split(key, 4)
    params = init_params(pkey)
    prep = prepare_params(params)   # one-time parameter preprocessing

    B = 4                       # number of (drug, disease, molecule) pairs
    N_PER_MOL = 6               # B * N_PER_MOL == N_MOL

    drug_x = jax.random.normal(xkey1, (N_DRUG, DRUG_IN), dtype=F32)
    dis_x = jax.random.normal(xkey2, (N_DIS, DIS_IN), dtype=F32)

    def ring_edges(n):
        s = jnp.arange(n)
        d = (s + 1) % n
        return jnp.stack([jnp.concatenate([s, d]), jnp.concatenate([d, s])])

    drug_adj = gcn_norm_adj(ring_edges(N_DRUG), N_DRUG)
    dis_adj = gcn_norm_adj(ring_edges(N_DIS), N_DIS)

    drug_idx = jnp.array([0, 3, 7, 12], dtype=jnp.int32)
    dis_idx = jnp.array([1, 5, 9, 14], dtype=jnp.int32)

    # Batched molecule: B chain graphs of N_PER_MOL atoms, 2 integer atom feats.
    mol_x = jnp.stack(
        [jax.random.randint(xkey3, (N_MOL,), 0, 10),
         jax.random.randint(jax.random.fold_in(xkey3, 1), (N_MOL,), 0, 5)],
        axis=1).astype(jnp.int32)
    srcs, dsts = [], []
    for g in range(B):
        s = jnp.arange(N_PER_MOL - 1) + g * N_PER_MOL
        srcs += [s, s + 1]
        dsts += [s + 1, s]
    mol_edges = jnp.stack([jnp.concatenate(srcs), jnp.concatenate(dsts)])
    mol_mask = gat_adj_mask(mol_edges, N_MOL)

    batch_vec = jnp.repeat(jnp.arange(B), N_PER_MOL)
    onehot = (batch_vec[None, :] == jnp.arange(B)[:, None]).astype(F32)
    mol_pool = onehot / jnp.sum(onehot, axis=1, keepdims=True)   # global_mean_pool

    fwd = jax.jit(my_model_forward)
    out = fwd(prep, drug_x, drug_adj, drug_idx, dis_x, dis_adj, dis_idx,
              mol_x, mol_mask, mol_pool)
    out = jax.block_until_ready(out)
    assert out.shape == (B, 1), out.shape
    print("KERNEL_OK")
</pallas_src>

<mosaic_0001>
module attributes {stable_mosaic.version = 11 : i64} {
  func.func @fused_forward_kernel(%arg0: memref<144x64xf32, #tpu.memory_space<vmem>>, %arg1: memref<216x256xf32, #tpu.memory_space<vmem>>, %arg2: memref<168x512xf32, #tpu.memory_space<vmem>>, %arg3: memref<1160x384xf32, #tpu.memory_space<vmem>>, %arg4: memref<1304x192xf32, #tpu.memory_space<vmem>>, %arg5: memref<8x128xf32, #tpu.memory_space<vmem>>) attributes {dimension_semantics = [], scalar_prefetch = 0 : i64, scratch_operands = 0 : i64, tpu.core_type = #tpu.core_type<tc>} {
    %c0 = arith.constant 0 : index
    %c0_0 = arith.constant 0 : index
    %0 = vector.load %arg0[%c0, %c0_0] : memref<144x64xf32, #tpu.memory_space<vmem>>, vector<32x64xf32>
    %c32 = arith.constant 32 : index
    %c0_1 = arith.constant 0 : index
    %1 = vector.load %arg0[%c32, %c0_1] : memref<144x64xf32, #tpu.memory_space<vmem>>, vector<32x32xf32>
    %c64 = arith.constant 64 : index
    %c0_2 = arith.constant 0 : index
    %2 = vector.load %arg0[%c64, %c0_2] : memref<144x64xf32, #tpu.memory_space<vmem>>, vector<16x32xf32>
    %c80 = arith.constant 80 : index
    %c0_3 = arith.constant 0 : index
    %3 = vector.load %arg0[%c80, %c0_3] : memref<144x64xf32, #tpu.memory_space<vmem>>, vector<24x32xf32>
    %c104 = arith.constant 104 : index
    %c0_4 = arith.constant 0 : index
    %4 = vector.load %arg0[%c104, %c0_4] : memref<144x64xf32, #tpu.memory_space<vmem>>, vector<24x24xf32>
    %c128 = arith.constant 128 : index
    %c0_5 = arith.constant 0 : index
    %5 = vector.load %arg0[%c128, %c0_5] : memref<144x64xf32, #tpu.memory_space<vmem>>, vector<8x24xf32>
    %c136 = arith.constant 136 : index
    %c0_6 = arith.constant 0 : index
    %6 = vector.load %arg0[%c136, %c0_6] : memref<144x64xf32, #tpu.memory_space<vmem>>, vector<2x16xf32>
    %c0_7 = arith.constant 0 : index
    %c0_8 = arith.constant 0 : index
    %7 = vector.load %arg1[%c0_7, %c0_8] : memref<216x256xf32, #tpu.memory_space<vmem>>, vector<64x64xf32>
    %c64_9 = arith.constant 64 : index
    %c0_10 = arith.constant 0 : index
    %8 = vector.load %arg1[%c64_9, %c0_10] : memref<216x256xf32, #tpu.memory_space<vmem>>, vector<64x64xf32>
    %c128_11 = arith.constant 128 : index
    %c0_12 = arith.constant 0 : index
    %9 = vector.load %arg1[%c128_11, %c0_12] : memref<216x256xf32, #tpu.memory_space<vmem>>, vector<64x256xf32>
    %c192 = arith.constant 192 : index
    %c0_13 = arith.constant 0 : index
    %10 = vector.load %arg1[%c192, %c0_13] : memref<216x256xf32, #tpu.memory_space<vmem>>, vector<1x64xf32>
    %c200 = arith.constant 200 : index
    %c0_14 = arith.constant 0 : index
    %11 = vector.load %arg1[%c200, %c0_14] : memref<216x256xf32, #tpu.memory_space<vmem>>, vector<1x64xf32>
    %c208 = arith.constant 208 : index
    %c0_15 = arith.constant 0 : index
    %12 = vector.load %arg1[%c208, %c0_15] : memref<216x256xf32, #tpu.memory_space<vmem>>, vector<1x256xf32>
    %13 = tpu.iota {dimensions = array<i32: 0>} : vector<32x64xi32>
    %14 = tpu.iota {dimensions = array<i32: 1>} : vector<32x64xi32>
    %c16_i32 = arith.constant 16 : i32
    %15 = vector.broadcast %c16_i32 : i32 to vector<32x64xi32>
    %16 = arith.cmpi slt, %13, %15 : vector<32x64xi32>
    %c32_i32 = arith.constant 32 : i32
    %17 = vector.broadcast %c32_i32 : i32 to vector<32x64xi32>
    %18 = arith.cmpi slt, %14, %17 : vector<32x64xi32>
    %19 = arith.xori %16, %18 : vector<32x64xi1>
    %cst = arith.constant dense<true> : vector<32x64xi1>
    %20 = arith.xori %19, %cst : vector<32x64xi1>
    %cst_16 = arith.constant 6.250000e-02 : f32
    %cst_17 = arith.constant 0.000000e+00 : f32
    %21 = vector.broadcast %cst_16 : f32 to vector<32x64xf32>
    %22 = vector.broadcast %cst_17 : f32 to vector<32x64xf32>
    %23 = arith.select %20, %21, %22 : vector<32x64xi1>, vector<32x64xf32>
    %cst_18 = arith.constant dense<0.000000e+00> : vector<32x64xf32>
    %24 = tpu.matmul %0, %7, %cst_18 {dimension_numbers = #tpu.dot_dimension_numbers<[1], [0], [0], [1], [0, 0, 1, 1], [], []>} : vector<32x64xf32>, vector<64x64xf32>, vector<32x64xf32> -> vector<32x64xf32>
    %cst_19 = arith.constant dense<0.000000e+00> : vector<32x64xf32>
    %25 = tpu.matmul %1, %24, %cst_19 {dimension_numbers = #tpu.dot_dimension_numbers<[1], [0], [0], [1], [0, 0, 1, 1], [], []>} : vector<32x32xf32>, vector<32x64xf32>, vector<32x64xf32> -> vector<32x64xf32>
    %26 = vector.broadcast %10 : vector<1x64xf32> to vector<32x64xf32>
    %27 = arith.addf %25, %26 : vector<32x64xf32>
    %28 = arith.mulf %23, %27 : vector<32x64xf32>
    %cst_20 = arith.constant dense<0.000000e+00> : vector<64xf32>
    %29 = vector.multi_reduction <add>, %28, %cst_20 [0] : vector<32x64xf32> to vector<64xf32>
    %30 = vector.shape_cast %29 : vector<64xf32> to vector<1x64xf32>
    %31 = vector.broadcast %30 : vector<1x64xf32> to vector<32x64xf32>
    %32 = arith.subf %27, %31 : vector<32x64xf32>
    %33 = arith.mulf %23, %32 : vector<32x64xf32>
    %34 = arith.mulf %33, %32 : vector<32x64xf32>
    %cst_21 = arith.constant dense<0.000000e+00> : vector<64xf32>
    %35 = vector.multi_reduction <add>, %34, %cst_21 [0] : vector<32x64xf32> to vector<64xf32>
    %36 = vector.shape_cast %35 : vector<64xf32> to vector<1x64xf32>
    %cst_22 = arith.constant 9.99999974E-6 : f32
    %37 = vector.broadcast %cst_22 : f32 to vector<1x64xf32>
    %38 = arith.addf %36, %37 : vector<1x64xf32>
    %39 = math.rsqrt %38 : vector<1x64xf32>
    %40 = vector.broadcast %39 : vector<1x64xf32> to vector<32x64xf32>
    %41 = arith.mulf %32, %40 : vector<32x64xf32>
    %cst_23 = arith.constant 0.000000e+00 : f32
    %42 = vector.broadcast %cst_23 : f32 to vector<32x64xf32>
    %43 = arith.maximumf %41, %42 : vector<32x64xf32>
    %cst_24 = arith.constant dense<0.000000e+00> : vector<32x64xf32>
    %44 = tpu.matmul %43, %8, %cst_24 {dimension_numbers = #tpu.dot_dimension_numbers<[1], [0], [0], [1], [0, 0, 1, 1], [], []>} : vector<32x64xf32>, vector<64x64xf32>, vector<32x64xf32> -> vector<32x64xf32>
    %cst_25 = arith.constant dense<0.000000e+00> : vector<32x64xf32>
    %45 = tpu.matmul %1, %44, %cst_25 {dimension_numbers = #tpu.dot_dimension_numbers<[1], [0], [0], [1], [0, 0, 1, 1], [], []>} : vector<32x32xf32>, vector<32x64xf32>, vector<32x64xf32> -> vector<32x64xf32>
    %46 = vector.broadcast %11 : vector<1x64xf32> to vector<32x64xf32>
    %47 = arith.addf %45, %46 : vector<32x64xf32>
    %48 = arith.mulf %23, %47 : vector<32x64xf32>
    %cst_26 = arith.constant dense<0.000000e+00> : vector<64xf32>
    %49 = vector.multi_reduction <add>, %48, %cst_26 [0] : vector<32x64xf32> to vector<64xf32>
    %50 = vector.shape_cast %49 : vector<64xf32> to vector<1x64xf32>
    %51 = vector.broadcast %50 : vector<1x64xf32> to vector<32x64xf32>
    %52 = arith.subf %47, %51 : vector<32x64xf32>
    %53 = arith.mulf %23, %52 : vector<32x64xf32>
    %54 = arith.mulf %53, %52 : vector<32x64xf32>
    %cst_27 = arith.constant dense<0.000000e+00> : vector<64xf32>
    %55 = vector.multi_reduction <add>, %54, %cst_27 [0] : vector<32x64xf32> to vector<64xf32>
    %56 = vector.shape_cast %55 : vector<64xf32> to vector<1x64xf32>
    %cst_28 = arith.constant 9.99999974E-6 : f32
    %57 = vector.broadcast %cst_28 : f32 to vector<1x64xf32>
    %58 = arith.addf %56, %57 : vector<1x64xf32>
    %59 = math.rsqrt %58 : vector<1x64xf32>
    %60 = vector.broadcast %59 : vector<1x64xf32> to vector<32x64xf32>
    %61 = arith.mulf %52, %60 : vector<32x64xf32>
    %cst_29 = arith.constant 0.000000e+00 : f32
    %62 = vector.broadcast %cst_29 : f32 to vector<32x64xf32>
    %63 = arith.maximumf %61, %62 : vector<32x64xf32>
    %cst_30 = arith.constant dense<0.000000e+00> : vector<16x64xf32>
    %64 = tpu.matmul %2, %63, %cst_30 {dimension_numbers = #tpu.dot_dimension_numbers<[1], [0], [0], [1], [0, 0, 1, 1], [], []>} : vector<16x32xf32>, vector<32x64xf32>, vector<16x64xf32> -> vector<16x64xf32>
    %cst_31 = arith.constant dense<0.000000e+00> : vector<16x256xf32>
    %65 = tpu.matmul %64, %9, %cst_31 {dimension_numbers = #tpu.dot_dimension_numbers<[1], [0], [0], [1], [0, 0, 1, 1], [], []>} : vector<16x64xf32>, vector<64x256xf32>, vector<16x256xf32> -> vector<16x256xf32>
    %66 = vector.broadcast %12 : vector<1x256xf32> to vector<16x256xf32>
    %67 = arith.addf %65, %66 : vector<16x256xf32>
    %68 = vector.extract_strided_slice %67 {offsets = [0, 0], sizes = [8, 128], strides = [1, 1]} : vector<16x256xf32> to vector<8x128xf32>
    %69 = vector.extract_strided_slice %67 {offsets = [8, 128], sizes = [8, 128], strides = [1, 1]} : vector<16x256xf32> to vector<8x128xf32>
    %c0_32 = arith.constant 0 : index
    %c0_33 = arith.constant 0 : index
    %70 = vector.load %arg2[%c0_32, %c0_33] : memref<168x512xf32, #tpu.memory_space<vmem>>, vector<32x128xf32>
    %c32_34 = arith.constant 32 : index
    %c0_35 = arith.constant 0 : index
    %71 = vector.load %arg2[%c32_34, %c0_35] : memref<168x512xf32, #tpu.memory_space<vmem>>, vector<4x128xf32>
    %c40 = arith.constant 40 : index
    %c0_36 = arith.constant 0 : index
    %72 = vector.load %arg2[%c40, %c0_36] : memref<168x512xf32, #tpu.memory_space<vmem>>, vector<4x128xf32>
    %c48 = arith.constant 48 : index
    %c0_37 = arith.constant 0 : index
    %73 = vector.load %arg2[%c48, %c0_37] : memref<168x512xf32, #tpu.memory_space<vmem>>, vector<1x32xf32>
    %cst_38 = arith.constant dense<0.000000e+00> : vector<24x128xf32>
    %74 = tpu.matmul %3, %70, %cst_38 {dimension_numbers = #tpu.dot_dimension_numbers<[1], [0], [0], [1], [0, 0, 1, 1], [], []>} : vector<24x32xf32>, vector<32x128xf32>, vector<24x128xf32> -> vector<24x128xf32>
    %cst_39 = arith.constant dense<0.000000e+00> : vector<4x24xf32>
    %75 = tpu.matmul %71, %74, %cst_39 {dimension_numbers = #tpu.dot_dimension_numbers<[1], [1], [0], [0], [0, 0, 1, 0], [], []>} : vector<4x128xf32>, vector<24x128xf32>, vector<4x24xf32> -> vector<4x24xf32>
    %cst_40 = arith.constant dense<0.000000e+00> : vector<4x24xf32>
    %76 = tpu.matmul %72, %74, %cst_40 {dimension_numbers = #tpu.dot_dimension_numbers<[1], [1], [0], [0], [0, 0, 1, 0], [], []>} : vector<4x128xf32>, vector<24x128xf32>, vector<4x24xf32> -> vector<4x24xf32>
    %77 = vector.shape_cast %76 : vector<4x24xf32> to vector<4x24x1xf32>
    %78 = vector.shape_cast %75 : vector<4x24xf32> to vector<4x1x24xf32>
    %79 = vector.broadcast %77 : vector<4x24x1xf32> to vector<4x24x24xf32>
    %80 = vector.broadcast %78 : vector<4x1x24xf32> to vector<4x24x24xf32>
    %81 = arith.addf %79, %80 : vector<4x24x24xf32>
    %cst_41 = arith.constant 0.000000e+00 : f32
    %82 = vector.broadcast %cst_41 : f32 to vector<4x24x24xf32>
    %83 = arith.cmpf ogt, %81, %82 : vector<4x24x24xf32>
    %cst_42 = arith.constant 2.000000e-01 : f32
    %84 = vector.broadcast %cst_42 : f32 to vector<4x24x24xf32>
    %85 = arith.mulf %84, %81 : vector<4x24x24xf32>
    %86 = arith.select %83, %81, %85 : vector<4x24x24xi1>, vector<4x24x24xf32>
    %87 = vector.shape_cast %4 : vector<24x24xf32> to vector<1x24x24xf32>
    %88 = vector.broadcast %87 : vector<1x24x24xf32> to vector<4x24x24xf32>
    %89 = arith.addf %86, %88 : vector<4x24x24xf32>
    %cst_43 = arith.constant dense<0xFF800000> : vector<4x24xf32>
    %90 = vector.multi_reduction <maximumf>, %89, %cst_43 [2] : vector<4x24x24xf32> to vector<4x24xf32>
    %91 = vector.shape_cast %90 : vector<4x24xf32> to vector<4x24x1xf32>
    %92 = vector.broadcast %91 : vector<4x24x1xf32> to vector<4x24x24xf32>
    %93 = arith.subf %89, %92 : vector<4x24x24xf32>
    %94 = math.exp %93 : vector<4x24x24xf32>
    %cst_44 = arith.constant dense<0.000000e+00> : vector<4x24xf32>
    %95 = vector.multi_reduction <add>, %94, %cst_44 [2] : vector<4x24x24xf32> to vector<4x24xf32>
    %96 = vector.shape_cast %95 : vector<4x24xf32> to vector<4x24x1xf32>
    %97 = tpu.reciprocal %96 {approx = true} : vector<4x24x1xf32> -> vector<4x24x1xf32>
    %98 = vector.broadcast %97 : vector<4x24x1xf32> to vector<4x24x24xf32>
    %99 = arith.mulf %94, %98 : vector<4x24x24xf32>
    %cst_45 = arith.constant 0.000000e+00 : f32
    %100 = vector.broadcast %cst_45 : f32 to vector<24x32xf32>
    %101 = vector.extract_strided_slice %99 {offsets = [0, 0, 0], sizes = [1, 24, 24], strides = [1, 1, 1]} : vector<4x24x24xf32> to vector<1x24x24xf32>
    %102 = vector.shape_cast %101 : vector<1x24x24xf32> to vector<24x24xf32>
    %103 = vector.extract_strided_slice %74 {offsets = [0, 0], sizes = [24, 32], strides = [1, 1]} : vector<24x128xf32> to vector<24x32xf32>
    %cst_46 = arith.constant dense<0.000000e+00> : vector<24x32xf32>
    %104 = tpu.matmul %102, %103, %cst_46 {dimension_numbers = #tpu.dot_dimension_numbers<[1], [0], [0], [1], [0, 0, 1, 1], [], []>} : vector<24x24xf32>, vector<24x32xf32>, vector<24x32xf32> -> vector<24x32xf32>
    %105 = arith.addf %100, %104 : vector<24x32xf32>
    %106 = vector.extract_strided_slice %99 {offsets = [1, 0, 0], sizes = [1, 24, 24], strides = [1, 1, 1]} : vector<4x24x24xf32> to vector<1x24x24xf32>
    %107 = vector.shape_cast %106 : vector<1x24x24xf32> to vector<24x24xf32>
    %108 = vector.extract_strided_slice %74 {offsets = [0, 32], sizes = [24, 32], strides = [1, 1]} : vector<24x128xf32> to vector<24x32xf32>
    %cst_47 = arith.constant dense<0.000000e+00> : vector<24x32xf32>
    %109 = tpu.matmul %107, %108, %cst_47 {dimension_numbers = #tpu.dot_dimension_numbers<[1], [0], [0], [1], [0, 0, 1, 1], [], []>} : vector<24x24xf32>, vector<24x32xf32>, vector<24x32xf32> -> vector<24x32xf32>
    %110 = arith.addf %105, %109 : vector<24x32xf32>
    %111 = vector.extract_strided_slice %99 {offsets = [2, 0, 0], sizes = [1, 24, 24], strides = [1, 1, 1]} : vector<4x24x24xf32> to vector<1x24x24xf32>
    %112 = vector.shape_cast %111 : vector<1x24x24xf32> to vector<24x24xf32>
    %113 = vector.extract_strided_slice %74 {offsets = [0, 64], sizes = [24, 32], strides = [1, 1]} : vector<24x128xf32> to vector<24x32xf32>
    %cst_48 = arith.constant dense<0.000000e+00> : vector<24x32xf32>
    %114 = tpu.matmul %112, %113, %cst_48 {dimension_numbers = #tpu.dot_dimension_numbers<[1], [0], [0], [1], [0, 0, 1, 1], [], []>} : vector<24x24xf32>, vector<24x32xf32>, vector<24x32xf32> -> vector<24x32xf32>
    %115 = arith.addf %110, %114 : vector<24x32xf32>
    %116 = vector.extract_strided_slice %99 {offsets = [3, 0, 0], sizes = [1, 24, 24], strides = [1, 1, 1]} : vector<4x24x24xf32> to vector<1x24x24xf32>
    %117 = vector.shape_cast %116 : vector<1x24x24xf32> to vector<24x24xf32>
    %118 = vector.extract_strided_slice %74 {offsets = [0, 96], sizes = [24, 32], strides = [1, 1]} : vector<24x128xf32> to vector<24x32xf32>
    %cst_49 = arith.constant dense<0.000000e+00> : vector<24x32xf32>
    %119 = tpu.matmul %117, %118, %cst_49 {dimension_numbers = #tpu.dot_dimension_numbers<[1], [0], [0], [1], [0, 0, 1, 1], [], []>} : vector<24x24xf32>, vector<24x32xf32>, vector<24x32xf32> -> vector<24x32xf32>
    %120 = arith.addf %115, %119 : vector<24x32xf32>
    %cst_50 = arith.constant 2.500000e-01 : f32
    %121 = vector.broadcast %cst_50 : f32 to vector<24x32xf32>
    %122 = arith.mulf %120, %121 : vector<24x32xf32>
    %123 = vector.broadcast %73 : vector<1x32xf32> to vector<24x32xf32>
    %124 = arith.addf %122, %123 : vector<24x32xf32>
    %cst_51 = arith.constant dense<0.000000e+00> : vector<32xf32>
    %125 = vector.multi_reduction <add>, %124, %cst_51 [0] : vector<24x32xf32> to vector<32xf32>
    %126 = vector.shape_cast %125 : vector<32xf32> to vector<1x32xf32>
    %cst_52 = arith.constant 2.400000e+01 : f32
    %127 = vector.broadcast %cst_52 : f32 to vector<1x32xf32>
    %128 = arith.divf %126, %127 : vector<1x32xf32>
    %129 = vector.broadcast %128 : vector<1x32xf32> to vector<24x32xf32>
    %130 = arith.subf %124, %129 : vector<24x32xf32>
    %131 = arith.mulf %130, %130 : vector<24x32xf32>
    %cst_53 = arith.constant dense<0.000000e+00> : vector<32xf32>
    %132 = vector.multi_reduction <add>, %131, %cst_53 [0] : vector<24x32xf32> to vector<32xf32>
    %133 = vector.shape_cast %132 : vector<32xf32> to vector<1x32xf32>
    %cst_54 = arith.constant 2.400000e+01 : f32
    %134 = vector.broadcast %cst_54 : f32 to vector<1x32xf32>
    %135 = arith.divf %133, %134 : vector<1x32xf32>
    %cst_55 = arith.constant 9.99999974E-6 : f32
    %136 = vector.broadcast %cst_55 : f32 to vector<1x32xf32>
    %137 = arith.addf %135, %136 : vector<1x32xf32>
    %138 = math.rsqrt %137 : vector<1x32xf32>
    %139 = vector.broadcast %138 : vector<1x32xf32> to vector<24x32xf32>
    %140 = arith.mulf %130, %139 : vector<24x32xf32>
    %cst_56 = arith.constant 0.000000e+00 : f32
    %141 = vector.broadcast %cst_56 : f32 to vector<24x32xf32>
    %142 = arith.maximumf %140, %141 : vector<24x32xf32>
    %c56 = arith.constant 56 : index
    %c0_57 = arith.constant 0 : index
    %143 = vector.load %arg2[%c56, %c0_57] : memref<168x512xf32, #tpu.memory_space<vmem>>, vector<32x128xf32>
    %c88 = arith.constant 88 : index
    %c0_58 = arith.constant 0 : index
    %144 = vector.load %arg2[%c88, %c0_58] : memref<168x512xf32, #tpu.memory_space<vmem>>, vector<4x128xf32>
    %c96 = arith.constant 96 : index
    %c0_59 = arith.constant 0 : index
    %145 = vector.load %arg2[%c96, %c0_59] : memref<168x512xf32, #tpu.memory_space<vmem>>, vector<4x128xf32>
    %c104_60 = arith.constant 104 : index
    %c0_61 = arith.constant 0 : index
    %146 = vector.load %arg2[%c104_60, %c0_61] : memref<168x512xf32, #tpu.memory_space<vmem>>, vector<1x32xf32>
    %cst_62 = arith.constant dense<0.000000e+00> : vector<24x128xf32>
    %147 = tpu.matmul %142, %143, %cst_62 {dimension_numbers = #tpu.dot_dimension_numbers<[1], [0], [0], [1], [0, 0, 1, 1], [], []>} : vector<24x32xf32>, vector<32x128xf32>, vector<24x128xf32> -> vector<24x128xf32>
    %cst_63 = arith.constant dense<0.000000e+00> : vector<4x24xf32>
    %148 = tpu.matmul %144, %147, %cst_63 {dimension_numbers = #tpu.dot_dimension_numbers<[1], [1], [0], [0], [0, 0, 1, 0], [], []>} : vector<4x128xf32>, vector<24x128xf32>, vector<4x24xf32> -> vector<4x24xf32>
    %cst_64 = arith.constant dense<0.000000e+00> : vector<4x24xf32>
    %149 = tpu.matmul %145, %147, %cst_64 {dimension_numbers = #tpu.dot_dimension_numbers<[1], [1], [0], [0], [0, 0, 1, 0], [], []>} : vector<4x128xf32>, vector<24x128xf32>, vector<4x24xf32> -> vector<4x24xf32>
    %150 = vector.shape_cast %149 : vector<4x24xf32> to vector<4x24x1xf32>
    %151 = vector.shape_cast %148 : vector<4x24xf32> to vector<4x1x24xf32>
    %152 = vector.broadcast %150 : vector<4x24x1xf32> to vector<4x24x24xf32>
    %153 = vector.broadcast %151 : vector<4x1x24xf32> to vector<4x24x24xf32>
    %154 = arith.addf %152, %153 : vector<4x24x24xf32>
    %cst_65 = arith.constant 0.000000e+00 : f32
    %155 = vector.broadcast %cst_65 : f32 to vector<4x24x24xf32>
    %156 = arith.cmpf ogt, %154, %155 : vector<4x24x24xf32>
    %cst_66 = arith.constant 2.000000e-01 : f32
    %157 = vector.broadcast %cst_66 : f32 to vector<4x24x24xf32>
    %158 = arith.mulf %157, %154 : vector<4x24x24xf32>
    %159 = arith.select %156, %154, %158 : vector<4x24x24xi1>, vector<4x24x24xf32>
    %160 = vector.shape_cast %4 : vector<24x24xf32> to vector<1x24x24xf32>
    %161 = vector.broadcast %160 : vector<1x24x24xf32> to vector<4x24x24xf32>
    %162 = arith.addf %159, %161 : vector<4x24x24xf32>
    %cst_67 = arith.constant dense<0xFF800000> : vector<4x24xf32>
    %163 = vector.multi_reduction <maximumf>, %162, %cst_67 [2] : vector<4x24x24xf32> to vector<4x24xf32>
    %164 = vector.shape_cast %163 : vector<4x24xf32> to vector<4x24x1xf32>
    %165 = vector.broadcast %164 : vector<4x24x1xf32> to vector<4x24x24xf32>
    %166 = arith.subf %162, %165 : vector<4x24x24xf32>
    %167 = math.exp %166 : vector<4x24x24xf32>
    %cst_68 = arith.constant dense<0.000000e+00> : vector<4x24xf32>
    %168 = vector.multi_reduction <add>, %167, %cst_68 [2] : vector<4x24x24xf32> to vector<4x24xf32>
    %169 = vector.shape_cast %168 : vector<4x24xf32> to vector<4x24x1xf32>
    %170 = tpu.reciprocal %169 {approx = true} : vector<4x24x1xf32> -> vector<4x24x1xf32>
    %171 = vector.broadcast %170 : vector<4x24x1xf32> to vector<4x24x24xf32>
    %172 = arith.mulf %167, %171 : vector<4x24x24xf32>
    %cst_69 = arith.constant 0.000000e+00 : f32
    %173 = vector.broadcast %cst_69 : f32 to vector<24x32xf32>
    %174 = vector.extract_strided_slice %172 {offsets = [0, 0, 0], sizes = [1, 24, 24], strides = [1, 1, 1]} : vector<4x24x24xf32> to vector<1x24x24xf32>
    %175 = vector.shape_cast %174 : vector<1x24x24xf32> to vector<24x24xf32>
    %176 = vector.extract_strided_slice %147 {offsets = [0, 0], sizes = [24, 32], strides = [1, 1]} : vector<24x128xf32> to vector<24x32xf32>
    %cst_70 = arith.constant dense<0.000000e+00> : vector<24x32xf32>
    %177 = tpu.matmul %175, %176, %cst_70 {dimension_numbers = #tpu.dot_dimension_numbers<[1], [0], [0], [1], [0, 0, 1, 1], [], []>} : vector<24x24xf32>, vector<24x32xf32>, vector<24x32xf32> -> vector<24x32xf32>
    %178 = arith.addf %173, %177 : vector<24x32xf32>
    %179 = vector.extract_strided_slice %172 {offsets = [1, 0, 0], sizes = [1, 24, 24], strides = [1, 1, 1]} : vector<4x24x24xf32> to vector<1x24x24xf32>
    %180 = vector.shape_cast %179 : vector<1x24x24xf32> to vector<24x24xf32>
    %181 = vector.extract_strided_slice %147 {offsets = [0, 32], sizes = [24, 32], strides = [1, 1]} : vector<24x128xf32> to vector<24x32xf32>
    %cst_71 = arith.constant dense<0.000000e+00> : vector<24x32xf32>
    %182 = tpu.matmul %180, %181, %cst_71 {dimension_numbers = #tpu.dot_dimension_numbers<[1], [0], [0], [1], [0, 0, 1, 1], [], []>} : vector<24x24xf32>, vector<24x32xf32>, vector<24x32xf32> -> vector<24x32xf32>
    %183 = arith.addf %178, %182 : vector<24x32xf32>
    %184 = vector.extract_strided_slice %172 {offsets = [2, 0, 0], sizes = [1, 24, 24], strides = [1, 1, 1]} : vector<4x24x24xf32> to vector<1x24x24xf32>
    %185 = vector.shape_cast %184 : vector<1x24x24xf32> to vector<24x24xf32>
    %186 = vector.extract_strided_slice %147 {offsets = [0, 64], sizes = [24, 32], strides = [1, 1]} : vector<24x128xf32> to vector<24x32xf32>
    %cst_72 = arith.constant dense<0.000000e+00> : vector<24x32xf32>
    %187 = tpu.matmul %185, %186, %cst_72 {dimension_numbers = #tpu.dot_dimension_numbers<[1], [0], [0], [1], [0, 0, 1, 1], [], []>} : vector<24x24xf32>, vector<24x32xf32>, vector<24x32xf32> -> vector<24x32xf32>
    %188 = arith.addf %183, %187 : vector<24x32xf32>
    %189 = vector.extract_strided_slice %172 {offsets = [3, 0, 0], sizes = [1, 24, 24], strides = [1, 1, 1]} : vector<4x24x24xf32> to vector<1x24x24xf32>
    %190 = vector.shape_cast %189 : vector<1x24x24xf32> to vector<24x24xf32>
    %191 = vector.extract_strided_slice %147 {offsets = [0, 96], sizes = [24, 32], strides = [1, 1]} : vector<24x128xf32> to vector<24x32xf32>
    %cst_73 = arith.constant dense<0.000000e+00> : vector<24x32xf32>
    %192 = tpu.matmul %190, %191, %cst_73 {dimension_numbers = #tpu.dot_dimension_numbers<[1], [0], [0], [1], [0, 0, 1, 1], [], []>} : vector<24x24xf32>, vector<24x32xf32>, vector<24x32xf32> -> vector<24x32xf32>
    %193 = arith.addf %188, %192 : vector<24x32xf32>
    %cst_74 = arith.constant 2.500000e-01 : f32
    %194 = vector.broadcast %cst_74 : f32 to vector<24x32xf32>
    %195 = arith.mulf %193, %194 : vector<24x32xf32>
    %196 = vector.broadcast %146 : vector<1x32xf32> to vector<24x32xf32>
    %197 = arith.addf %195, %196 : vector<24x32xf32>
    %cst_75 = arith.constant dense<0.000000e+00> : vector<32xf32>
    %198 = vector.multi_reduction <add>, %197, %cst_75 [0] : vector<24x32xf32> to vector<32xf32>
    %199 = vector.shape_cast %198 : vector<32xf32> to vector<1x32xf32>
    %cst_76 = arith.constant 2.400000e+01 : f32
    %200 = vector.broadcast %cst_76 : f32 to vector<1x32xf32>
    %201 = arith.divf %199, %200 : vector<1x32xf32>
    %202 = vector.broadcast %201 : vector<1x32xf32> to vector<24x32xf32>
    %203 = arith.subf %197, %202 : vector<24x32xf32>
    %204 = arith.mulf %203, %203 : vector<24x32xf32>
    %cst_77 = arith.constant dense<0.000000e+00> : vector<32xf32>
    %205 = vector.multi_reduction <add>, %204, %cst_77 [0] : vector<24x32xf32> to vector<32xf32>
    %206 = vector.shape_cast %205 : vector<32xf32> to vector<1x32xf32>
    %cst_78 = arith.constant 2.400000e+01 : f32
    %207 = vector.broadcast %cst_78 : f32 to vector<1x32xf32>
    %208 = arith.divf %206, %207 : vector<1x32xf32>
    %cst_79 = arith.constant 9.99999974E-6 : f32
    %209 = vector.broadcast %cst_79 : f32 to vector<1x32xf32>
    %210 = arith.addf %208, %209 : vector<1x32xf32>
    %211 = math.rsqrt %210 : vector<1x32xf32>
    %212 = vector.broadcast %211 : vector<1x32xf32> to vector<24x32xf32>
    %213 = arith.mulf %203, %212 : vector<24x32xf32>
    %cst_80 = arith.constant 0.000000e+00 : f32
    %214 = vector.broadcast %cst_80 : f32 to vector<24x32xf32>
    %215 = arith.maximumf %213, %214 : vector<24x32xf32>
    %c112 = arith.constant 112 : index
    %c0_81 = arith.constant 0 : index
    %216 = vector.load %arg2[%c112, %c0_81] : memref<168x512xf32, #tpu.memory_space<vmem>>, vector<32x512xf32>
    %c144 = arith.constant 144 : index
    %c0_82 = arith.constant 0 : index
    %217 = vector.load %arg2[%c144, %c0_82] : memref<168x512xf32, #tpu.memory_space<vmem>>, vector<4x512xf32>
    %c152 = arith.constant 152 : index
    %c0_83 = arith.constant 0 : index
    %218 = vector.load %arg2[%c152, %c0_83] : memref<168x512xf32, #tpu.memory_space<vmem>>, vector<4x512xf32>
    %cst_84 = arith.constant dense<0.000000e+00> : vector<24x512xf32>
    %219 = tpu.matmul %215, %216, %cst_84 {dimension_numbers = #tpu.dot_dimension_numbers<[1], [0], [0], [1], [0, 0, 1, 1], [], []>} : vector<24x32xf32>, vector<32x512xf32>, vector<24x512xf32> -> vector<24x512xf32>
    %cst_85 = arith.constant dense<0.000000e+00> : vector<4x24xf32>
    %220 = tpu.matmul %217, %219, %cst_85 {dimension_numbers = #tpu.dot_dimension_numbers<[1], [1], [0], [0], [0, 0, 1, 0], [], []>} : vector<4x512xf32>, vector<24x512xf32>, vector<4x24xf32> -> vector<4x24xf32>
    %cst_86 = arith.constant dense<0.000000e+00> : vector<4x24xf32>
    %221 = tpu.matmul %218, %219, %cst_86 {dimension_numbers = #tpu.dot_dimension_numbers<[1], [1], [0], [0], [0, 0, 1, 0], [], []>} : vector<4x512xf32>, vector<24x512xf32>, vector<4x24xf32> -> vector<4x24xf32>
    %222 = vector.shape_cast %221 : vector<4x24xf32> to vector<4x24x1xf32>
    %223 = vector.shape_cast %220 : vector<4x24xf32> to vector<4x1x24xf32>
    %224 = vector.broadcast %222 : vector<4x24x1xf32> to vector<4x24x24xf32>
    %225 = vector.broadcast %223 : vector<4x1x24xf32> to vector<4x24x24xf32>
    %226 = arith.addf %224, %225 : vector<4x24x24xf32>
    %cst_87 = arith.constant 0.000000e+00 : f32
    %227 = vector.broadcast %cst_87 : f32 to vector<4x24x24xf32>
    %228 = arith.cmpf ogt, %226, %227 : vector<4x24x24xf32>
    %cst_88 = arith.constant 2.000000e-01 : f32
    %229 = vector.broadcast %cst_88 : f32 to vector<4x24x24xf32>
    %230 = arith.mulf %229, %226 : vector<4x24x24xf32>
    %231 = arith.select %228, %226, %230 : vector<4x24x24xi1>, vector<4x24x24xf32>
    %232 = vector.shape_cast %4 : vector<24x24xf32> to vector<1x24x24xf32>
    %233 = vector.broadcast %232 : vector<1x24x24xf32> to vector<4x24x24xf32>
    %234 = arith.addf %231, %233 : vector<4x24x24xf32>
    %cst_89 = arith.constant dense<0xFF800000> : vector<4x24xf32>
    %235 = vector.multi_reduction <maximumf>, %234, %cst_89 [2] : vector<4x24x24xf32> to vector<4x24xf32>
    %236 = vector.shape_cast %235 : vector<4x24xf32> to vector<4x24x1xf32>
    %237 = vector.broadcast %236 : vector<4x24x1xf32> to vector<4x24x24xf32>
    %238 = arith.subf %234, %237 : vector<4x24x24xf32>
    %239 = math.exp %238 : vector<4x24x24xf32>
    %cst_90 = arith.constant dense<0.000000e+00> : vector<4x24xf32>
    %240 = vector.multi_reduction <add>, %239, %cst_90 [2] : vector<4x24x24xf32> to vector<4x24xf32>
    %241 = vector.shape_cast %240 : vector<4x24xf32> to vector<4x24x1xf32>
    %242 = tpu.reciprocal %241 {approx = true} : vector<4x24x1xf32> -> vector<4x24x1xf32>
    %243 = vector.broadcast %242 : vector<4x24x1xf32> to vector<4x24x24xf32>
    %244 = arith.mulf %239, %243 : vector<4x24x24xf32>
    %cst_91 = arith.constant 0.000000e+00 : f32
    %245 = vector.broadcast %cst_91 : f32 to vector<8x128xf32>
    %246 = vector.extract_strided_slice %244 {offsets = [0, 0, 0], sizes = [1, 24, 24], strides = [1, 1, 1]} : vector<4x24x24xf32> to vector<1x24x24xf32>
    %247 = vector.shape_cast %246 : vector<1x24x24xf32> to vector<24x24xf32>
    %cst_92 = arith.constant dense<0.000000e+00> : vector<8x24xf32>
    %248 = tpu.matmul %5, %247, %cst_92 {dimension_numbers = #tpu.dot_dimension_numbers<[1], [0], [0], [1], [0, 0, 1, 1], [], []>} : vector<8x24xf32>, vector<24x24xf32>, vector<8x24xf32> -> vector<8x24xf32>
    %249 = vector.extract_strided_slice %219 {offsets = [0, 0], sizes = [24, 128], strides = [1, 1]} : vector<24x512xf32> to vector<24x128xf32>
    %cst_93 = arith.constant dense<0.000000e+00> : vector<8x128xf32>
    %250 = tpu.matmul %248, %249, %cst_93 {dimension_numbers = #tpu.dot_dimension_numbers<[1], [0], [0], [1], [0, 0, 1, 1], [], []>} : vector<8x24xf32>, vector<24x128xf32>, vector<8x128xf32> -> vector<8x128xf32>
    %251 = arith.addf %245, %250 : vector<8x128xf32>
    %252 = vector.extract_strided_slice %244 {offsets = [1, 0, 0], sizes = [1, 24, 24], strides = [1, 1, 1]} : vector<4x24x24xf32> to vector<1x24x24xf32>
    %253 = vector.shape_cast %252 : vector<1x24x24xf32> to vector<24x24xf32>
    %cst_94 = arith.constant dense<0.000000e+00> : vector<8x24xf32>
    %254 = tpu.matmul %5, %253, %cst_94 {dimension_numbers = #tpu.dot_dimension_numbers<[1], [0], [0], [1], [0, 0, 1, 1], [], []>} : vector<8x24xf32>, vector<24x24xf32>, vector<8x24xf32> -> vector<8x24xf32>
    %255 = vector.extract_strided_slice %219 {offsets = [0, 128], sizes = [24, 128], strides = [1, 1]} : vector<24x512xf32> to vector<24x128xf32>
    %cst_95 = arith.constant dense<0.000000e+00> : vector<8x128xf32>
    %256 = tpu.matmul %254, %255, %cst_95 {dimension_numbers = #tpu.dot_dimension_numbers<[1], [0], [0], [1], [0, 0, 1, 1], [], []>} : vector<8x24xf32>, vector<24x128xf32>, vector<8x128xf32> -> vector<8x128xf32>
    %257 = arith.addf %251, %256 : vector<8x128xf32>
    %258 = vector.extract_strided_slice %244 {offsets = [2, 0, 0], sizes = [1, 24, 24], strides = [1, 1, 1]} : vector<4x24x24xf32> to vector<1x24x24xf32>
    %259 = vector.shape_cast %258 : vector<1x24x24xf32> to vector<24x24xf32>
    %cst_96 = arith.constant dense<0.000000e+00> : vector<8x24xf32>
    %260 = tpu.matmul %5, %259, %cst_96 {dimension_numbers = #tpu.dot_dimension_numbers<[1], [0], [0], [1], [0, 0, 1, 1], [], []>} : vector<8x24xf32>, vector<24x24xf32>, vector<8x24xf32> -> vector<8x24xf32>
    %261 = vector.extract_strided_slice %219 {offsets = [0, 256], sizes = [24, 128], strides = [1, 1]} : vector<24x512xf32> to vector<24x128xf32>
    %cst_97 = arith.constant dense<0.000000e+00> : vector<8x128xf32>
    %262 = tpu.matmul %260, %261, %cst_97 {dimension_numbers = #tpu.dot_dimension_numbers<[1], [0], [0], [1], [0, 0, 1, 1], [], []>} : vector<8x24xf32>, vector<24x128xf32>, vector<8x128xf32> -> vector<8x128xf32>
    %263 = arith.addf %257, %262 : vector<8x128xf32>
    %264 = vector.extract_strided_slice %244 {offsets = [3, 0, 0], sizes = [1, 24, 24], strides = [1, 1, 1]} : vector<4x24x24xf32> to vector<1x24x24xf32>
    %265 = vector.shape_cast %264 : vector<1x24x24xf32> to vector<24x24xf32>
    %cst_98 = arith.constant dense<0.000000e+00> : vector<8x24xf32>
    %266 = tpu.matmul %5, %265, %cst_98 {dimension_numbers = #tpu.dot_dimension_numbers<[1], [0], [0], [1], [0, 0, 1, 1], [], []>} : vector<8x24xf32>, vector<24x24xf32>, vector<8x24xf32> -> vector<8x24xf32>
    %267 = vector.extract_strided_slice %219 {offsets = [0, 384], sizes = [24, 128], strides = [1, 1]} : vector<24x512xf32> to vector<24x128xf32>
    %cst_99 = arith.constant dense<0.000000e+00> : vector<8x128xf32>
    %268 = tpu.matmul %266, %267, %cst_99 {dimension_numbers = #tpu.dot_dimension_numbers<[1], [0], [0], [1], [0, 0, 1, 1], [], []>} : vector<8x24xf32>, vector<24x128xf32>, vector<8x128xf32> -> vector<8x128xf32>
    %269 = arith.addf %263, %268 : vector<8x128xf32>
    %cst_100 = arith.constant 2.500000e-01 : f32
    %270 = vector.broadcast %cst_100 : f32 to vector<8x128xf32>
    %271 = arith.mulf %269, %270 : vector<8x128xf32>
    %c160 = arith.constant 160 : index
    %c0_101 = arith.constant 0 : index
    %272 = vector.load %arg2[%c160, %c0_101] : memref<168x512xf32, #tpu.memory_space<vmem>>, vector<1x128xf32>
    %273 = vector.broadcast %272 : vector<1x128xf32> to vector<8x128xf32>
    %274 = arith.addf %271, %273 : vector<8x128xf32>
    %275 = tpu.concatenate %68, %274, %69 in 1 : vector<8x128xf32>, vector<8x128xf32>, vector<8x128xf32> -> vector<8x384xf32>
    %c0_102 = arith.constant 0 : index
    %c0_103 = arith.constant 0 : index
    %276 = vector.load %arg3[%c0_102, %c0_103] : memref<1160x384xf32, #tpu.memory_space<vmem>>, vector<384x384xf32>
    %c384 = arith.constant 384 : index
    %c0_104 = arith.constant 0 : index
    %277 = vector.load %arg3[%c384, %c0_104] : memref<1160x384xf32, #tpu.memory_space<vmem>>, vector<384x384xf32>
    %c1152 = arith.constant 1152 : index
    %c0_105 = arith.constant 0 : index
    %278 = vector.load %arg3[%c1152, %c0_105] : memref<1160x384xf32, #tpu.memory_space<vmem>>, vector<1x384xf32>
    %c768 = arith.constant 768 : index
    %c0_106 = arith.constant 0 : index
    %279 = vector.load %arg3[%c768, %c0_106] : memref<1160x384xf32, #tpu.memory_space<vmem>>, vector<384x384xf32>
    %cst_107 = arith.constant dense<0.000000e+00> : vector<8x384xf32>
    %280 = tpu.matmul %275, %276, %cst_107 {dimension_numbers = #tpu.dot_dimension_numbers<[1], [0], [0], [1], [0, 0, 1, 1], [], []>} : vector<8x384xf32>, vector<384x384xf32>, vector<8x384xf32> -> vector<8x384xf32>
    %cst_108 = arith.constant dense<0.000000e+00> : vector<8x384xf32>
    %281 = tpu.matmul %275, %277, %cst_108 {dimension_numbers = #tpu.dot_dimension_numbers<[1], [0], [0], [1], [0, 0, 1, 1], [], []>} : vector<8x384xf32>, vector<384x384xf32>, vector<8x384xf32> -> vector<8x384xf32>
    %282 = arith.maximumf %280, %281 : vector<8x384xf32>
    %283 = vector.broadcast %278 : vector<1x384xf32> to vector<8x384xf32>
    %284 = arith.addf %282, %283 : vector<8x384xf32>
    %285 = arith.mulf %284, %284 : vector<8x384xf32>
    %286 = tpu.concatenate %284, %285 in 0 : vector<8x384xf32>, vector<8x384xf32> -> vector<16x384xf32>
    %cst_109 = arith.constant dense<0.000000e+00> : vector<2x384xf32>
    %287 = tpu.matmul %6, %286, %cst_109 {dimension_numbers = #tpu.dot_dimension_numbers<[1], [0], [0], [1], [0, 0, 1, 1], [], []>} : vector<2x16xf32>, vector<16x384xf32>, vector<2x384xf32> -> vector<2x384xf32>
    %cst_110 = arith.constant dense<0.000000e+00> : vector<2x384xf32>
    %288 = tpu.matmul %287, %279, %cst_110 {dimension_numbers = #tpu.dot_dimension_numbers<[1], [0], [0], [1], [0, 0, 1, 1], [], []>} : vector<2x384xf32>, vector<384x384xf32>, vector<2x384xf32> -> vector<2x384xf32>
    %289 = vector.extract_strided_slice %288 {offsets = [0, 0], sizes = [1, 384], strides = [1, 1]} : vector<2x384xf32> to vector<1x384xf32>
    %290 = vector.extract_strided_slice %288 {offsets = [1, 0], sizes = [1, 384], strides = [1, 1]} : vector<2x384xf32> to vector<1x384xf32>
    %291 = arith.mulf %289, %289 : vector<1x384xf32>
    %292 = arith.subf %290, %291 : vector<1x384xf32>
    %cst_111 = arith.constant 0.000000e+00 : f32
    %293 = vector.broadcast %cst_111 : f32 to vector<1x384xf32>
    %294 = arith.maximumf %292, %293 : vector<1x384xf32>
    %295 = vector.broadcast %289 : vector<1x384xf32> to vector<8x384xf32>
    %296 = arith.subf %284, %295 : vector<8x384xf32>
    %cst_112 = arith.constant 9.99999974E-6 : f32
    %297 = vector.broadcast %cst_112 : f32 to vector<1x384xf32>
    %298 = arith.addf %294, %297 : vector<1x384xf32>
    %299 = math.rsqrt %298 : vector<1x384xf32>
    %300 = vector.broadcast %299 : vector<1x384xf32> to vector<8x384xf32>
    %301 = arith.mulf %296, %300 : vector<8x384xf32>
    %cst_113 = arith.constant 0.000000e+00 : f32
    %302 = vector.broadcast %cst_113 : f32 to vector<8x384xf32>
    %303 = arith.maximumf %301, %302 : vector<8x384xf32>
    %c0_114 = arith.constant 0 : index
    %c0_115 = arith.constant 0 : index
    %304 = vector.load %arg4[%c0_114, %c0_115] : memref<1304x192xf32, #tpu.memory_space<vmem>>, vector<384x192xf32>
    %c384_116 = arith.constant 384 : index
    %c0_117 = arith.constant 0 : index
    %305 = vector.load %arg4[%c384_116, %c0_117] : memref<1304x192xf32, #tpu.memory_space<vmem>>, vector<384x192xf32>
    %c960 = arith.constant 960 : index
    %c0_118 = arith.constant 0 : index
    %306 = vector.load %arg4[%c960, %c0_118] : memref<1304x192xf32, #tpu.memory_space<vmem>>, vector<1x192xf32>
    %c768_119 = arith.constant 768 : index
    %c0_120 = arith.constant 0 : index
    %307 = vector.load %arg4[%c768_119, %c0_120] : memref<1304x192xf32, #tpu.memory_space<vmem>>, vector<192x192xf32>
    %cst_121 = arith.constant dense<0.000000e+00> : vector<8x192xf32>
    %308 = tpu.matmul %303, %304, %cst_121 {dimension_numbers = #tpu.dot_dimension_numbers<[1], [0], [0], [1], [0, 0, 1, 1], [], []>} : vector<8x384xf32>, vector<384x192xf32>, vector<8x192xf32> -> vector<8x192xf32>
    %cst_122 = arith.constant dense<0.000000e+00> : vector<8x192xf32>
    %309 = tpu.matmul %303, %305, %cst_122 {dimension_numbers = #tpu.dot_dimension_numbers<[1], [0], [0], [1], [0, 0, 1, 1], [], []>} : vector<8x384xf32>, vector<384x192xf32>, vector<8x192xf32> -> vector<8x192xf32>
    %310 = arith.maximumf %308, %309 : vector<8x192xf32>
    %311 = vector.broadcast %306 : vector<1x192xf32> to vector<8x192xf32>
    %312 = arith.addf %310, %311 : vector<8x192xf32>
    %313 = arith.mulf %312, %312 : vector<8x192xf32>
    %314 = tpu.concatenate %312, %313 in 0 : vector<8x192xf32>, vector<8x192xf32> -> vector<16x192xf32>
    %cst_123 = arith.constant dense<0.000000e+00> : vector<2x192xf32>
    %315 = tpu.matmul %6, %314, %cst_123 {dimension_numbers = #tpu.dot_dimension_numbers<[1], [0], [0], [1], [0, 0, 1, 1], [], []>} : vector<2x16xf32>, vector<16x192xf32>, vector<2x192xf32> -> vector<2x192xf32>
    %cst_124 = arith.constant dense<0.000000e+00> : vector<2x192xf32>
    %316 = tpu.matmul %315, %307, %cst_124 {dimension_numbers = #tpu.dot_dimension_numbers<[1], [0], [0], [1], [0, 0, 1, 1], [], []>} : vector<2x192xf32>, vector<192x192xf32>, vector<2x192xf32> -> vector<2x192xf32>
    %317 = vector.extract_strided_slice %316 {offsets = [0, 0], sizes = [1, 192], strides = [1, 1]} : vector<2x192xf32> to vector<1x192xf32>
    %318 = vector.extract_strided_slice %316 {offsets = [1, 0], sizes = [1, 192], strides = [1, 1]} : vector<2x192xf32> to vector<1x192xf32>
    %319 = arith.mulf %317, %317 : vector<1x192xf32>
    %320 = arith.subf %318, %319 : vector<1x192xf32>
    %cst_125 = arith.constant 0.000000e+00 : f32
    %321 = vector.broadcast %cst_125 : f32 to vector<1x192xf32>
    %322 = arith.maximumf %320, %321 : vector<1x192xf32>
    %323 = vector.broadcast %317 : vector<1x192xf32> to vector<8x192xf32>
    %324 = arith.subf %312, %323 : vector<8x192xf32>
    %cst_126 = arith.constant 9.99999974E-6 : f32
    %325 = vector.broadcast %cst_126 : f32 to vector<1x192xf32>
    %326 = arith.addf %322, %325 : vector<1x192xf32>
    %327 = math.rsqrt %326 : vector<1x192xf32>
    %328 = vector.broadcast %327 : vector<1x192xf32> to vector<8x192xf32>
    %329 = arith.mulf %324, %328 : vector<8x192xf32>
    %cst_127 = arith.constant 0.000000e+00 : f32
    %330 = vector.broadcast %cst_127 : f32 to vector<8x192xf32>
    %331 = arith.maximumf %329, %330 : vector<8x192xf32>
    %c968 = arith.constant 968 : index
    %c0_128 = arith.constant 0 : index
    %332 = vector.load %arg4[%c968, %c0_128] : memref<1304x192xf32, #tpu.memory_space<vmem>>, vector<192x128xf32>
    %cst_129 = arith.constant dense<0.000000e+00> : vector<8x128xf32>
    %333 = tpu.matmul %331, %332, %cst_129 {dimension_numbers = #tpu.dot_dimension_numbers<[1], [0], [0], [1], [0, 0, 1, 1], [], []>} : vector<8x192xf32>, vector<192x128xf32>, vector<8x128xf32> -> vector<8x128xf32>
    %c1160 = arith.constant 1160 : index
    %c0_130 = arith.constant 0 : index
    %334 = vector.load %arg4[%c1160, %c0_130] : memref<1304x192xf32, #tpu.memory_space<vmem>>, vector<1x128xf32>
    %335 = vector.broadcast %334 : vector<1x128xf32> to vector<8x128xf32>
    %336 = arith.addf %333, %335 : vector<8x128xf32>
    %cst_131 = arith.constant 0.000000e+00 : f32
    %337 = vector.broadcast %cst_131 : f32 to vector<8x128xf32>
    %338 = arith.maximumf %336, %337 : vector<8x128xf32>
    %c1168 = arith.constant 1168 : index
    %c0_132 = arith.constant 0 : index
    %339 = vector.load %arg4[%c1168, %c0_132] : memref<1304x192xf32, #tpu.memory_space<vmem>>, vector<128x128xf32>
    %cst_133 = arith.constant dense<0.000000e+00> : vector<8x128xf32>
    %340 = tpu.matmul %338, %339, %cst_133 {dimension_numbers = #tpu.dot_dimension_numbers<[1], [0], [0], [1], [0, 0, 1, 1], [], []>} : vector<8x128xf32>, vector<128x128xf32>, vector<8x128xf32> -> vector<8x128xf32>
    %c1296 = arith.constant 1296 : index
    %c0_134 = arith.constant 0 : index
    %341 = vector.load %arg4[%c1296, %c0_134] : memref<1304x192xf32, #tpu.memory_space<vmem>>, vector<1x128xf32>
    %342 = vector.broadcast %341 : vector<1x128xf32> to vector<8x128xf32>
    %343 = arith.addf %340, %342 : vector<8x128xf32>
    %c0_135 = arith.constant 0 : index
    %c0_136 = arith.constant 0 : index
    %344 = vector.load %arg5[%c0_135, %c0_136] : memref<8x128xf32, #tpu.memory_space<vmem>>, vector<8x128xf32>
    tpu.vector_store %arg5[%c0_135, %c0_136], %343 {strides = array<i32>} : memref<8x128xf32, #tpu.memory_space<vmem>>, vector<8x128xf32>,
    return
  }
}

</mosaic_0001>

<bundles_post_ra>
// kernel: my_model_forward.1
= control target key start
LH: loop header
LB: loop body
LE: loop exit
PB: predicated region body
PF: predicated region fallthrough
CT: control target
= control target key end

     0   :  { %vm98_vm0 = vcmask 523264   ;;  %vm196_vm1 = vcmask 261120   ;;  %v79_v38 = vlaneseq  ;;  %vm8572_vm3 = vmmov 1   ;;  %s8577_s30 = smov 96   ;;  %s8578_s6 = smov 64   ;;  %s11992_s1 = inlined_call_operand.vmem [shape: f32[216,256], index: 1, kind: input, shape index: {}]   ;;  %s11993_s0 = inlined_call_operand.vmem [shape: f32[144,64], index: 0, kind: input, shape index: {}]   ;;  %s11994_s2 = inlined_call_operand.vmem [shape: f32[168,512], index: 2, kind: input, shape index: {}]   ;;  %s11995_s3 = inlined_call_operand.vmem [shape: f32[1160,384], index: 3, kind: input, shape index: {}]   ;;  %s11996_s4 = inlined_call_operand.vmem [shape: f32[1304,192], index: 4, kind: input, shape index: {}]   ;;  %s11997_s5 = inlined_call_operand.vmem [shape: f32[8,128], index: 5, kind: output, shape index: {}]  }
   0x1   :  { %v38_v0 = vld [vmem:[%s11992_s1] sm:$0xff]  ;;  %v39_v1 = vld [vmem:[%s11992_s1 + $0x10] sm:$0xff]  ;;  %v21_v13 = vld [vmem:[%s11993_s0 + $0x8] sm:$0xff]  ;;  %v8573_v41 = vmov 0.0   ;;  %vm8575_vm7 = vmmov 0   ;;  %vm1154_vm10 = vcmask 195584  }
   0x2   :  { %v40_v2 = vld [vmem:[%s11992_s1 + $0x20] sm:$0xff]  ;;  %v7369_v3 = vpack.c.bf16 %v39_v1, %v38_v0  ;;  %v41_v4 = vld [vmem:[%s11992_s1 + $0x30] sm:$0xff]  ;;  %v23_v15 = vld [vmem:[%s11993_s0 + $0x18] sm:$0xff]  ;;  %v80_v39 = vand.u32 127, %v79_v38  ;;  %s8579_s7 = smov 32  }
   0x3   :  { %v7373_v5 = vpack.c.bf16 %v41_v4, %v40_v2  ;;  %v42_v6 = vld [vmem:[%s11992_s1 + $0x40] sm:$0xff]  ;;  %v43_v7 = vld [vmem:[%s11992_s1 + $0x50] sm:$0xff]  ;;  %v8658_v23 = vld [vmem:[%s11993_s0 + $0x28] sm:$0xff] }
   0x4   :  { %v20_v8 = vld [vmem:[%s11993_s0] sm:$0xff]  ;;  %7370 = vmatprep.subr.bf16.mxu0 %v7369_v3  ;;  %v7377_v9 = vpack.c.bf16 %v43_v7, %v42_v6  ;;  %v45_v11 = vld [vmem:[%s11992_s1 + $0x70] sm:$0xff]  ;;  %v8672_v25 = vld [vmem:[%s11993_s0 + $0x38] sm:$0xff]  ;;  %vm85_vm2 = vcmp.lt.s32.totalorder %v80_v39, 32 }
   0x5   :  { %6893 = vmatprep.mubr.msk.f32.mxu0 %vm98_vm0, %v20_v8  ;;  %7372 = vmatpush3.bf16.msra.mxu0 %v7369_v3  ;;  %v44_v10 = vld [vmem:[%s11992_s1 + $0x60] sm:$0xff]  ;;  %v22_v14 = vld [vmem:[%s11993_s0 + $0x10] sm:$0xff]  ;;  %vm86_vm4 = vmxor %vm8572_vm3, %vm85_vm2 }
   0x6   :  { %7374 = vmatprep.subr.bf16.mxu0 %v7373_v5  ;;  %v7381_v12 = vpack.c.bf16 %v45_v11, %v44_v10  ;;  %v24_v16 = vld [vmem:[%s11993_s0 + $0x20] sm:$0xff]  ;;  %v8663_v24 = vld [vmem:[%s11993_s0 + $0x30] sm:$0xff]  ;;  %vm90_vm5 = vmxor %vm86_vm4, %vm8572_vm3 }
   0x7   :  { %6907 = vmatprep.mubr.msk.f32.mxu1 %vm196_vm1, %v24_v16  ;;  %v46_v26 = vld [vmem:[%s11992_s1 + $0x80] sm:$0xff]  ;;  %v47_v27 = vld [vmem:[%s11992_s1 + $0x90] sm:$0xff]  ;;  %v8705_v42 = vsel %vm90_vm5, 0.0625, %v8573_v41  ;;  %vm92_vm6 = vmxor %vm85_vm2, %vm8572_vm3 }
   0x8   :  { %v7393_v28 = vpack.c.bf16 %v47_v27, %v46_v26  ;;  %v48_v29 = vld [vmem:[%s11992_s1 + $0xa0] sm:$0xff]  ;;  %v49_v30 = vld [vmem:[%s11992_s1 + $0xb0] sm:$0xff]  ;;  %v8711_v51 = vsel %vm92_vm6, 0.0625, %v8573_v41 }
   0x9   :  { %7376 = vmatpush3.bf16.msra.mxu0 %v7373_v5  ;;  %v7397_v31 = vpack.c.bf16 %v49_v30, %v48_v29  ;;  %v50_v32 = vld [vmem:[%s11992_s1 + $0xc0] sm:$0xff]  ;;  %v51_v33 = vld [vmem:[%s11992_s1 + $0xd0] sm:$0xff] }
   0xa   :  { %7378 = vmatprep.subr.bf16.mxu0 %v7377_v9  ;;  %v7401_v34 = vpack.c.bf16 %v51_v33, %v50_v32  ;;  %v52_v35 = vld [vmem:[%s11992_s1 + $0xe0] sm:$0xff]  ;;  %v53_v36 = vld [vmem:[%s11992_s1 + $0xf0] sm:$0xff] }
   0xb   :  { %v7405_v37 = vpack.c.bf16 %v53_v36, %v52_v35  ;;  %v70_v40 = vld [vmem:[%s11992_s1 + $0x180] ss:$0 sm:$0xff] }
   0xd   :  { %7380 = vmatpush3.bf16.msra.mxu0 %v7377_v9 }
   0xe   :  { %7382 = vmatprep.subr.bf16.mxu0 %v7381_v12 }
  0x11   :  { %7384 = vmatpush3.bf16.msra.mxu0 %v7381_v12 }
  0x14   :  { %6894 = vmatmul.mubr.msk.f32.vlgmr.msra.gmra.mrb[0].mxu0 %vm98_vm0, %v21_v13 }
  0x15   :  { %6896 = vmatprep.mubr.msk.f32.mxu0 %vm98_vm0, %v22_v14 }
  0x18   :  { %6897 = vmatmul.mubr.msk.f32.gmra.mrb[2].mxu0 %vm98_vm0, %v23_v15 }
  0x19   :  { %6943 = vmatprep.mubr.msk.f32.mxu0 %vm196_vm1, %v24_v16 }
  0xe7   :  { %v6895_v17 = vpop.f32.mrb[0].mxu0 }
  0xe8   :  { %v177_v18 = vpop.f32.mrb[1].mxu0 }
  0xe9   :  { %v7385_v19 = vpack.c.bf16 %v6895_v17, %v177_v18 }
  0xeb   :  { %v6898_v20 = vpop.f32.mrb[2].mxu0  ;;  %7386 = vmatprep.subr.bf16.mxu1 %v7385_v19 }
  0xec   :  { %v187_v21 = vpop.f32.mrb[3].mxu0  ;;  %7388 = vmatpush3.bf16.msra.mxu1 %v7385_v19 }
  0xed   :  { %v7389_v22 = vpack.c.bf16 %v6898_v20, %v187_v21 }
  0xef   :  { %7390 = vmatprep.subr.bf16.mxu1 %v7389_v22 }
  0xf0   :  { %7392 = vmatpush3.bf16.msra.mxu1 %v7389_v22 }
  0xf1   :  { %7394 = vmatprep.subr.bf16.mxu1 %v7393_v28 }
  0xf3   :  { %6908 = vmatmul.mubr.msk.f32.vlgmr.msra.gmra.mrb[0].mxu1 %vm196_vm1, %v8658_v23 }
  0xf4   :  { %6910 = vmatprep.mubr.msk.f32.mxu1 %vm196_vm1, %v8663_v24  ;;  %7396 = vmatpush3.bf16.msra.mxu1 %v7393_v28 }
  0xf5   :  { %7398 = vmatprep.subr.bf16.mxu1 %v7397_v31 }
  0xf7   :  { %6911 = vmatmul.mubr.msk.f32.gmra.mrb[2].mxu1 %vm196_vm1, %v8672_v25 }
  0xf8   :  { %7400 = vmatpush3.bf16.msra.mxu1 %v7397_v31 }
  0xf9   :  { %7402 = vmatprep.subr.bf16.mxu1 %v7401_v34 }
  0xfc   :  { %7404 = vmatpush3.bf16.msra.mxu1 %v7401_v34 }
  0xfd   :  { %7406 = vmatprep.subr.bf16.mxu1 %v7405_v37 }
 0x100   :  { %7408 = vmatpush3.bf16.msra.mxu1 %v7405_v37 }
 0x1c6   :  { %v6909_v43 = vpop.f32.mrb[0].mxu1 }
 0x1c7   :  { %v281_v44 = vadd.f32 %v6909_v43, %v70_v40  ;;  %v275_v45 = vpop.f32.mrb[1].mxu1 }
 0x1c8   :  { %v276_v46 = vadd.f32 %v275_v45, %v70_v40 }
 0x1c9   :  { %v295_v47 = vmul.f32 %v281_v44, %v8705_v42 }
 0x1ca   :  { %v294_v48 = vmul.f32 %v276_v46, %v8705_v42  ;;  %v6912_v49 = vpop.f32.mrb[2].mxu1 }
 0x1cb   :  { %v299_v50 = vsel %vm98_vm0, %v295_v47, 0.0  ;;  %v291_v52 = vadd.f32 %v6912_v49, %v70_v40  ;;  %v285_v53 = vpop.f32.mrb[3].mxu1 }
 0x1cc   :  { %v298_v54 = vsel %vm98_vm0, %v294_v48, 0.0  ;;  %v286_v55 = vadd.f32 %v285_v53, %v70_v40  ;;  %v28_v53 = vld [vmem:[%s11993_s0 + $0x40] sm:$0xff] }
 0x1cd   :  { %v300_v56 = vadd.f32 %v299_v50, %v298_v54  ;;  %v297_v57 = vmul.f32 %v291_v52, %v8711_v51  ;;  %v55_v54 = vld [vmem:[%s11992_s1 + $0x108] sm:$0xff] }
 0x1ce   :  { %v296_v58 = vmul.f32 %v286_v55, %v8711_v51 }
 0x1cf   :  { %v303_v61 = vsel %vm98_vm0, %v297_v57, 0.0  ;;  %v61_v57 = vld [vmem:[%s11992_s1 + $0x138] sm:$0xff] }
 0x1d0   :  { %v301_v59 = vsel %vm98_vm0, %v296_v58, 0.0 }
 0x1d1   :  { %v302_v60 = vadd.f32 %v301_v59, %v300_v56  ;;  %v59_v56 = vld [vmem:[%s11992_s1 + $0x128] sm:$0xff] }
 0x1d2   :  { %v7429_v59 = vpack.c.bf16 %v61_v57, %v59_v56 }
 0x1d3   :  { %v304_v62 = vadd.f32 %v303_v61, %v302_v60  ;;  %v58_v60 = vld [vmem:[%s11992_s1 + $0x120] sm:$0xff]  ;;  %v60_v61 = vld [vmem:[%s11992_s1 + $0x130] sm:$0xff] }
 0x1d5   :  { %v305_v63 = vrot.slane %v304_v62, 4 }
 0x1d7   :  { %v306_v0 = vadd.f32 %v305_v63, %v304_v62  ;;  %v63_v62 = vld [vmem:[%s11992_s1 + $0x148] sm:$0xff]  ;;  %v65_v63 = vld [vmem:[%s11992_s1 + $0x158] sm:$0xff] }
 0x1d9   :  { %v307_v1 = vrot.slane %v306_v0, 2 }
 0x1db   :  { %v308_v2 = vadd.f32 %v307_v1, %v306_v0  ;;  %v7431_v0 = vpack.c.bf16 %v60_v61, %v58_v60  ;;  %v7433_v1 = vpack.c.bf16 %v65_v63, %v63_v62 }
 0x1dd   :  { %v309_v3 = vrot.slane %v308_v2, 1 }
 0x1df   :  { %v310_v4 = vadd.f32 %v309_v3, %v308_v2  ;;  %v62_v2 = vld [vmem:[%s11992_s1 + $0x140] sm:$0xff]  ;;  %v64_v3 = vld [vmem:[%s11992_s1 + $0x150] sm:$0xff] }
 0x1e1   :  { %v311_v5 = vsub.f32 %v276_v46, %v310_v4  ;;  %v312_v6 = vsub.f32 %v281_v44, %v310_v4  ;;  %v313_v7 = vsub.f32 %v286_v55, %v310_v4  ;;  %v314_v8 = vsub.f32 %v291_v52, %v310_v4  ;;  %v67_v4 = vld [vmem:[%s11992_s1 + $0x168] sm:$0xff] }
 0x1e3   :  { %v315_v9 = vmul.f32 %v311_v5, %v8705_v42  ;;  %v316_v10 = vmul.f32 %v312_v6, %v8705_v42  ;;  %v317_v11 = vmul.f32 %v313_v7, %v8711_v51  ;;  %v318_v12 = vmul.f32 %v314_v8, %v8711_v51 }
 0x1e5   :  { %v319_v13 = vmul.f32 %v315_v9, %v311_v5  ;;  %v320_v14 = vmul.f32 %v316_v10, %v312_v6  ;;  %v321_v15 = vmul.f32 %v317_v11, %v313_v7  ;;  %v322_v16 = vmul.f32 %v318_v12, %v314_v8  ;;  %v68_v9 = vld [vmem:[%s11992_s1 + $0x170] sm:$0xff] }
 0x1e6   :  { %v8574_v11 = vmov 0.0|0.0   ;;  %v71_v12 = vld [vmem:[%s11992_s1 + $0x190] ss:$0 sm:$0xff] }
 0x1e7   :  { %v323_v17 = vsel %vm98_vm0, %v319_v13, 0.0  ;;  %v324_v18 = vsel %vm98_vm0, %v320_v14, 0.0  ;;  %v326_v20 = vsel %vm98_vm0, %v321_v15, 0.0  ;;  %v328_v22 = vsel %vm98_vm0, %v322_v16, 0.0 }
 0x1e8   :  { %v325_v19 = vadd.f32 %v324_v18, %v323_v17 }
 0x1ea   :  { %v327_v21 = vadd.f32 %v326_v20, %v325_v19 }
 0x1ec   :  { %v329_v26 = vadd.f32 %v328_v22, %v327_v21 }
 0x1ee   :  { %v330_v27 = vrot.slane %v329_v26, 4 }
 0x1f0   :  { %v331_v28 = vadd.f32 %v330_v27, %v329_v26 }
 0x1f2   :  { %v332_v29 = vrot.slane %v331_v28, 2 }
 0x1f4   :  { %v333_v30 = vadd.f32 %v332_v29, %v331_v28 }
 0x1f6   :  { %v334_v31 = vrot.slane %v333_v30, 1 }
 0x1f8   :  { %v335_v32 = vadd.f32 %v334_v31, %v333_v30 }
 0x1fa   :  { %v336_v33 = vadd.f32 1e-05, %v335_v32 }
 0x1fc   :  { %8406 = vrsqrt.f32 %v336_v33 }
 0x206   :  { %v8407_v34 = vpop.eup %8406 }
 0x207   :  { %v340_v35 = vmul.f32 %v8407_v34, %v313_v7  ;;  %v338_v36 = vmul.f32 %v8407_v34, %v311_v5  ;;  %v339_v37 = vmul.f32 %v8407_v34, %v312_v6  ;;  %v341_v39 = vmul.f32 %v8407_v34, %v314_v8  ;;  %v69_v5 = vld [vmem:[%s11992_s1 + $0x178] sm:$0xff]  ;;  %v66_v8 = vld [vmem:[%s11992_s1 + $0x160] sm:$0xff] }
 0x208   :  { %v7435_v6 = vpack.c.bf16 %v64_v3, %v62_v2  ;;  %v7437_v7 = vpack.c.bf16 %v69_v5, %v67_v4  ;;  %v7439_v10 = vpack.c.bf16 %v68_v9, %v66_v8 }
 0x209   :  { %v342_v40 = vmax.f32 %v338_v36, 0.0  ;;  %v343_v43 = vmax.f32 %v339_v37, 0.0  ;;  %v344_v44 = vmax.f32 %v340_v35, 0.0  ;;  %v345_v45 = vmax.f32 %v341_v39, 0.0 }
 0x20b   :  { %6929 = vmatprep.mubr.msk.f32.mxu1 %vm98_vm0, %v342_v40 }
 0x20c   :  { %6930 = vmatmul.mubr.msk.f32.vlgmr.msra.gmra.mrb[4].mxu1 %vm98_vm0, %v343_v43 }
 0x20d   :  { %6932 = vmatprep.mubr.msk.f32.mxu1 %vm98_vm0, %v344_v44 }
 0x210   :  { %6933 = vmatmul.mubr.msk.f32.gmra.mrb[6].mxu1 %vm98_vm0, %v345_v45 }
 0x211   :  { %742 = vmatprep.mubr.f32.mxu1 %v8573_v41 }
 0x2df   :  { %v6931_v46 = vpop.f32.mrb[4].mxu1 }
 0x2e0   :  { %v424_v47 = vpop.f32.mrb[5].mxu1 }
 0x2e1   :  { %v7409_v48 = vpack.c.bf16 %v6931_v46, %v424_v47 }
 0x2e3   :  { %v6934_v49 = vpop.f32.mrb[6].mxu1  ;;  %7410 = vmatprep.subr.bf16.mxu0 %v7409_v48 }
 0x2e4   :  { %v434_v50 = vpop.f32.mrb[7].mxu1  ;;  %7412 = vmatpush3.bf16.msra.mxu0 %v7409_v48 }
 0x2e5   :  { %v7413_v52 = vpack.c.bf16 %v6934_v49, %v434_v50 }
 0x2e7   :  { %7414 = vmatprep.subr.bf16.mxu0 %v7413_v52 }
 0x2e8   :  { %7416 = vmatpush3.bf16.msra.mxu0 %v7413_v52 }
 0x2eb   :  { %6944 = vmatmul.mubr.msk.f32.vlgmr.msra.gmra.mrb[4].mxu0 %vm196_vm1, %v8658_v23  ;;  %v57_v23 = vld [vmem:[%s11992_s1 + $0x118] sm:$0xff] }
 0x2ec   :  { %6946 = vmatprep.mubr.msk.f32.mxu0 %vm196_vm1, %v8663_v24  ;;  %v54_v24 = vld [vmem:[%s11992_s1 + $0x100] sm:$0xff]  ;;  %v7425_v55 = vpack.c.bf16 %v57_v23, %v55_v54 }
 0x2ee   :  { %7426 = vmatprep.subr.bf16.mxu1 %v7425_v55 }
 0x2ef   :  { %6947 = vmatmul.mubr.msk.f32.gmra.mrb[6].mxu0 %vm196_vm1, %v8672_v25  ;;  %v56_v25 = vld [vmem:[%s11992_s1 + $0x110] sm:$0xff] }
 0x2f0   :  { %6957 = vmatprep.mubr.msk.f32.mxu0 %vm196_vm1, %v28_v53  ;;  %v7427_v58 = vpack.c.bf16 %v56_v25, %v54_v24 }
 0x2f2   :  { %7428 = vmatpush1.bf16.msra.mxu1 %v7427_v58 }
 0x2f3   :  { %7430 = vmatprep.subr.bf16.mxu1 %v7429_v59 }
 0x2f6   :  { %7432 = vmatpush1.bf16.msra.mxu1 %v7431_v0 }
 0x2f7   :  { %7434 = vmatprep.subr.bf16.mxu1 %v7433_v1 }
 0x2fa   :  { %7436 = vmatpush1.bf16.msra.mxu1 %v7435_v6 }
 0x2fb   :  { %7438 = vmatprep.subr.bf16.mxu1 %v7437_v7 }
 0x2fe   :  { %7440 = vmatpush1.bf16.msra.mxu1 %v7439_v10 }
 0x2ff   :  { %7450 = vmatprep.subr.bf16.mxu1 %v8574_v11 }
 0x3be   :  { %v6945_v13 = vpop.f32.mrb[4].mxu0 }
 0x3bf   :  { %v515_v14 = vadd.f32 %v6945_v13, %v71_v12  ;;  %v509_v15 = vpop.f32.mrb[5].mxu0 }
 0x3c0   :  { %v510_v16 = vadd.f32 %v509_v15, %v71_v12  ;;  %v754_v15 = vld [vmem:[%s11994_s2 + $0x20] sm:$0xff] }
 0x3c1   :  { %v529_v17 = vmul.f32 %v515_v14, %v8705_v42 }
 0x3c2   :  { %v528_v18 = vmul.f32 %v510_v16, %v8705_v42  ;;  %v6948_v19 = vpop.f32.mrb[6].mxu0 }
 0x3c3   :  { %v533_v20 = vsel %vm98_vm0, %v529_v17, 0.0  ;;  %v525_v21 = vadd.f32 %v6948_v19, %v71_v12  ;;  %v519_v22 = vpop.f32.mrb[7].mxu0  ;;  %v756_v19 = vld [vmem:[%s11994_s2 + $0x60] sm:$0xff] }
 0x3c4   :  { %v532_v26 = vsel %vm98_vm0, %v528_v18, 0.0  ;;  %v520_v27 = vadd.f32 %v519_v22, %v71_v12  ;;  %v755_v18 = vld [vmem:[%s11994_s2 + $0x40] sm:$0xff]  ;;  %v31_v22 = vld [vmem:[%s11993_s0 + $0x58] sm:$0xff] }
 0x3c5   :  { %v534_v28 = vadd.f32 %v533_v20, %v532_v26  ;;  %v531_v29 = vmul.f32 %v525_v21, %v8711_v51  ;;  %v7445_v20 = vpack.c.bf16 %v756_v19, %v755_v18  ;;  %v32_v26 = vld [vmem:[%s11993_s0 + $0x60] sm:$0xff] }
 0x3c6   :  { %v530_v30 = vmul.f32 %v520_v27, %v8711_v51 }
 0x3c7   :  { %v537_v33 = vsel %vm98_vm0, %v531_v29, 0.0 }
 0x3c8   :  { %v535_v31 = vsel %vm98_vm0, %v530_v30, 0.0 }
 0x3c9   :  { %v536_v32 = vadd.f32 %v535_v31, %v534_v28 }
 0x3cb   :  { %v538_v34 = vadd.f32 %v537_v33, %v536_v32 }
 0x3cd   :  { %v539_v35 = vrot.slane %v538_v34, 4 }
 0x3cf   :  { %v540_v36 = vadd.f32 %v539_v35, %v538_v34 }
 0x3d1   :  { %v541_v37 = vrot.slane %v540_v36, 2 }
 0x3d3   :  { %v542_v39 = vadd.f32 %v541_v37, %v540_v36  ;;  %v758_v37 = vld [vmem:[%s11994_s2 + $0xa0] sm:$0xf] }
 0x3d5   :  { %v543_v40 = vrot.slane %v542_v39, 1 }
 0x3d7   :  { %v544_v43 = vadd.f32 %v543_v40, %v542_v39  ;;  %v757_v39 = vld [vmem:[%s11994_s2 + $0x80] sm:$0xf] }
 0x3d9   :  { %v545_v44 = vsub.f32 %v510_v16, %v544_v43  ;;  %v546_v45 = vsub.f32 %v515_v14, %v544_v43  ;;  %v547_v46 = vsub.f32 %v520_v27, %v544_v43  ;;  %v548_v47 = vsub.f32 %v525_v21, %v544_v43  ;;  %v753_v14 = vld [vmem:[%s11994_s2] sm:$0xff]  ;;  %v29_v16 = vld [vmem:[%s11993_s0 + $0x48] sm:$0xff]  ;;  %v30_v21 = vld [vmem:[%s11993_s0 + $0x50] sm:$0xff] }
 0x3da   :  { %v7442_v17 = vpack.c.bf16 %v754_v15, %v753_v14 }
 0x3db   :  { %v549_v48 = vmul.f32 %v545_v44, %v8705_v42  ;;  %v550_v49 = vmul.f32 %v546_v45, %v8705_v42  ;;  %v551_v50 = vmul.f32 %v547_v46, %v8711_v51  ;;  %v552_v52 = vmul.f32 %v548_v47, %v8711_v51 }
 0x3dd   :  { %v553_v53 = vmul.f32 %v549_v48, %v545_v44  ;;  %v554_v54 = vmul.f32 %v550_v49, %v546_v45  ;;  %v555_v23 = vmul.f32 %v551_v50, %v547_v46  ;;  %v556_v24 = vmul.f32 %v552_v52, %v548_v47 }
 0x3df   :  { %v557_v55 = vsel %vm98_vm0, %v553_v53, 0.0  ;;  %v558_v25 = vsel %vm98_vm0, %v554_v54, 0.0  ;;  %v560_v57 = vsel %vm98_vm0, %v555_v23, 0.0  ;;  %v562_v59 = vsel %vm98_vm0, %v556_v24, 0.0 }
 0x3e0   :  { %v559_v56 = vadd.f32 %v558_v25, %v557_v55 }
 0x3e2   :  { %v561_v58 = vadd.f32 %v560_v57, %v559_v56  ;;  %v8576_v56 = vmov 1966171168  }
 0x3e3   :  { %v1051_v57 = vunpack.c.l.s4 %v8576_v56 }
 0x3e4   :  { %v563_v60 = vadd.f32 %v562_v59, %v561_v58 }
 0x3e5   :  { %v1052_v58 = vunpack.c.0.s8 %v1051_v57 }
 0x3e6   :  { %v564_v42 = vrot.slane %v563_v60, 4 }
 0x3e8   :  { %v565_v61 = vadd.f32 %v564_v42, %v563_v60 }
 0x3ea   :  { %v566_v62 = vrot.slane %v565_v61, 2 }
 0x3ec   :  { %v567_v63 = vadd.f32 %v566_v62, %v565_v61 }
 0x3ee   :  { %v568_v51 = vrot.slane %v567_v63, 1 }
 0x3f0   :  { %v569_v0 = vadd.f32 %v568_v51, %v567_v63 }
 0x3f2   :  { %v570_v1 = vadd.f32 1e-05, %v569_v0 }
 0x3f4   :  { %8408 = vrsqrt.f32 %v570_v1 }
 0x3fe   :  { %v8409_v2 = vpop.eup %8408 }
 0x3ff   :  { %v572_v3 = vmul.f32 %v8409_v2, %v545_v44  ;;  %v573_v4 = vmul.f32 %v8409_v2, %v546_v45  ;;  %v574_v5 = vmul.f32 %v8409_v2, %v547_v46  ;;  %v575_v6 = vmul.f32 %v8409_v2, %v548_v47 }
 0x400   :  { %v663_v46 = vshrl.u32 %v79_v38, 7 }
 0x401   :  { %v576_v7 = vmax.f32 %v572_v3, 0.0  ;;  %v577_v8 = vmax.f32 %v573_v4, 0.0  ;;  %v578_v9 = vmax.f32 %v574_v5, 0.0  ;;  %v579_v10 = vmax.f32 %v575_v6, 0.0  ;;  %v8904_v4 = vld [vmem:[%s11993_s0 + $0x68] sm:$0xff] }
 0x402   :  { %v8882_v47 = vsub.s32 1, %v663_v46  ;;  %v8885_v54 = vsub.s32 0, %v663_v46  ;;  %v8888_v24 = vsub.s32 2, %v663_v46  ;;  %v8891_v55 = vsub.s32 3, %v663_v46 }
 0x403   :  { %v7417_v12 = vpack.c.bf16 %v577_v8, %v576_v7  ;;  %v7421_v13 = vpack.c.bf16 %v579_v10, %v578_v9  ;;  %v8894_v59 = vsub.s32 %v1052_v58, %v663_v46 }
 0x405   :  { %7418 = vmatprep.subr.bf16.mxu0 %v7417_v12 }
 0x406   :  { %7420 = vmatpush3.bf16.msra.mxu0 %v7417_v12 }
 0x407   :  { %7422 = vmatprep.subr.bf16.mxu0 %v7421_v13 }
 0x40a   :  { %7424 = vmatpush3.bf16.msra.mxu0 %v7421_v13  ;;  %v8909_v13 = vld [vmem:[%s11993_s0 + $0x78] sm:$0xff] }
 0x40b   :  { %7441 = vmatprep.subr.bf16.mxu0 %v8574_v11 }
 0x40d   :  { %6958 = vmatmul.mubr.msk.f32.vlgmr.msra.gmra.mrb[8].mxu0 %vm196_vm1, %v29_v16 }
 0x40e   :  { %7443 = vmatpush3.bf16.msra.mxu0 %v7442_v17  ;;  %6968 = vmatprep.mubr.msk.f32.mxu0 %vm8575_vm7, %v8573_v41  ;;  %v8917_v17 = vld [vmem:[%s11993_s0 + $0x70] sm:$0xff] }
 0x40f   :  { %7444 = vmatprep.subr.bf16.mxu0 %v8574_v11 }
 0x412   :  { %7446 = vmatpush3.bf16.msra.mxu0 %v7445_v20 }
 0x413   :  { %7447 = vmatprep.subr.bf16.mxu0 %v8574_v11 }
 0x415   :  { %6969 = vmatmul.mubr.msk.f32.vlgmr.msra.gmra.mrb[10].mxu0 %vm196_vm1, %v30_v21 }
 0x416   :  { %6971 = vmatprep.mubr.msk.f32.mxu0 %vm8575_vm7, %v8573_v41 }
 0x419   :  { %6972 = vmatmul.mubr.msk.f32.gmra.mrb[12].mxu0 %vm196_vm1, %v31_v22 }
 0x41a   :  { %6974 = vmatprep.mubr.msk.f32.mxu0 %vm8575_vm7, %v8573_v41 }
 0x41d   :  { %6975 = vmatmul.mubr.msk.f32.gmra.mrb[14].mxu0 %vm196_vm1, %v32_v26 }
 0x41e   :  { %6983 = vmatprep.mubr.msk.f32.mxu0 %vm8575_vm7, %v8573_v41 }
 0x4e0   :  { %v6959_v27 = vpop.f32.mrb[8].mxu0 }
 0x4e1   :  { %v652_v28 = vpop.f32.mrb[9].mxu0 }
 0x4e2   :  { %6492 = vmatmul.mubr.msk.f32.vlgmr.msra.gmra.mrb[8].mxu1 %vm98_vm0, %v652_v28 }
 0x4e3   :  { %747 = vmatprep.mubr.f32.mxu1 %v8573_v41 }
 0x4e6   :  { %6493 = vmatmul.mubr.msk.f32.gmra.mrb[10].mxu1 %vm98_vm0, %v6959_v27 }
 0x4e7   :  { %6992 = vmatprep.mubr.msk.f32.mxu1 %vm8575_vm7, %v8573_v41 }
 0x4e8   :  { %v835_v29 = vpop.f32.mrb[10].mxu0 }
 0x4e9   :  { %v6970_v30 = vpop.f32.mrb[11].mxu0 }
 0x4ec   :  { %v840_v31 = vpop.f32.mrb[12].mxu0 }
 0x4ed   :  { %v8853_v32 = vpack.c.bf16 %v840_v31, %v835_v29  ;;  %v6973_v33 = vpop.f32.mrb[13].mxu0  ;;  %v8855_v34 = vpack.i.bf16 %v840_v31, %v835_v29 }
 0x4ef   :  { %7449 = vmatpush3.bf16.xpose.msra.mxu0 %v8853_v32  ;;  %7452 = vmatpush3.bf16.xpose.msra.mxu1 %v8853_v32 }
 0x4f0   :  { %v8859_v35 = vpop.f32.mrb[14].mxu0  ;;  %6981 = vmatprep.subr.mxu0 %v8573_v41  ;;  %6990 = vmatprep.subr.mxu1 %v8573_v41 }
 0x4f1   :  { %v6976_v36 = vpop.f32.mrb[15].mxu0 }
 0x4f7   :  { %6982 = vmatpush3.xpose.msra.mxu0 %v8859_v35  ;;  %6991 = vmatpush3.xpose.msra.mxu1 %v8859_v35 }
 0x4f8   :  { %7453 = vmatprep.subr.bf16.mxu0 %v8574_v11  ;;  %7465 = vmatprep.subr.bf16.mxu1 %v8574_v11 }
 0x4fa   :  { %6993 = vmatmul.mubr.f32.vlgmr.msra.gmra.mrb[12].mxu1 %v758_v37  ;;  %6984 = vmatmul.mubr.f32.vlgmr.msra.gmra.mrb[16].mxu0 %v757_v39 }
 0x4fb   :  { %7001 = vmatprep.mubr.msk.f32.mxu0 %vm8575_vm7, %v8573_v41  ;;  %7063 = vmatprep.mubr.msk.f32.mxu1 %vm8575_vm7, %v8573_v41 }
 0x5b5   :  { %v8877_v40 = vpop.f32.mrb[8].mxu1 }
 0x5b6   :  { %v746_v43 = vpop.f32.mrb[9].mxu1 }
 0x5b9   :  { %v749_v44 = vpop.f32.mrb[10].mxu1 }
 0x5ba   :  { %v8879_v45 = vpop.f32.mrb[11].mxu1 }
 0x5cd   :  { %v985_v48 = vpop.f32.mrb[12].mxu1  ;;  %v915_v49 = vpop.f32.mrb[16].mxu0 }
 0x5ce   :  { %v6994_v50 = vpop.f32.mrb[13].mxu1  ;;  %v1007_v52 = vrot.slane %v985_v48, %v8882_v47  ;;  %v6985_v53 = vpop.f32.mrb[17].mxu0  ;;  %v992_v23 = vrot.slane %v985_v48, %v8885_v54  ;;  %v1022_v38 = vrot.slane %v985_v48, %v8888_v24  ;;  %v1037_v25 = vrot.slane %v985_v48, %v8891_v55 }
 0x5cf   :  { %v1056_v60 = vrot.slane %v915_v49, %v8894_v59 }
 0x5d0   :  { %1017 = vbcast.lane.b32.xlu1 %v1007_v52, 272  ;;  %1009 = vbcast.lane.b32.xlu0 %v1007_v52, 256 }
 0x5d1   :  { %v1057_v42 = vcombine.high %v1056_v60, %v1056_v60  ;;  %v1064_v63 = vrot.slane %v1056_v60, %v8894_v59 }
 0x5d3   :  { %v1071_v61 = vrot.slane %v1057_v42, %v8894_v59  ;;  %v1077_v3 = vrot.slane %v1064_v63, %v8885_v54  ;;  %v1072_v15 = vcombine.high %v1064_v63, %v1064_v63 }
 0x5d4   :  { %1013 = vbcast.lane.b32.xlu0 %v1007_v52, 264  ;;  %994 = vbcast.lane.b32.xlu1 %v992_v23, 256 }
 0x5d5   :  { %v1081_v62 = vrot.slane %v1071_v61, %v8885_v54  ;;  %v1073_v31 = vcombine.high %v1071_v61, %v1071_v61  ;;  %v1085_v33 = vrot.slane %v1072_v15, %v8885_v54 }
 0x5d7   :  { %v1089_v57 = vrot.slane %v1073_v31, %v8885_v54 }
 0x5d8   :  { %998 = vbcast.lane.b32.xlu0 %v992_v23, 264  ;;  %1002 = vbcast.lane.b32.xlu1 %v992_v23, 272 }
 0x5dc   :  { %1024 = vbcast.lane.b32.xlu0 %v1022_v38, 256  ;;  %1028 = vbcast.lane.b32.xlu1 %v1022_v38, 264 }
 0x5e0   :  { %1032 = vbcast.lane.b32.xlu0 %v1022_v38, 272  ;;  %1039 = vbcast.lane.b32.xlu1 %v1037_v25, 256 }
 0x5e4   :  { %1043 = vbcast.lane.b32.xlu0 %v1037_v25, 264  ;;  %1047 = vbcast.lane.b32.xlu1 %v1037_v25, 272 }
 0x642   :  { %v1018_v51 = vpop.permute.xlu1 %1017  ;;  %v1010_v0 = vpop.permute.xlu0 %1009 }
 0x643   :  { %v1099_v1 = vadd.f32 %v1081_v62, %v1018_v51  ;;  %v1097_v2 = vadd.f32 %v1081_v62, %v1010_v0 }
 0x645   :  { %v1123_v5 = vmul.f32 0.2, %v1099_v1  ;;  %v1121_v6 = vmul.f32 0.2, %v1097_v2  ;;  %vm1109_vm8 = vcmp.gt.f32.partialorder %v1097_v2, 0.0  ;;  %vm1111_vm9 = vcmp.gt.f32.partialorder %v1099_v1, 0.0 }
 0x646   :  { %v1014_v7 = vpop.permute.xlu0 %1013  ;;  %v995_v8 = vpop.permute.xlu1 %994 }
 0x647   :  { %v1098_v9 = vadd.f32 %v1081_v62, %v1014_v7  ;;  %v1094_v10 = vadd.f32 %v1077_v3, %v995_v8  ;;  %v1133_v12 = vsel %vm1109_vm8, %v1097_v2, %v1121_v6  ;;  %v1135_v14 = vsel %vm1111_vm9, %v1099_v1, %v1123_v5 }
 0x648   :  { %v8912_v16 = vadd.f32 %v1133_v12, %v8904_v4  ;;  %v8922_v26 = vadd.f32 %v1135_v14, %v8909_v13 }
 0x649   :  { %v1122_v18 = vmul.f32 0.2, %v1098_v9  ;;  %v1118_v19 = vmul.f32 0.2, %v1094_v10  ;;  %vm1110_vm11 = vcmp.gt.f32.partialorder %v1098_v9, 0.0  ;;  %vm1106_vm12 = vcmp.gt.f32.partialorder %v1094_v10, 0.0 }
 0x64a   :  { %v999_v20 = vpop.permute.xlu0 %998  ;;  %v1003_v21 = vpop.permute.xlu1 %1002  ;;  %v1164_v22 = vsel %vm1154_vm10, %v8912_v16, -inf  ;;  %v1170_v46 = vsel %vm1154_vm10, %v8922_v26, -inf }
 0x64b   :  { %v1095_v27 = vadd.f32 %v1077_v3, %v999_v20  ;;  %v1096_v28 = vadd.f32 %v1077_v3, %v1003_v21  ;;  %1165 = vmax.xlane.f32.xlu0 %v1164_v22  ;;  %v1134_v29 = vsel %vm1110_vm11, %v1098_v9, %v1122_v18  ;;  %v1130_v30 = vsel %vm1106_vm12, %v1094_v10, %v1118_v19 }
 0x64c   :  { %v8926_v36 = vadd.f32 %v1134_v29, %v8917_v17  ;;  %v8933_v49 = vadd.f32 %v1130_v30, %v8904_v4 }
 0x64d   :  { %v1119_v37 = vmul.f32 0.2, %v1095_v27  ;;  %v1120_v39 = vmul.f32 0.2, %v1096_v28  ;;  %vm1107_vm13 = vcmp.gt.f32.partialorder %v1095_v27, 0.0  ;;  %vm1108_vm14 = vcmp.gt.f32.partialorder %v1096_v28, 0.0 }
 0x64e   :  { %v1025_v43 = vpop.permute.xlu0 %1024  ;;  %v1029_v44 = vpop.permute.xlu1 %1028  ;;  %v1167_v48 = vsel %vm1154_vm10, %v8926_v36, -inf  ;;  %v1155_v42 = vsel %vm1154_vm10, %v8933_v49, -inf }
 0x64f   :  { %v1100_v50 = vadd.f32 %v1085_v33, %v1025_v43  ;;  %v1101_v52 = vadd.f32 %v1085_v33, %v1029_v44  ;;  %1171 = vmax.xlane.f32.xlu0 %v1170_v46  ;;  %1168 = vmax.xlane.f32.xlu1 %v1167_v48  ;;  %v1131_v53 = vsel %vm1107_vm13, %v1095_v27, %v1119_v37 }
 0x650   :  { %v8936_v23 = vadd.f32 %v1131_v53, %v8917_v17  ;;  %v1132_v38 = vsel %vm1108_vm14, %v1096_v28, %v1120_v39 }
 0x651   :  { %v1124_v25 = vmul.f32 0.2, %v1100_v50  ;;  %v1125_v56 = vmul.f32 0.2, %v1101_v52  ;;  %vm1112_vm15 = vcmp.gt.f32.partialorder %v1100_v50, 0.0  ;;  %v8944_v61 = vadd.f32 %v1132_v38, %v8909_v13 }
 0x652   :  { %v1040_v58 = vpop.permute.xlu1 %1039  ;;  %v1158_v60 = vsel %vm1154_vm10, %v8936_v23, -inf  ;;  %vm1113_vm2 = vcmp.gt.f32.partialorder %v1101_v52, 0.0  ;;  %v1033_v20 = vpop.permute.xlu0 %1032 }
 0x653   :  { %v1103_v62 = vadd.f32 %v1089_v57, %v1040_v58  ;;  %1159 = vmax.xlane.f32.xlu1 %v1158_v60  ;;  %1156 = vmax.xlane.f32.xlu0 %v1155_v42  ;;  %v1136_v63 = vsel %vm1112_vm15, %v1100_v50, %v1124_v25  ;;  %v1137_v0 = vsel %vm1113_vm2, %v1101_v52, %v1125_v56  ;;  %v1161_v5 = vsel %vm1154_vm10, %v8944_v61, -inf }
 0x654   :  { %v8947_v51 = vadd.f32 %v1136_v63, %v8904_v4  ;;  %v8954_v6 = vadd.f32 %v1137_v0, %v8917_v17  ;;  %v1102_v21 = vadd.f32 %v1085_v33, %v1033_v20 }
 0x655   :  { %v1127_v1 = vmul.f32 0.2, %v1103_v62  ;;  %vm1115_vm3 = vcmp.gt.f32.partialorder %v1103_v62, 0.0 }
 0x656   :  { %v1048_v2 = vpop.permute.xlu1 %1047  ;;  %v1173_v3 = vsel %vm1154_vm10, %v8947_v51, -inf  ;;  %v1176_v10 = vsel %vm1154_vm10, %v8954_v6, -inf  ;;  %v1044_v22 = vpop.permute.xlu0 %1043  ;;  %v1126_v27 = vmul.f32 0.2, %v1102_v21  ;;  %vm1114_vm5 = vcmp.gt.f32.partialorder %v1102_v21, 0.0 }
 0x657   :  { %v1105_v7 = vadd.f32 %v1089_v57, %v1048_v2  ;;  %1174 = vmax.xlane.f32.xlu1 %v1173_v3  ;;  %1162 = vmax.xlane.f32.xlu0 %v1161_v5  ;;  %v1139_v8 = vsel %vm1115_vm3, %v1103_v62, %v1127_v1  ;;  %v1104_v28 = vadd.f32 %v1089_v57, %v1044_v22 }
 0x658   :  { %v8959_v12 = vadd.f32 %v1139_v8, %v8904_v4  ;;  %v1138_v30 = vsel %vm1114_vm5, %v1102_v21, %v1126_v27 }
 0x659   :  { %v1129_v9 = vmul.f32 0.2, %v1105_v7  ;;  %vm1117_vm4 = vcmp.gt.f32.partialorder %v1105_v7, 0.0  ;;  %v1128_v29 = vmul.f32 0.2, %v1104_v28  ;;  %vm1116_vm6 = vcmp.gt.f32.partialorder %v1104_v28, 0.0 }
 0x65a   :  { %v1182_v15 = vsel %vm1154_vm10, %v8959_v12, -inf  ;;  %v8973_v31 = vadd.f32 %v1138_v30, %v8909_v13 }
 0x65b   :  { %1177 = vmax.xlane.f32.xlu0 %v1176_v10  ;;  %v1141_v14 = vsel %vm1117_vm4, %v1105_v7, %v1129_v9  ;;  %v1140_v37 = vsel %vm1116_vm6, %v1104_v28, %v1128_v29 }
 0x65c   :  { %v8964_v18 = vadd.f32 %v1141_v14, %v8909_v13  ;;  %v1179_v39 = vsel %vm1154_vm10, %v8973_v31, -inf  ;;  %v8978_v43 = vadd.f32 %v1140_v37, %v8917_v17 }
 0x65e   :  { %v1188_v19 = vsel %vm1154_vm10, %v8964_v18, -inf  ;;  %v1185_v33 = vsel %vm1154_vm10, %v8978_v43, -inf }
 0x65f   :  { %1183 = vmax.xlane.f32.xlu0 %v1182_v15 }
 0x663   :  { %1189 = vmax.xlane.f32.xlu0 %v1188_v19 }
 0x668   :  { %8377 = vrot.lane.b32.xlu1 %v8855_v34, %s8577_s30 }
 0x679   :  { %1294 = vrot.lane.b32.xlu0 %v8859_v35, %s8577_s30 }
 0x68c   :  { %1180 = vmax.xlane.f32.xlu1 %v1179_v39 }
 0x690   :  { %1186 = vmax.xlane.f32.xlu1 %v1185_v33 }
 0x6a1   :  { %8382 = vrot.lane.b32.xlu1 %v8855_v34, %s8578_s6 }
 0x6d8   :  { %v1166_v44 = vpop.xlane.xlu0 %1165 }
 0x6d9   :  { %v1194_v46 = vsub.f32 %v8912_v16, %v1166_v44 }
 0x6db   :  { %v1209_v48 = vmul.f32 1.442695, %v1194_v46 }
 0x6dc   :  { %v1172_v50 = vpop.xlane.xlu0 %1171  ;;  %v1169_v52 = vpop.xlane.xlu1 %1168 }
 0x6dd   :  { %8410 = vpow2.f32 %v1209_v48  ;;  %v1196_v53 = vsub.f32 %v8922_v26, %v1172_v50  ;;  %v1195_v38 = vsub.f32 %v8926_v36, %v1169_v52 }
 0x6df   :  { %v1213_v25 = vmul.f32 1.442695, %v1196_v53  ;;  %v1211_v56 = vmul.f32 1.442695, %v1195_v38 }
 0x6e0   :  { %v1157_v57 = vpop.xlane.xlu0 %1156  ;;  %v1160_v58 = vpop.xlane.xlu1 %1159 }
 0x6e1   :  { %8412 = vpow2.f32 %v1213_v25  ;;  %v1191_v60 = vsub.f32 %v8933_v49, %v1157_v57  ;;  %v1192_v42 = vsub.f32 %v8936_v23, %v1160_v58 }
 0x6e2   :  { %8414 = vpow2.f32 %v1211_v56 }
 0x6e3   :  { %v1203_v62 = vmul.f32 1.442695, %v1191_v60  ;;  %v1205_v16 = vmul.f32 1.442695, %v1192_v42 }
 0x6e4   :  { %v1163_v63 = vpop.xlane.xlu0 %1162  ;;  %v1175_v0 = vpop.xlane.xlu1 %1174 }
 0x6e5   :  { %8416 = vpow2.f32 %v1203_v62  ;;  %v1193_v1 = vsub.f32 %v8944_v61, %v1163_v63  ;;  %v1197_v26 = vsub.f32 %v8947_v51, %v1175_v0 }
 0x6e6   :  { %8418 = vpow2.f32 %v1205_v16 }
 0x6e7   :  { %v8991_v36 = vpop.eup %8410  ;;  %v1207_v2 = vmul.f32 1.442695, %v1193_v1  ;;  %v1215_v3 = vmul.f32 1.442695, %v1197_v26 }
 0x6e8   :  { %v1178_v5 = vpop.xlane.xlu0 %1177  ;;  %v8378_v7 = vpop.permute.xlu1 %8377  ;;  %v1236_v49 = vsel %vm1154_vm10, %v8991_v36, 0.0 }
 0x6e9   :  { %8420 = vpow2.f32 %v1207_v2  ;;  %v1198_v23 = vsub.f32 %v8954_v6, %v1178_v5  ;;  %v8380_v8 = vunpack.i.h.bf16 %v8378_v7  ;;  %v8379_v9 = vunpack.i.l.bf16 %v8378_v7  ;;  %1237 = vadd.xlane.f32.xlu1 %v1236_v49 }
 0x6ea   :  { %8422 = vpow2.f32 %v1215_v3 }
 0x6eb   :  { %v8996_v10 = vpop.eup %8412  ;;  %v1217_v61 = vmul.f32 1.442695, %v1198_v23  ;;  %v7454_v51 = vpack.c.bf16 %v8380_v8, %v8379_v9 }
 0x6ec   :  { %v8998_v14 = vpop.eup %8414  ;;  %v1184_v15 = vpop.xlane.xlu0 %1183  ;;  %v1242_v19 = vsel %vm1154_vm10, %v8996_v10, 0.0 }
 0x6ed   :  { %8424 = vpow2.f32 %v1217_v61  ;;  %v1200_v20 = vsub.f32 %v8959_v12, %v1184_v15  ;;  %1243 = vadd.xlane.f32.xlu1 %v1242_v19  ;;  %v1239_v6 = vsel %vm1154_vm10, %v8998_v14, 0.0  ;;  %7455 = vmatpush3.bf16.msra.mxu0 %v7454_v51 }
 0x6ee   :  { %1240 = vadd.xlane.f32.xlu0 %v1239_v6  ;;  %6999 = vmatprep.subr.mxu0 %v8573_v41 }
 0x6ef   :  { %v9006_v21 = vpop.eup %8416  ;;  %v1221_v22 = vmul.f32 1.442695, %v1200_v20 }
 0x6f0   :  { %v9008_v27 = vpop.eup %8418  ;;  %v1190_v28 = vpop.xlane.xlu0 %1189  ;;  %v1227_v29 = vsel %vm1154_vm10, %v9006_v21, 0.0 }
 0x6f1   :  { %8426 = vpow2.f32 %v1221_v22  ;;  %v1230_v12 = vsel %vm1154_vm10, %v9008_v27, 0.0  ;;  %v1202_v53 = vsub.f32 %v8964_v18, %v1190_v28 }
 0x6f2   :  { %1228 = vadd.xlane.f32.xlu0 %v1227_v29  ;;  %1231 = vadd.xlane.f32.xlu1 %v1230_v12 }
 0x6f3   :  { %v9014_v30 = vpop.eup %8420  ;;  %v1225_v56 = vmul.f32 1.442695, %v1202_v53 }
 0x6f4   :  { %v1295_v37 = vpop.permute.xlu0 %1294  ;;  %v1233_v39 = vsel %vm1154_vm10, %v9014_v30, 0.0  ;;  %v9018_v33 = vpop.eup %8422 }
 0x6f5   :  { %7000 = vmatpush3.msra.mxu0 %v1295_v37  ;;  %v1245_v48 = vsel %vm1154_vm10, %v9018_v33, 0.0 }
 0x6f6   :  { %1234 = vadd.xlane.f32.xlu0 %v1233_v39  ;;  %7456 = vmatprep.subr.bf16.mxu0 %v8574_v11 }
 0x6f7   :  { %v9021_v44 = vpop.eup %8424 }
 0x6f8   :  { %v1248_v46 = vsel %vm1154_vm10, %v9021_v44, 0.0 }
 0x6f9   :  { %1249 = vadd.xlane.f32.xlu1 %v1248_v46 }
 0x6fa   :  { %1246 = vadd.xlane.f32.xlu0 %v1245_v48 }
 0x6fb   :  { %v9027_v50 = vpop.eup %8426 }
 0x6fc   :  { %v1254_v52 = vsel %vm1154_vm10, %v9027_v50, 0.0 }
 0x6fd   :  { %1255 = vadd.xlane.f32.xlu1 %v1254_v52 }
 0x719   :  { %v1181_v38 = vpop.xlane.xlu1 %1180 }
 0x71a   :  { %v1199_v25 = vsub.f32 %v8973_v31, %v1181_v38 }
 0x71c   :  { %v1219_v57 = vmul.f32 1.442695, %v1199_v25 }
 0x71d   :  { %v1187_v58 = vpop.xlane.xlu1 %1186 }
 0x71e   :  { %8428 = vpow2.f32 %v1219_v57  ;;  %v1201_v60 = vsub.f32 %v8978_v43, %v1187_v58 }
 0x71f   :  { %8430 = vpow2.f32 %v1225_v56 }
 0x720   :  { %v1223_v42 = vmul.f32 1.442695, %v1201_v60 }
 0x721   :  { %v8383_v43 = vpop.permute.xlu1 %8382 }
 0x722   :  { %8432 = vpow2.f32 %v1223_v42  ;;  %v8385_v61 = vunpack.i.h.bf16 %v8383_v43  ;;  %v8384_v51 = vunpack.i.l.bf16 %v8383_v43 }
 0x724   :  { %v7460_v19 = vpack.c.bf16 %v8385_v61, %v8384_v51 }
 0x728   :  { %v9034_v62 = vpop.eup %8428 }
 0x729   :  { %v1251_v16 = vsel %vm1154_vm10, %v9034_v62, 0.0  ;;  %v9038_v63 = vpop.eup %8430 }
 0x72a   :  { %1252 = vadd.xlane.f32.xlu0 %v1251_v16  ;;  %v1260_v31 = vsel %vm1154_vm10, %v9038_v63, 0.0  ;;  %v1725_v16 = vld [vmem:[%s11994_s2 + $0x100] sm:$0xff] }
 0x72c   :  { %v9040_v18 = vpop.eup %8432 }
 0x72d   :  { %v1257_v0 = vsel %vm1154_vm10, %v9040_v18, 0.0 }
 0x72e   :  { %1261 = vadd.xlane.f32.xlu0 %v1260_v31  ;;  %1258 = vadd.xlane.f32.xlu1 %v1257_v0  ;;  %v1727_v31 = vld [vmem:[%s11994_s2 + $0x140] sm:$0xff] }
 0x73f   :  { %8387 = vrot.lane.b32.xlu1 %v8855_v34, %s8579_s7 }
 0x743   :  { %1582 = vrot.lane.b32.xlu1 %v8859_v35, %s8579_s7 }
 0x744   :  { %1481 = vrot.lane.b32.xlu0 %v8859_v35, %s8578_s6 }
 0x776   :  { %v1238_v1 = vpop.xlane.xlu1 %1237 }
 0x777   :  { %8434 = vrcp.f32 %v1238_v1 }
 0x77a   :  { %v1244_v2 = vpop.xlane.xlu1 %1243 }
 0x77b   :  { %v1241_v26 = vpop.xlane.xlu0 %1240 }
 0x77c   :  { %8436 = vrcp.f32 %v1241_v26 }
 0x77d   :  { %8438 = vrcp.f32 %v1244_v2  ;;  %v759_v2 = vld [vmem:[%s11994_s2 + $0xc0] ss:$0 sm:$0xff] }
 0x77f   :  { %v1229_v3 = vpop.xlane.xlu0 %1228  ;;  %v1232_v49 = vpop.xlane.xlu1 %1231 }
 0x780   :  { %8440 = vrcp.f32 %v1229_v3 }
 0x781   :  { %v8435_v5 = vpop.eup %8434  ;;  %8442 = vrcp.f32 %v1232_v49 }
 0x782   :  { %v1278_v7 = vmul.f32 %v8435_v5, %v8991_v36 }
 0x783   :  { %v1235_v23 = vpop.xlane.xlu0 %1234 }
 0x784   :  { %7002 = vmatmul.mubr.msk.f32.vlgmr.msra.gmra.mrb[18].mxu0 %vm1154_vm10, %v1278_v7  ;;  %8444 = vrcp.f32 %v1235_v23 }
 0x785   :  { %7458 = vmatpush3.bf16.msra.mxu0 %v8853_v32  ;;  %7004 = vmatprep.mubr.msk.f32.mxu0 %vm8575_vm7, %v8573_v41 }
 0x786   :  { %v8437_v34 = vpop.eup %8436  ;;  %7014 = vmatprep.subr.mxu0 %v8573_v41 }
 0x787   :  { %v1279_v8 = vmul.f32 %v8437_v34, %v8998_v14  ;;  %v8439_v9 = vpop.eup %8438  ;;  %v1247_v6 = vpop.xlane.xlu0 %1246 }
 0x788   :  { %v1280_v32 = vmul.f32 %v8439_v9, %v8996_v10  ;;  %8446 = vrcp.f32 %v1247_v6 }
 0x789   :  { %7005 = vmatmul.mubr.msk.f32.gmra.mrb[20].mxu0 %vm1154_vm10, %v1279_v8 }
 0x78a   :  { %7015 = vmatpush3.msra.mxu0 %v8859_v35  ;;  %7007 = vmatprep.mubr.msk.f32.mxu0 %vm8575_vm7, %v8573_v41  ;;  %v8441_v36 = vpop.eup %8440 }
 0x78b   :  { %7459 = vmatprep.subr.bf16.mxu0 %v8574_v11  ;;  %v1275_v14 = vmul.f32 %v8441_v36, %v9006_v21  ;;  %v8443_v15 = vpop.eup %8442  ;;  %v1250_v21 = vpop.xlane.xlu1 %1249 }
 0x78c   :  { %v1276_v35 = vmul.f32 %v8443_v15, %v9008_v27  ;;  %8448 = vrcp.f32 %v1250_v21 }
 0x78d   :  { %7008 = vmatmul.mubr.msk.f32.gmra.mrb[22].mxu0 %vm1154_vm10, %v1280_v32 }
 0x78e   :  { %7016 = vmatprep.mubr.msk.f32.mxu0 %vm8575_vm7, %v8573_v41  ;;  %v8445_v10 = vpop.eup %8444 }
 0x78f   :  { %v1277_v20 = vmul.f32 %v8445_v10, %v9014_v30  ;;  %v1256_v22 = vpop.xlane.xlu1 %1255 }
 0x791   :  { %7017 = vmatmul.mubr.msk.f32.vlgmr.msra.gmra.mrb[18].mxu0 %vm1154_vm10, %v1275_v14 }
 0x792   :  { %7461 = vmatpush3.bf16.msra.mxu0 %v7460_v19  ;;  %7019 = vmatprep.mubr.msk.f32.mxu0 %vm8575_vm7, %v8573_v41  ;;  %v8447_v12 = vpop.eup %8446 }
 0x793   :  { %7029 = vmatprep.subr.mxu0 %v8573_v41  ;;  %v1281_v37 = vmul.f32 %v8447_v12, %v9018_v33 }
 0x795   :  { %7020 = vmatmul.mubr.msk.f32.gmra.mrb[20].mxu0 %vm1154_vm10, %v1276_v35 }
 0x796   :  { %7022 = vmatprep.mubr.msk.f32.mxu0 %vm8575_vm7, %v8573_v41  ;;  %v8449_v46 = vpop.eup %8448 }
 0x797   :  { %v1282_v38 = vmul.f32 %v8449_v46, %v9021_v44 }
 0x799   :  { %7023 = vmatmul.mubr.msk.f32.gmra.mrb[22].mxu0 %vm1154_vm10, %v1277_v20 }
 0x79a   :  { %7031 = vmatprep.mubr.msk.f32.mxu0 %vm8575_vm7, %v8573_v41 }
 0x7b7   :  { %v1253_v27 = vpop.xlane.xlu0 %1252 }
 0x7b8   :  { %8450 = vrcp.f32 %v1253_v27 }
 0x7b9   :  { %8452 = vrcp.f32 %v1256_v22 }
 0x7bb   :  { %v1262_v28 = vpop.xlane.xlu0 %1261  ;;  %v1259_v29 = vpop.xlane.xlu1 %1258 }
 0x7bc   :  { %8454 = vrcp.f32 %v1259_v29 }
 0x7bd   :  { %8456 = vrcp.f32 %v1262_v28 }
 0x7bf   :  { %v1482_v39 = vpop.permute.xlu0 %1481  ;;  %v8388_v30 = vpop.permute.xlu1 %8387 }
 0x7c0   :  { %v8390_v48 = vunpack.i.h.bf16 %v8388_v30  ;;  %v8389_v52 = vunpack.i.l.bf16 %v8388_v30  ;;  %7030 = vmatpush3.msra.mxu0 %v1482_v39 }
 0x7c1   :  { %7032 = vmatmul.mubr.msk.f32.vlgmr.msra.gmra.mrb[18].mxu0 %vm1154_vm10, %v1281_v37  ;;  %7462 = vmatprep.subr.bf16.mxu0 %v8574_v11 }
 0x7c2   :  { %v7463_v53 = vpack.c.bf16 %v8390_v48, %v8389_v52  ;;  %7034 = vmatprep.mubr.msk.f32.mxu0 %vm8575_vm7, %v8573_v41  ;;  %v8451_v25 = vpop.eup %8450 }
 0x7c3   :  { %v1583_v33 = vpop.permute.xlu1 %1582  ;;  %v1283_v56 = vmul.f32 %v8451_v25, %v9034_v62  ;;  %v8453_v57 = vpop.eup %8452 }
 0x7c4   :  { %7464 = vmatpush3.bf16.msra.mxu0 %v7463_v53  ;;  %v1284_v44 = vmul.f32 %v8453_v57, %v9027_v50  ;;  %v1724_v50 = vld [vmem:[%s11994_s2 + $0xe0] sm:$0xff] }
 0x7c5   :  { %7035 = vmatmul.mubr.msk.f32.gmra.mrb[20].mxu0 %vm1154_vm10, %v1282_v38  ;;  %7044 = vmatprep.subr.mxu0 %v8573_v41 }
 0x7c6   :  { %7037 = vmatprep.mubr.msk.f32.mxu0 %vm8575_vm7, %v8573_v41  ;;  %v8455_v58 = vpop.eup %8454 }
 0x7c7   :  { %v1285_v60 = vmul.f32 %v8455_v58, %v9040_v18  ;;  %v8457_v42 = vpop.eup %8456  ;;  %v7466_v18 = vpack.c.bf16 %v1725_v16, %v1724_v50 }
 0x7c8   :  { %7045 = vmatpush3.msra.mxu0 %v1583_v33  ;;  %v1286_v62 = vmul.f32 %v8457_v42, %v9038_v63  ;;  %v1726_v63 = vld [vmem:[%s11994_s2 + $0x120] sm:$0xff] }
 0x7c9   :  { %7038 = vmatmul.mubr.msk.f32.gmra.mrb[22].mxu0 %vm1154_vm10, %v1283_v56  ;;  %7467 = vmatpush3.bf16.msra.mxu1 %v7466_v18  ;;  %v7469_v0 = vpack.c.bf16 %v1727_v31, %v1726_v63 }
 0x7ca   :  { %7046 = vmatprep.mubr.msk.f32.mxu0 %vm8575_vm7, %v8573_v41  ;;  %7468 = vmatprep.subr.bf16.mxu1 %v8574_v11 }
 0x7cd   :  { %7047 = vmatmul.mubr.msk.f32.vlgmr.msra.gmra.mrb[18].mxu0 %vm1154_vm10, %v1284_v44  ;;  %7470 = vmatpush3.bf16.msra.mxu1 %v7469_v0 }
 0x7ce   :  { %7049 = vmatprep.mubr.msk.f32.mxu0 %vm8575_vm7, %v8573_v41  ;;  %7471 = vmatprep.subr.bf16.mxu1 %v8574_v11 }
 0x7d1   :  { %7050 = vmatmul.mubr.msk.f32.gmra.mrb[20].mxu0 %vm1154_vm10, %v1285_v60 }
 0x7d2   :  { %7052 = vmatprep.mubr.msk.f32.mxu0 %vm8575_vm7, %v8573_v41 }
 0x7d5   :  { %7053 = vmatmul.mubr.msk.f32.gmra.mrb[22].mxu0 %vm1154_vm10, %v1286_v62 }
 0x7d6   :  { %2790 = vmatprep.mubr.f32.mxu0 %v8573_v41 }
 0x8a0   :  { %v1662_v43 = vpop.f32.mrb[18].mxu0 }
 0x8a1   :  { %v1679_v1 = vmul.f32 0.25, %v1662_v43  ;;  %v7048_v26 = vpop.f32.mrb[19].mxu0 }
 0x8a3   :  { %v1682_v5 = vadd.f32 %v1679_v1, %v759_v2 }
 0x8a4   :  { %v1667_v3 = vpop.f32.mrb[20].mxu0 }
 0x8a5   :  { %v1680_v7 = vmul.f32 0.25, %v1667_v3  ;;  %v7051_v49 = vpop.f32.mrb[21].mxu0  ;;  %v1685_v8 = vsel %vm196_vm1, %v1682_v5, 0.0 }
 0x8a6   :  { %v1728_v49 = vld [vmem:[%s11994_s2 + $0x160] sm:$0xf] }
 0x8a7   :  { %v1683_v34 = vadd.f32 %v1680_v7, %v759_v2 }
 0x8a8   :  { %v1672_v23 = vpop.f32.mrb[22].mxu0 }
 0x8a9   :  { %v1686_v9 = vsel %vm196_vm1, %v1683_v34, 0.0  ;;  %v1681_v32 = vmul.f32 0.25, %v1672_v23  ;;  %v7054_v36 = vpop.f32.mrb[23].mxu0 }
 0x8aa   :  { %v1687_v61 = vadd.f32 %v1686_v9, %v1685_v8 }
 0x8ab   :  { %v1684_v51 = vadd.f32 %v1681_v32, %v759_v2 }
 0x8ad   :  { %v1688_v14 = vsel %vm196_vm1, %v1684_v51, 0.0 }
 0x8ae   :  { %v1689_v15 = vadd.f32 %v1688_v14, %v1687_v61 }
 0x8b0   :  { %v1690_v19 = vrot.slane %v1689_v15, 4 }
 0x8b2   :  { %v1691_v35 = vadd.f32 %v1690_v19, %v1689_v15 }
 0x8b4   :  { %v1692_v10 = vrot.slane %v1691_v35, 2 }
 0x8b6   :  { %v1693_v20 = vadd.f32 %v1692_v10, %v1691_v35 }
 0x8b8   :  { %v1694_v6 = vrot.slane %v1693_v20, 1 }
 0x8ba   :  { %v1695_v21 = vadd.f32 %v1694_v6, %v1693_v20 }
 0x8bc   :  { %v1697_v22 = vmul.f32 0.041666668, %v1695_v21 }
 0x8be   :  { %v1698_v27 = vsub.f32 %v1682_v5, %v1697_v22  ;;  %v1699_v28 = vsub.f32 %v1683_v34, %v1697_v22  ;;  %v1700_v29 = vsub.f32 %v1684_v51, %v1697_v22  ;;  %v1729_v34 = vld [vmem:[%s11994_s2 + $0x180] sm:$0xf] }
 0x8c0   :  { %v1701_v12 = vmul.f32 %v1698_v27, %v1698_v27  ;;  %v1702_v37 = vmul.f32 %v1699_v28, %v1699_v28  ;;  %v1703_v39 = vmul.f32 %v1700_v29, %v1700_v29 }
 0x8c2   :  { %v1704_v30 = vsel %vm196_vm1, %v1701_v12, 0.0  ;;  %v1705_v46 = vsel %vm196_vm1, %v1702_v37, 0.0  ;;  %v1707_v52 = vsel %vm196_vm1, %v1703_v39, 0.0 }
 0x8c3   :  { %v1706_v48 = vadd.f32 %v1705_v46, %v1704_v30 }
 0x8c5   :  { %v1708_v53 = vadd.f32 %v1707_v52, %v1706_v48 }
 0x8c7   :  { %v1709_v38 = vrot.slane %v1708_v53, 4 }
 0x8c9   :  { %v1710_v25 = vadd.f32 %v1709_v38, %v1708_v53 }
 0x8cb   :  { %v1711_v33 = vrot.slane %v1710_v25, 2 }
 0x8cd   :  { %v1712_v56 = vadd.f32 %v1711_v33, %v1710_v25 }
 0x8cf   :  { %v1713_v57 = vrot.slane %v1712_v56, 1 }
 0x8d1   :  { %v1714_v44 = vadd.f32 %v1713_v57, %v1712_v56 }
 0x8d3   :  { %v1715_v58 = vmul.f32 0.041666668, %v1714_v44 }
 0x8d5   :  { %v1716_v60 = vadd.f32 1e-05, %v1715_v58 }
 0x8d7   :  { %8458 = vrsqrt.f32 %v1716_v60 }
 0x8e1   :  { %v8459_v42 = vpop.eup %8458 }
 0x8e2   :  { %v1720_v62 = vmul.f32 %v8459_v42, %v1700_v29  ;;  %v1718_v50 = vmul.f32 %v8459_v42, %v1698_v27  ;;  %v1719_v16 = vmul.f32 %v8459_v42, %v1699_v28 }
 0x8e4   :  { %v1721_v18 = vmax.f32 %v1718_v50, 0.0  ;;  %v1722_v63 = vmax.f32 %v1719_v16, 0.0  ;;  %v1723_v31 = vmax.f32 %v1720_v62, 0.0 }
 0x8e6   :  { %7064 = vmatmul.mubr.msk.f32.vlgmr.msra.gmra.mrb[14].mxu1 %vm196_vm1, %v1721_v18 }
 0x8e7   :  { %7066 = vmatprep.mubr.msk.f32.mxu1 %vm8575_vm7, %v8573_v41 }
 0x8ea   :  { %7067 = vmatmul.mubr.msk.f32.gmra.mrb[16].mxu1 %vm196_vm1, %v1722_v63 }
 0x8eb   :  { %7069 = vmatprep.mubr.msk.f32.mxu1 %vm8575_vm7, %v8573_v41 }
 0x8ee   :  { %7070 = vmatmul.mubr.msk.f32.gmra.mrb[18].mxu1 %vm196_vm1, %v1723_v31 }
 0x8ef   :  { %7078 = vmatprep.mubr.msk.f32.mxu1 %vm8575_vm7, %v8573_v41 }
 0x9b9   :  { %v1806_v0 = vpop.f32.mrb[14].mxu1 }
 0x9ba   :  { %v7065_v43 = vpop.f32.mrb[15].mxu1 }
 0x9bd   :  { %v1811_v1 = vpop.f32.mrb[16].mxu1 }
 0x9be   :  { %v9138_v26 = vpack.c.bf16 %v1811_v1, %v1806_v0  ;;  %v7068_v2 = vpop.f32.mrb[17].mxu1  ;;  %v9140_v3 = vpack.i.bf16 %v1811_v1, %v1806_v0 }
 0x9c0   :  { %7473 = vmatpush3.bf16.xpose.msra.mxu1 %v9138_v26 }
 0x9c1   :  { %v9143_v5 = vpop.f32.mrb[18].mxu1  ;;  %7076 = vmatprep.subr.mxu1 %v8573_v41 }
 0x9c2   :  { %v7071_v7 = vpop.f32.mrb[19].mxu1 }
 0x9c8   :  { %7077 = vmatpush3.xpose.msra.mxu1 %v9143_v5 }
 0x9c9   :  { %7474 = vmatprep.subr.bf16.mxu1 %v8574_v11 }
 0x9cb   :  { %7079 = vmatmul.mubr.f32.vlgmr.msra.gmra.mrb[20].mxu1 %v1728_v49 }
 0x9cc   :  { %7476 = vmatpush3.bf16.xpose.msra.mxu1 %v9138_v26  ;;  %7087 = vmatprep.mubr.msk.f32.mxu1 %vm8575_vm7, %v8573_v41 }
 0x9cd   :  { %7085 = vmatprep.subr.mxu1 %v8573_v41 }
 0x9d4   :  { %7086 = vmatpush3.xpose.msra.mxu1 %v9143_v5 }
 0x9d5   :  { %7477 = vmatprep.subr.bf16.mxu1 %v8574_v11 }
 0x9d7   :  { %7088 = vmatmul.mubr.f32.vlgmr.msra.gmra.mrb[22].mxu1 %v1729_v34 }
 0x9d8   :  { %7096 = vmatprep.mubr.msk.f32.mxu1 %vm8575_vm7, %v8573_v41 }
 0xa9e   :  { %v1886_v23 = vpop.f32.mrb[20].mxu1 }
 0xa9f   :  { %v7080_v8 = vpop.f32.mrb[21].mxu1  ;;  %v2027_v15 = vrot.slane %v1886_v23, %v8894_v59 }
 0xaa1   :  { %v2028_v19 = vcombine.high %v2027_v15, %v2027_v15  ;;  %v2035_v10 = vrot.slane %v2027_v15, %v8894_v59 }
 0xaa3   :  { %v2042_v35 = vrot.slane %v2028_v19, %v8894_v59  ;;  %v2048_v28 = vrot.slane %v2035_v10, %v8885_v54  ;;  %v2043_v53 = vcombine.high %v2035_v10, %v2035_v10 }
 0xaa5   :  { %v2052_v20 = vrot.slane %v2042_v35, %v8885_v54  ;;  %v2044_v16 = vcombine.high %v2042_v35, %v2042_v35  ;;  %v2056_v18 = vrot.slane %v2043_v53, %v8885_v54 }
 0xaaa   :  { %v1956_v9 = vpop.f32.mrb[22].mxu1 }
 0xaab   :  { %v7089_v32 = vpop.f32.mrb[23].mxu1  ;;  %v1978_v36 = vrot.slane %v1956_v9, %v8882_v47  ;;  %v1963_v61 = vrot.slane %v1956_v9, %v8885_v54  ;;  %v1993_v51 = vrot.slane %v1956_v9, %v8888_v24  ;;  %v2008_v14 = vrot.slane %v1956_v9, %v8891_v55 }
 0xaac   :  { %v2060_v32 = vrot.slane %v2044_v16, %v8885_v54 }
 0xaad   :  { %1984 = vbcast.lane.b32.xlu1 %v1978_v36, 264  ;;  %1980 = vbcast.lane.b32.xlu0 %v1978_v36, 256 }
 0xab1   :  { %1988 = vbcast.lane.b32.xlu0 %v1978_v36, 272  ;;  %1965 = vbcast.lane.b32.xlu1 %v1963_v61, 256 }
 0xab5   :  { %1969 = vbcast.lane.b32.xlu0 %v1963_v61, 264  ;;  %1973 = vbcast.lane.b32.xlu1 %v1963_v61, 272 }
 0xab9   :  { %1995 = vbcast.lane.b32.xlu0 %v1993_v51, 256  ;;  %1999 = vbcast.lane.b32.xlu1 %v1993_v51, 264 }
 0xabd   :  { %2003 = vbcast.lane.b32.xlu0 %v1993_v51, 272  ;;  %2010 = vbcast.lane.b32.xlu1 %v2008_v14, 256 }
 0xac1   :  { %2014 = vbcast.lane.b32.xlu0 %v2008_v14, 264  ;;  %2018 = vbcast.lane.b32.xlu1 %v2008_v14, 272 }
 0xb1f   :  { %v1985_v6 = vpop.permute.xlu1 %1984  ;;  %v1981_v21 = vpop.permute.xlu0 %1980 }
 0xb20   :  { %v2069_v22 = vadd.f32 %v2052_v20, %v1985_v6  ;;  %v2068_v27 = vadd.f32 %v2052_v20, %v1981_v21 }
 0xb22   :  { %vm2081_vm8 = vcmp.gt.f32.partialorder %v2069_v22, 0.0  ;;  %v2093_v29 = vmul.f32 0.2, %v2069_v22  ;;  %vm2080_vm9 = vcmp.gt.f32.partialorder %v2068_v27, 0.0  ;;  %v2092_v12 = vmul.f32 0.2, %v2068_v27 }
 0xb23   :  { %v1989_v37 = vpop.permute.xlu0 %1988  ;;  %v1966_v39 = vpop.permute.xlu1 %1965 }
 0xb24   :  { %v2070_v30 = vadd.f32 %v2052_v20, %v1989_v37  ;;  %v2065_v46 = vadd.f32 %v2048_v28, %v1966_v39  ;;  %v2104_v48 = vsel %vm2080_vm9, %v2068_v27, %v2092_v12  ;;  %v2105_v52 = vsel %vm2081_vm8, %v2069_v22, %v2093_v29 }
 0xb25   :  { %v9172_v38 = vadd.f32 %v2104_v48, %v8904_v4  ;;  %v9175_v25 = vadd.f32 %v2105_v52, %v8917_v17 }
 0xb26   :  { %vm2082_vm11 = vcmp.gt.f32.partialorder %v2070_v30, 0.0  ;;  %v2094_v33 = vmul.f32 0.2, %v2070_v30  ;;  %vm2077_vm12 = vcmp.gt.f32.partialorder %v2065_v46, 0.0  ;;  %v2089_v56 = vmul.f32 0.2, %v2065_v46 }
 0xb27   :  { %v1970_v57 = vpop.permute.xlu0 %1969  ;;  %v1974_v44 = vpop.permute.xlu1 %1973  ;;  %v2134_v58 = vsel %vm1154_vm10, %v9172_v38, -inf  ;;  %v2137_v60 = vsel %vm1154_vm10, %v9175_v25, -inf }
 0xb28   :  { %v2066_v42 = vadd.f32 %v2048_v28, %v1970_v57  ;;  %v2067_v62 = vadd.f32 %v2048_v28, %v1974_v44  ;;  %2135 = vmax.xlane.f32.xlu0 %v2134_v58  ;;  %2138 = vmax.xlane.f32.xlu1 %v2137_v60  ;;  %v2106_v50 = vsel %vm2082_vm11, %v2070_v30, %v2094_v33 }
 0xb29   :  { %v9183_v63 = vadd.f32 %v2106_v50, %v8909_v13  ;;  %v2101_v31 = vsel %vm2077_vm12, %v2065_v46, %v2089_v56 }
 0xb2a   :  { %vm2078_vm13 = vcmp.gt.f32.partialorder %v2066_v42, 0.0  ;;  %v2090_v0 = vmul.f32 0.2, %v2066_v42  ;;  %vm2079_vm14 = vcmp.gt.f32.partialorder %v2067_v62, 0.0  ;;  %v2091_v43 = vmul.f32 0.2, %v2067_v62 }
 0xb2b   :  { %v1996_v1 = vpop.permute.xlu0 %1995  ;;  %v2000_v2 = vpop.permute.xlu1 %1999  ;;  %v2140_v7 = vsel %vm1154_vm10, %v9183_v63, -inf  ;;  %v9188_v49 = vadd.f32 %v2101_v31, %v8904_v4 }
 0xb2c   :  { %v2071_v34 = vadd.f32 %v2056_v18, %v1996_v1  ;;  %v2072_v23 = vadd.f32 %v2056_v18, %v2000_v2  ;;  %2141 = vmax.xlane.f32.xlu0 %v2140_v7  ;;  %v2102_v8 = vsel %vm2078_vm13, %v2066_v42, %v2090_v0  ;;  %v2103_v9 = vsel %vm2079_vm14, %v2067_v62, %v2091_v43 }
 0xb2d   :  { %v9192_v36 = vadd.f32 %v2102_v8, %v8917_v17  ;;  %v2125_v19 = vsel %vm1154_vm10, %v9188_v49, -inf  ;;  %v9199_v35 = vadd.f32 %v2103_v9, %v8909_v13 }
 0xb2e   :  { %vm2083_vm15 = vcmp.gt.f32.partialorder %v2071_v34, 0.0  ;;  %v2095_v61 = vmul.f32 0.2, %v2071_v34  ;;  %vm2084_vm2 = vcmp.gt.f32.partialorder %v2072_v23, 0.0  ;;  %v2096_v51 = vmul.f32 0.2, %v2072_v23 }
 0xb2f   :  { %v2011_v14 = vpop.permute.xlu1 %2010  ;;  %v2128_v15 = vsel %vm1154_vm10, %v9192_v36, -inf  ;;  %v2131_v29 = vsel %vm1154_vm10, %v9199_v35, -inf  ;;  %v2004_v57 = vpop.permute.xlu0 %2003 }
 0xb30   :  { %v2074_v10 = vadd.f32 %v2060_v32, %v2011_v14  ;;  %2129 = vmax.xlane.f32.xlu1 %v2128_v15  ;;  %2126 = vmax.xlane.f32.xlu0 %v2125_v19  ;;  %v2107_v20 = vsel %vm2083_vm15, %v2071_v34, %v2095_v61  ;;  %v2108_v21 = vsel %vm2084_vm2, %v2072_v23, %v2096_v51 }
 0xb31   :  { %v9202_v6 = vadd.f32 %v2107_v20, %v8904_v4  ;;  %v9209_v12 = vadd.f32 %v2108_v21, %v8917_v17 }
 0xb32   :  { %vm2086_vm3 = vcmp.gt.f32.partialorder %v2074_v10, 0.0  ;;  %v2098_v22 = vmul.f32 0.2, %v2074_v10 }
 0xb33   :  { %v2019_v27 = vpop.permute.xlu1 %2018  ;;  %v2143_v28 = vsel %vm1154_vm10, %v9202_v6, -inf  ;;  %v2146_v46 = vsel %vm1154_vm10, %v9209_v12, -inf  ;;  %v2015_v44 = vpop.permute.xlu0 %2014 }
 0xb34   :  { %v2076_v37 = vadd.f32 %v2060_v32, %v2019_v27  ;;  %2144 = vmax.xlane.f32.xlu1 %v2143_v28  ;;  %2132 = vmax.xlane.f32.xlu0 %v2131_v29  ;;  %v2110_v39 = vsel %vm2086_vm3, %v2074_v10, %v2098_v22  ;;  %v2075_v60 = vadd.f32 %v2060_v32, %v2015_v44 }
 0xb35   :  { %v9214_v48 = vadd.f32 %v2110_v39, %v8904_v4  ;;  %v2073_v4 = vadd.f32 %v2056_v18, %v2004_v57 }
 0xb36   :  { %vm2088_vm4 = vcmp.gt.f32.partialorder %v2076_v37, 0.0  ;;  %v2100_v30 = vmul.f32 0.2, %v2076_v37  ;;  %v2099_v42 = vmul.f32 0.2, %v2075_v60  ;;  %vm2087_vm6 = vcmp.gt.f32.partialorder %v2075_v60, 0.0 }
 0xb37   :  { %v2152_v53 = vsel %vm1154_vm10, %v9214_v48, -inf  ;;  %v2097_v58 = vmul.f32 0.2, %v2073_v4  ;;  %vm2085_vm5 = vcmp.gt.f32.partialorder %v2073_v4, 0.0 }
 0xb38   :  { %2147 = vmax.xlane.f32.xlu0 %v2146_v46  ;;  %v2112_v52 = vsel %vm2088_vm4, %v2076_v37, %v2100_v30  ;;  %v2111_v16 = vsel %vm2087_vm6, %v2075_v60, %v2099_v42 }
 0xb39   :  { %v9219_v33 = vadd.f32 %v2112_v52, %v8909_v13  ;;  %v2109_v62 = vsel %vm2085_vm5, %v2073_v4, %v2097_v58  ;;  %v9233_v0 = vadd.f32 %v2111_v16, %v8917_v17 }
 0xb3a   :  { %v9228_v50 = vadd.f32 %v2109_v62, %v8909_v13 }
 0xb3b   :  { %v2158_v56 = vsel %vm1154_vm10, %v9219_v33, -inf  ;;  %v2155_v18 = vsel %vm1154_vm10, %v9233_v0, -inf }
 0xb3c   :  { %2153 = vmax.xlane.f32.xlu0 %v2152_v53  ;;  %v2149_v31 = vsel %vm1154_vm10, %v9228_v50, -inf }
 0xb40   :  { %2159 = vmax.xlane.f32.xlu0 %v2158_v56 }
 0xb45   :  { %8392 = vrot.lane.b32.xlu1 %v9140_v3, %s8577_s30 }
 0xb56   :  { %2264 = vrot.lane.b32.xlu0 %v9143_v5, %s8577_s30 }
 0xb69   :  { %2150 = vmax.xlane.f32.xlu1 %v2149_v31 }
 0xb6d   :  { %2156 = vmax.xlane.f32.xlu1 %v2155_v18 }
 0xb7e   :  { %8397 = vrot.lane.b32.xlu1 %v9140_v3, %s8578_s6 }
 0xbb5   :  { %v2136_v43 = vpop.xlane.xlu0 %2135  ;;  %v2139_v1 = vpop.xlane.xlu1 %2138 }
 0xbb6   :  { %v2164_v13 = vsub.f32 %v9172_v38, %v2136_v43  ;;  %v2165_v2 = vsub.f32 %v9175_v25, %v2139_v1 }
 0xbb8   :  { %v2179_v7 = vmul.f32 1.442695, %v2164_v13  ;;  %v2181_v34 = vmul.f32 1.442695, %v2165_v2 }
 0xbb9   :  { %v2142_v23 = vpop.xlane.xlu0 %2141 }
 0xbba   :  { %8460 = vpow2.f32 %v2179_v7  ;;  %v2166_v17 = vsub.f32 %v9183_v63, %v2142_v23 }
 0xbbb   :  { %8462 = vpow2.f32 %v2181_v34 }
 0xbbc   :  { %v2183_v8 = vmul.f32 1.442695, %v2166_v17 }
 0xbbd   :  { %v2127_v9 = vpop.xlane.xlu0 %2126  ;;  %v2130_v32 = vpop.xlane.xlu1 %2129 }
 0xbbe   :  { %8464 = vpow2.f32 %v2183_v8  ;;  %v2161_v61 = vsub.f32 %v9188_v49, %v2127_v9  ;;  %v2162_v51 = vsub.f32 %v9192_v36, %v2130_v32 }
 0xbc0   :  { %v2173_v14 = vmul.f32 1.442695, %v2161_v61  ;;  %v2175_v15 = vmul.f32 1.442695, %v2162_v51 }
 0xbc1   :  { %v2133_v38 = vpop.xlane.xlu0 %2132  ;;  %v2145_v19 = vpop.xlane.xlu1 %2144 }
 0xbc2   :  { %8466 = vpow2.f32 %v2173_v14  ;;  %v2163_v25 = vsub.f32 %v9199_v35, %v2133_v38  ;;  %v2167_v10 = vsub.f32 %v9202_v6, %v2145_v19 }
 0xbc3   :  { %8468 = vpow2.f32 %v2175_v15 }
 0xbc4   :  { %v9246_v63 = vpop.eup %8460  ;;  %v2177_v20 = vmul.f32 1.442695, %v2163_v25  ;;  %v2185_v21 = vmul.f32 1.442695, %v2167_v10 }
 0xbc5   :  { %v9248_v22 = vpop.eup %8462  ;;  %v2148_v27 = vpop.xlane.xlu0 %2147  ;;  %v2206_v36 = vsel %vm1154_vm10, %v9246_v63, 0.0 }
 0xbc6   :  { %v8393_v49 = vpop.permute.xlu1 %8392  ;;  %8470 = vpow2.f32 %v2177_v20  ;;  %v2168_v28 = vsub.f32 %v9209_v12, %v2148_v27  ;;  %2207 = vadd.xlane.f32.xlu1 %v2206_v36  ;;  %v2209_v35 = vsel %vm1154_vm10, %v9248_v22, 0.0 }
 0xbc7   :  { %v8395_v29 = vunpack.i.h.bf16 %v8393_v49  ;;  %v8394_v37 = vunpack.i.l.bf16 %v8393_v49  ;;  %8472 = vpow2.f32 %v2185_v21  ;;  %2210 = vadd.xlane.f32.xlu0 %v2209_v35 }
 0xbc8   :  { %v9255_v6 = vpop.eup %8464  ;;  %v2187_v39 = vmul.f32 1.442695, %v2168_v28 }
 0xbc9   :  { %v7478_v30 = vpack.c.bf16 %v8395_v29, %v8394_v37  ;;  %v2154_v46 = vpop.xlane.xlu0 %2153  ;;  %v2212_v52 = vsel %vm1154_vm10, %v9255_v6, 0.0 }
 0xbca   :  { %8474 = vpow2.f32 %v2187_v39  ;;  %v2170_v53 = vsub.f32 %v9214_v48, %v2154_v46  ;;  %2213 = vadd.xlane.f32.xlu1 %v2212_v52 }
 0xbcb   :  { %7479 = vmatpush3.bf16.msra.mxu1 %v7478_v30 }
 0xbcc   :  { %7094 = vmatprep.subr.mxu1 %v8573_v41  ;;  %v9261_v12 = vpop.eup %8466  ;;  %v2191_v56 = vmul.f32 1.442695, %v2170_v53 }
 0xbcd   :  { %v9263_v57 = vpop.eup %8468  ;;  %v2160_v4 = vpop.xlane.xlu0 %2159  ;;  %v2197_v44 = vsel %vm1154_vm10, %v9261_v12, 0.0 }
 0xbce   :  { %8476 = vpow2.f32 %v2191_v56  ;;  %2198 = vadd.xlane.f32.xlu0 %v2197_v44  ;;  %v2200_v58 = vsel %vm1154_vm10, %v9263_v57, 0.0  ;;  %v2172_v13 = vsub.f32 %v9219_v33, %v2160_v4 }
 0xbcf   :  { %2201 = vadd.xlane.f32.xlu1 %v2200_v58 }
 0xbd0   :  { %v9269_v48 = vpop.eup %8470  ;;  %v2195_v34 = vmul.f32 1.442695, %v2172_v13 }
 0xbd1   :  { %v2265_v60 = vpop.permute.xlu0 %2264  ;;  %v2203_v42 = vsel %vm1154_vm10, %v9269_v48, 0.0  ;;  %v9273_v62 = vpop.eup %8472 }
 0xbd2   :  { %2204 = vadd.xlane.f32.xlu0 %v2203_v42  ;;  %7095 = vmatpush3.msra.mxu1 %v2265_v60  ;;  %v2215_v18 = vsel %vm1154_vm10, %v9273_v62, 0.0 }
 0xbd3   :  { %7480 = vmatprep.subr.bf16.mxu1 %v8574_v11 }
 0xbd4   :  { %v9276_v16 = vpop.eup %8474 }
 0xbd5   :  { %v2218_v31 = vsel %vm1154_vm10, %v9276_v16, 0.0 }
 0xbd6   :  { %2219 = vadd.xlane.f32.xlu1 %v2218_v31  ;;  %2216 = vadd.xlane.f32.xlu0 %v2215_v18 }
 0xbd8   :  { %v9282_v43 = vpop.eup %8476 }
 0xbd9   :  { %v2224_v1 = vsel %vm1154_vm10, %v9282_v43, 0.0 }
 0xbda   :  { %2225 = vadd.xlane.f32.xlu1 %v2224_v1 }
 0xbf6   :  { %v2151_v2 = vpop.xlane.xlu1 %2150 }
 0xbf7   :  { %v2169_v7 = vsub.f32 %v9228_v50, %v2151_v2 }
 0xbf9   :  { %v2189_v23 = vmul.f32 1.442695, %v2169_v7 }
 0xbfa   :  { %v2157_v17 = vpop.xlane.xlu1 %2156 }
 0xbfb   :  { %8478 = vpow2.f32 %v2189_v23  ;;  %v2171_v8 = vsub.f32 %v9233_v0, %v2157_v17 }
 0xbfc   :  { %8480 = vpow2.f32 %v2195_v34 }
 0xbfd   :  { %v2193_v9 = vmul.f32 1.442695, %v2171_v8  ;;  %v2698_v8 = vld [vmem:[%s11994_s2 + $0x1e8] sm:$0xff] }
 0xbfe   :  { %v8398_v0 = vpop.permute.xlu1 %8397 }
 0xbff   :  { %8482 = vpow2.f32 %v2193_v9  ;;  %v8400_v28 = vunpack.i.h.bf16 %v8398_v0  ;;  %v8399_v29 = vunpack.i.l.bf16 %v8398_v0  ;;  %v2701_v0 = vld [vmem:[%s11994_s2 + $0x200] sm:$0xff] }
 0xc01   :  { %v7484_v35 = vpack.c.bf16 %v8400_v28, %v8399_v29 }
 0xc05   :  { %v9289_v32 = vpop.eup %8478 }
 0xc06   :  { %v2221_v61 = vsel %vm1154_vm10, %v9289_v32, 0.0  ;;  %v9293_v51 = vpop.eup %8480 }
 0xc07   :  { %2222 = vadd.xlane.f32.xlu0 %v2221_v61  ;;  %v2230_v50 = vsel %vm1154_vm10, %v9293_v51, 0.0  ;;  %v2697_v61 = vld [vmem:[%s11994_s2 + $0x1e0] sm:$0xff] }
 0xc09   :  { %v9295_v33 = vpop.eup %8482 }
 0xc0a   :  { %v2227_v14 = vsel %vm1154_vm10, %v9295_v33, 0.0 }
 0xc0b   :  { %2231 = vadd.xlane.f32.xlu0 %v2230_v50  ;;  %2228 = vadd.xlane.f32.xlu1 %v2227_v14  ;;  %v2706_v50 = vld [vmem:[%s11994_s2 + $0x228] sm:$0xff] }
 0xc1c   :  { %8402 = vrot.lane.b32.xlu1 %v9140_v3, %s8579_s7 }
 0xc20   :  { %2552 = vrot.lane.b32.xlu1 %v9143_v5, %s8579_s7 }
 0xc21   :  { %2451 = vrot.lane.b32.xlu0 %v9143_v5, %s8578_s6 }
 0xc53   :  { %v2208_v15 = vpop.xlane.xlu1 %2207 }
 0xc54   :  { %8484 = vrcp.f32 %v2208_v15  ;;  %v2211_v38 = vpop.xlane.xlu0 %2210  ;;  %v2705_v15 = vld [vmem:[%s11994_s2 + $0x220] sm:$0xff] }
 0xc55   :  { %8486 = vrcp.f32 %v2211_v38  ;;  %v7495_v38 = vpack.c.bf16 %v2705_v15, %v2701_v0 }
 0xc57   :  { %v2214_v19 = vpop.xlane.xlu1 %2213 }
 0xc58   :  { %8488 = vrcp.f32 %v2214_v19  ;;  %v2696_v19 = vld [vmem:[%s11994_s2 + $0x1d8] sm:$0xff] }
 0xc5b   :  { %v2199_v25 = vpop.xlane.xlu0 %2198 }
 0xc5c   :  { %8490 = vrcp.f32 %v2199_v25  ;;  %v2202_v21 = vpop.xlane.xlu1 %2201  ;;  %v2700_v25 = vld [vmem:[%s11994_s2 + $0x1f8] sm:$0xff] }
 0xc5d   :  { %8492 = vrcp.f32 %v2202_v21 }
 0xc5e   :  { %v8485_v10 = vpop.eup %8484 }
 0xc5f   :  { %v2248_v20 = vmul.f32 %v8485_v10, %v9246_v63  ;;  %v8487_v3 = vpop.eup %8486  ;;  %v2205_v27 = vpop.xlane.xlu0 %2204  ;;  %v7497_v10 = vpack.c.bf16 %v2700_v25, %v2696_v19 }
 0xc60   :  { %v2249_v49 = vmul.f32 %v8487_v3, %v9248_v22  ;;  %8494 = vrcp.f32 %v2205_v27  ;;  %v1730_v27 = vld [vmem:[%s11994_s2 + $0x1a0] ss:$0 sm:$0xff] }
 0xc61   :  { %7097 = vmatmul.mubr.msk.f32.vlgmr.msra.gmra.mrb[24].mxu1 %vm1154_vm10, %v2248_v20 }
 0xc62   :  { %7482 = vmatpush3.bf16.msra.mxu1 %v9138_v26  ;;  %7099 = vmatprep.mubr.msk.f32.mxu1 %vm8575_vm7, %v8573_v41  ;;  %v8489_v36 = vpop.eup %8488 }
 0xc63   :  { %7109 = vmatprep.subr.mxu1 %v8573_v41  ;;  %v2250_v63 = vmul.f32 %v8489_v36, %v9255_v6  ;;  %v2217_v30 = vpop.xlane.xlu0 %2216  ;;  %v2220_v46 = vpop.xlane.xlu1 %2219 }
 0xc64   :  { %8496 = vrcp.f32 %v2217_v30 }
 0xc65   :  { %7100 = vmatmul.mubr.msk.f32.gmra.mrb[26].mxu1 %vm1154_vm10, %v2249_v49  ;;  %8498 = vrcp.f32 %v2220_v46 }
 0xc66   :  { %7110 = vmatpush3.msra.mxu1 %v9143_v5  ;;  %7102 = vmatprep.mubr.msk.f32.mxu1 %vm8575_vm7, %v8573_v41  ;;  %v8491_v26 = vpop.eup %8490 }
 0xc67   :  { %7483 = vmatprep.subr.bf16.mxu1 %v8574_v11  ;;  %v2245_v22 = vmul.f32 %v8491_v26, %v9261_v12  ;;  %v8493_v37 = vpop.eup %8492  ;;  %v2226_v52 = vpop.xlane.xlu1 %2225 }
 0xc68   :  { %v2246_v5 = vmul.f32 %v8493_v37, %v9263_v57 }
 0xc69   :  { %7103 = vmatmul.mubr.msk.f32.gmra.mrb[28].mxu1 %vm1154_vm10, %v2250_v63 }
 0xc6a   :  { %7111 = vmatprep.mubr.msk.f32.mxu1 %vm8575_vm7, %v8573_v41  ;;  %v8495_v6 = vpop.eup %8494 }
 0xc6b   :  { %v2247_v39 = vmul.f32 %v8495_v6, %v9269_v48 }
 0xc6d   :  { %7112 = vmatmul.mubr.msk.f32.vlgmr.msra.gmra.mrb[24].mxu1 %vm1154_vm10, %v2245_v22 }
 0xc6e   :  { %7485 = vmatpush3.bf16.msra.mxu1 %v7484_v35  ;;  %7114 = vmatprep.mubr.msk.f32.mxu1 %vm8575_vm7, %v8573_v41  ;;  %v8497_v57 = vpop.eup %8496 }
 0xc6f   :  { %7124 = vmatprep.subr.mxu1 %v8573_v41  ;;  %v2251_v4 = vmul.f32 %v8497_v57, %v9273_v62  ;;  %v8499_v48 = vpop.eup %8498 }
 0xc70   :  { %v2252_v18 = vmul.f32 %v8499_v48, %v9276_v16 }
 0xc71   :  { %7115 = vmatmul.mubr.msk.f32.gmra.mrb[26].mxu1 %vm1154_vm10, %v2246_v5 }
 0xc72   :  { %7117 = vmatprep.mubr.msk.f32.mxu1 %vm8575_vm7, %v8573_v41 }
 0xc75   :  { %7118 = vmatmul.mubr.msk.f32.gmra.mrb[28].mxu1 %vm1154_vm10, %v2247_v39 }
 0xc76   :  { %7126 = vmatprep.mubr.msk.f32.mxu1 %vm8575_vm7, %v8573_v41 }
 0xc94   :  { %v2223_v53 = vpop.xlane.xlu0 %2222 }
 0xc95   :  { %8500 = vrcp.f32 %v2223_v53 }
 0xc96   :  { %8502 = vrcp.f32 %v2226_v52 }
 0xc98   :  { %v2232_v12 = vpop.xlane.xlu0 %2231  ;;  %v2229_v56 = vpop.xlane.xlu1 %2228 }
 0xc99   :  { %8504 = vrcp.f32 %v2229_v56 }
 0xc9a   :  { %8506 = vrcp.f32 %v2232_v12 }
 0xc9c   :  { %v2452_v44 = vpop.permute.xlu0 %2451  ;;  %v8403_v58 = vpop.permute.xlu1 %8402 }
 0xc9d   :  { %v8405_v60 = vunpack.i.h.bf16 %v8403_v58  ;;  %v8404_v42 = vunpack.i.l.bf16 %v8403_v58  ;;  %7125 = vmatpush3.msra.mxu1 %v2452_v44 }
 0xc9e   :  { %7127 = vmatmul.mubr.msk.f32.vlgmr.msra.gmra.mrb[24].mxu1 %vm1154_vm10, %v2251_v4  ;;  %7486 = vmatprep.subr.bf16.mxu1 %v8574_v11 }
 0xc9f   :  { %v7487_v31 = vpack.c.bf16 %v8405_v60, %v8404_v42  ;;  %7129 = vmatprep.mubr.msk.f32.mxu1 %vm8575_vm7, %v8573_v41  ;;  %v8501_v1 = vpop.eup %8500 }
 0xca0   :  { %v2553_v62 = vpop.permute.xlu1 %2552  ;;  %v2253_v13 = vmul.f32 %v8501_v1, %v9289_v32  ;;  %v8503_v2 = vpop.eup %8502  ;;  %v2693_v32 = vld [vmem:[%s11994_s2 + $0x1c0] sm:$0xff] }
 0xca1   :  { %7488 = vmatpush3.bf16.msra.mxu1 %v7487_v31  ;;  %v2254_v16 = vmul.f32 %v8503_v2, %v9282_v43  ;;  %v2694_v43 = vld [vmem:[%s11994_s2 + $0x1c8] sm:$0xff] }
 0xca2   :  { %7130 = vmatmul.mubr.msk.f32.gmra.mrb[26].mxu1 %vm1154_vm10, %v2252_v18  ;;  %7139 = vmatprep.subr.mxu1 %v8573_v41  ;;  %v7489_v9 = vpack.c.bf16 %v2698_v8, %v2694_v43 }
 0xca3   :  { %7132 = vmatprep.mubr.msk.f32.mxu1 %vm8575_vm7, %v8573_v41  ;;  %v8505_v7 = vpop.eup %8504 }
 0xca4   :  { %v2255_v34 = vmul.f32 %v8505_v7, %v9295_v33  ;;  %v8507_v23 = vpop.eup %8506  ;;  %7490 = vmatprep.subr.bf16.mxu0 %v7489_v9  ;;  %v2702_v33 = vld [vmem:[%s11994_s2 + $0x208] sm:$0xff] }
 0xca5   :  { %7140 = vmatpush3.msra.mxu1 %v2553_v62  ;;  %v2256_v17 = vmul.f32 %v8507_v23, %v9293_v51  ;;  %v7491_v51 = vpack.c.bf16 %v2697_v61, %v2693_v32  ;;  %v7493_v14 = vpack.c.bf16 %v2706_v50, %v2702_v33  ;;  %v2695_v61 = vld [vmem:[%s11994_s2 + $0x1d0] sm:$0xff]  ;;  %v2704_v50 = vld [vmem:[%s11994_s2 + $0x218] sm:$0xff] }
 0xca6   :  { %7133 = vmatmul.mubr.msk.f32.gmra.mrb[28].mxu1 %vm1154_vm10, %v2253_v13 }
 0xca7   :  { %7141 = vmatprep.mubr.msk.f32.mxu1 %vm8575_vm7, %v8573_v41  ;;  %7492 = vmatpush1.bf16.msra.mxu0 %v7491_v51  ;;  %v2699_v51 = vld [vmem:[%s11994_s2 + $0x1f0] sm:$0xff] }
 0xca8   :  { %7494 = vmatprep.subr.bf16.mxu0 %v7493_v14  ;;  %v2708_v14 = vld [vmem:[%s11994_s2 + $0x238] sm:$0xff]  ;;  %v7499_v19 = vpack.c.bf16 %v2699_v51, %v2695_v61 }
 0xcaa   :  { %7142 = vmatmul.mubr.msk.f32.vlgmr.msra.gmra.mrb[24].mxu1 %vm1154_vm10, %v2254_v16 }
 0xcab   :  { %7144 = vmatprep.mubr.msk.f32.mxu1 %vm8575_vm7, %v8573_v41  ;;  %7496 = vmatpush1.bf16.msra.mxu0 %v7495_v38 }
 0xcac   :  { %7498 = vmatprep.subr.bf16.mxu0 %v7497_v10  ;;  %v7501_v10 = vpack.c.bf16 %v2708_v14, %v2704_v50 }
 0xcae   :  { %7145 = vmatmul.mubr.msk.f32.gmra.mrb[26].mxu1 %vm1154_vm10, %v2255_v34 }
 0xcaf   :  { %7147 = vmatprep.mubr.msk.f32.mxu1 %vm8575_vm7, %v8573_v41 }
 0xcb2   :  { %7148 = vmatmul.mubr.msk.f32.gmra.mrb[28].mxu1 %vm1154_vm10, %v2256_v17 }
 0xd7d   :  { %v2632_v20 = vpop.f32.mrb[24].mxu1 }
 0xd7e   :  { %v2649_v21 = vmul.f32 0.25, %v2632_v20  ;;  %v7143_v3 = vpop.f32.mrb[25].mxu1  ;;  %v2703_v20 = vld [vmem:[%s11994_s2 + $0x210] sm:$0xff] }
 0xd80   :  { %v2652_v36 = vadd.f32 %v2649_v21, %v1730_v27  ;;  %v2707_v21 = vld [vmem:[%s11994_s2 + $0x230] sm:$0xff] }
 0xd81   :  { %v2637_v49 = vpop.f32.mrb[26].mxu1  ;;  %v7503_v3 = vpack.c.bf16 %v2707_v21, %v2703_v20  ;;  %v9504_v21 = vld [vmem:[%s11993_s0 + $0x68] sm:$0xff] }
 0xd82   :  { %v2650_v63 = vmul.f32 0.25, %v2637_v49  ;;  %v7146_v26 = vpop.f32.mrb[27].mxu1  ;;  %v2655_v22 = vsel %vm196_vm1, %v2652_v36, 0.0 }
 0xd84   :  { %v2653_v28 = vadd.f32 %v2650_v63, %v1730_v27  ;;  %v2714_v63 = vld [vmem:[%s11994_s2 + $0x268] sm:$0xf] }
 0xd85   :  { %v2642_v29 = vpop.f32.mrb[28].mxu1  ;;  %3096 = vmatprep.mubr.f32.mxu1 %v2714_v63 }
 0xd86   :  { %v2656_v37 = vsel %vm196_vm1, %v2653_v28, 0.0  ;;  %v2651_v35 = vmul.f32 0.25, %v2642_v29  ;;  %v7149_v5 = vpop.f32.mrb[29].mxu1 }
 0xd87   :  { %v2657_v6 = vadd.f32 %v2656_v37, %v2655_v22 }
 0xd88   :  { %v2654_v39 = vadd.f32 %v2651_v35, %v1730_v27 }
 0xd8a   :  { %v2658_v30 = vsel %vm196_vm1, %v2654_v39, 0.0 }
 0xd8b   :  { %v2659_v46 = vadd.f32 %v2658_v30, %v2657_v6 }
 0xd8d   :  { %v2660_v52 = vrot.slane %v2659_v46, 4 }
 0xd8f   :  { %v2661_v53 = vadd.f32 %v2660_v52, %v2659_v46 }
 0xd91   :  { %v2662_v12 = vrot.slane %v2661_v53, 2 }
 0xd93   :  { %v2663_v56 = vadd.f32 %v2662_v12, %v2661_v53 }
 0xd95   :  { %v2664_v57 = vrot.slane %v2663_v56, 1 }
 0xd97   :  { %v2665_v4 = vadd.f32 %v2664_v57, %v2663_v56  ;;  %v2709_v56 = vld [vmem:[%s11994_s2 + $0x240] sm:$0xf] }
 0xd98   :  { %v2713_v57 = vld [vmem:[%s11994_s2 + $0x260] sm:$0xf] }
 0xd99   :  { %v2666_v44 = vmul.f32 0.041666668, %v2665_v4 }
 0xd9b   :  { %v2667_v58 = vsub.f32 %v2652_v36, %v2666_v44  ;;  %v2668_v48 = vsub.f32 %v2653_v28, %v2666_v44  ;;  %v2669_v60 = vsub.f32 %v2654_v39, %v2666_v44  ;;  %v2710_v36 = vld [vmem:[%s11994_s2 + $0x248] sm:$0xf] }
 0xd9d   :  { %v2670_v42 = vmul.f32 %v2667_v58, %v2667_v58  ;;  %v2671_v31 = vmul.f32 %v2668_v48, %v2668_v48  ;;  %v2672_v18 = vmul.f32 %v2669_v60, %v2669_v60 }
 0xd9f   :  { %v2673_v1 = vsel %vm196_vm1, %v2670_v42, 0.0  ;;  %v2674_v62 = vsel %vm196_vm1, %v2671_v31, 0.0  ;;  %v2676_v2 = vsel %vm196_vm1, %v2672_v18, 0.0  ;;  %v2711_v42 = vld [vmem:[%s11994_s2 + $0x250] sm:$0xf] }
 0xda0   :  { %v2675_v13 = vadd.f32 %v2674_v62, %v2673_v1 }
 0xda2   :  { %v2677_v16 = vadd.f32 %v2676_v2, %v2675_v13 }
 0xda4   :  { %v2678_v7 = vrot.slane %v2677_v16, 4 }
 0xda6   :  { %v2679_v34 = vadd.f32 %v2678_v7, %v2677_v16 }
 0xda8   :  { %v2680_v23 = vrot.slane %v2679_v34, 2 }
 0xdaa   :  { %v2681_v17 = vadd.f32 %v2680_v23, %v2679_v34 }
 0xdac   :  { %v2682_v43 = vrot.slane %v2681_v17, 1 }
 0xdae   :  { %v2683_v8 = vadd.f32 %v2682_v43, %v2681_v17 }
 0xdb0   :  { %v2684_v9 = vmul.f32 0.041666668, %v2683_v8 }
 0xdb2   :  { %v2685_v32 = vadd.f32 1e-05, %v2684_v9 }
 0xdb4   :  { %8508 = vrsqrt.f32 %v2685_v32 }
 0xdbe   :  { %v8509_v33 = vpop.eup %8508 }
 0xdbf   :  { %v2687_v0 = vmul.f32 %v8509_v33, %v2667_v58  ;;  %v2689_v15 = vmul.f32 %v8509_v33, %v2669_v60  ;;  %v2688_v38 = vmul.f32 %v8509_v33, %v2668_v48  ;;  %v2716_v58 = vld [vmem:[%s11994_s2 + $0x278] sm:$0xf]  ;;  %v2715_v60 = vld [vmem:[%s11994_s2 + $0x270] sm:$0xf] }
 0xdc0   :  { %v2712_v48 = vld [vmem:[%s11994_s2 + $0x258] sm:$0xf] }
 0xdc1   :  { %v2690_v25 = vmax.f32 %v2687_v0, 0.0  ;;  %v2691_v27 = vmax.f32 %v2688_v38, 0.0  ;;  %v2692_v49 = vmax.f32 %v2689_v15, 0.0 }
 0xdc3   :  { %6524 = vmatmul.mubr.msk.f32.vlgmr.msra.gmra.mrb[24].mxu0 %vm196_vm1, %v2690_v25 }
 0xdc4   :  { %2796 = vmatprep.mubr.f32.mxu0 %v8573_v41  ;;  %7500 = vmatpush1.bf16.msra.mxu0 %v7499_v19 }
 0xdc5   :  { %7502 = vmatprep.subr.bf16.mxu0 %v7501_v10 }
 0xdc7   :  { %6525 = vmatmul.mubr.msk.f32.gmra.mrb[26].mxu0 %vm196_vm1, %v2691_v27 }
 0xdc8   :  { %2802 = vmatprep.mubr.f32.mxu0 %v8573_v41  ;;  %7504 = vmatpush1.bf16.msra.mxu0 %v7503_v3 }
 0xdcb   :  { %6526 = vmatmul.mubr.msk.f32.gmra.mrb[28].mxu0 %vm196_vm1, %v2692_v49 }
 0xdcc   :  { %2873 = vmatprep.mubr.f32.mxu0 %v8573_v41 }
 0xdcf   :  { %6527 = vmatmul.mubr.msk.f32.vlgmr.msra.gmra.mrb[30].mxu0 %vm196_vm1, %v2690_v25 }
 0xdd0   :  { %2879 = vmatprep.mubr.f32.mxu0 %v8573_v41 }
 0xdd3   :  { %6528 = vmatmul.mubr.msk.f32.gmra.mrb[32].mxu0 %vm196_vm1, %v2691_v27 }
 0xdd4   :  { %2885 = vmatprep.mubr.f32.mxu0 %v8573_v41 }
 0xdd7   :  { %6529 = vmatmul.mubr.msk.f32.gmra.mrb[34].mxu0 %vm196_vm1, %v2692_v49 }
 0xdd8   :  { %2956 = vmatprep.mubr.f32.mxu0 %v2710_v36 }
 0xe96   :  { %v2792_v26 = vpop.f32.mrb[24].mxu0 }
 0xe97   :  { %v2794_v28 = vpop.f32.mrb[25].mxu0 }
 0xe9a   :  { %v2798_v29 = vpop.f32.mrb[26].mxu0 }
 0xe9b   :  { %v9434_v22 = vpack.c.bf16 %v2798_v29, %v2792_v26  ;;  %v2800_v37 = vpop.f32.mrb[27].mxu0 }
 0xe9c   :  { %v7505_v35 = vpack.c.bf16 %v2800_v37, %v2794_v28 }
 0xe9e   :  { %v9436_v5 = vpop.f32.mrb[28].mxu0  ;;  %7506 = vmatprep.subr.bf16.mxu0 %v7505_v35  ;;  %7514 = vmatprep.subr.bf16.mxu1 %v7505_v35 }
 0xe9f   :  { %v2806_v6 = vpop.f32.mrb[29].mxu0  ;;  %7508 = vmatpush1.bf16.xpose.msra.mxu0 %v9434_v22  ;;  %7516 = vmatpush1.bf16.xpose.msra.mxu1 %v9434_v22 }
 0xea0   :  { %2896 = vmatprep.subr.mxu0 %v2806_v6  ;;  %3036 = vmatprep.subr.mxu1 %v2806_v6 }
 0xea2   :  { %v2875_v39 = vpop.f32.mrb[30].mxu0 }
 0xea3   :  { %v2877_v30 = vpop.f32.mrb[31].mxu0 }
 0xea6   :  { %v2881_v46 = vpop.f32.mrb[32].mxu0 }
 0xea7   :  { %v9440_v52 = vpack.c.bf16 %v2881_v46, %v2875_v39  ;;  %v2883_v53 = vpop.f32.mrb[33].mxu0  ;;  %2897 = vmatpush1.xpose.msra.mxu0 %v9436_v5  ;;  %3037 = vmatpush1.xpose.msra.mxu1 %v9436_v5 }
 0xea8   :  { %v9444_v12 = vpack.c.bf16 %v2883_v53, %v2877_v30  ;;  %v9517_v30 = vld [vmem:[%s11993_s0 + $0x78] sm:$0xff] }
 0xeaa   :  { %v9452_v4 = vpop.f32.mrb[34].mxu0  ;;  %7510 = vmatprep.subr.bf16.mxu0 %v9444_v12  ;;  %7518 = vmatprep.subr.bf16.mxu1 %v9444_v12 }
 0xeab   :  { %v9456_v44 = vpop.f32.mrb[35].mxu0  ;;  %2957 = vmatmul.mubr.f32.vlgmr.msra.gmra.mrb[36].mxu0 %v2709_v56  ;;  %3097 = vmatmul.mubr.f32.vlgmr.msra.gmra.mrb[30].mxu1 %v2713_v57 }
 0xeac   :  { %7512 = vmatpush1.bf16.xpose.msra.mxu0 %v9440_v52  ;;  %7520 = vmatpush1.bf16.xpose.msra.mxu1 %v9440_v52 }
 0xead   :  { %2966 = vmatprep.subr.mxu0 %v9456_v44  ;;  %3106 = vmatprep.subr.mxu1 %v9456_v44 }
 0xeae   :  { %3166 = vmatprep.mubr.f32.mxu1 %v2716_v58  ;;  %3026 = vmatprep.mubr.f32.mxu0 %v2712_v48 }
 0xeb4   :  { %2967 = vmatpush1.xpose.msra.mxu0 %v9452_v4  ;;  %3107 = vmatpush1.xpose.msra.mxu1 %v9452_v4 }
 0xeb5   :  { %7527 = vmatprep.subr.bf16.mxu1 %v8574_v11  ;;  %7521 = vmatprep.subr.bf16.mxu0 %v8574_v11 }
 0xeb7   :  { %3167 = vmatmul.mubr.f32.vlgmr.msra.gmra.mrb[30].mxu1 %v2715_v60  ;;  %3027 = vmatmul.mubr.f32.vlgmr.msra.gmra.mrb[36].mxu0 %v2711_v42 }
 0xeb8   :  { %7529 = vmatpush3.bf16.msra.mxu1 %v7505_v35  ;;  %7156 = vmatprep.mubr.msk.f32.mxu0 %vm8575_vm7, %v8573_v41 }
 0xeb9   :  { %7172 = vmatprep.subr.mxu1 %v8573_v41  ;;  %7174 = vmatprep.mubr.msk.f32.mxu1 %vm8575_vm7, %v8573_v41 }
 0xebc   :  { %7173 = vmatpush3.msra.mxu1 %v2806_v6 }
 0xebd   :  { %7530 = vmatprep.subr.bf16.mxu1 %v8574_v11 }
 0xf8a   :  { %v3168_v31 = vpop.f32.mrb[30].mxu1  ;;  %v3028_v18 = vpop.f32.mrb[36].mxu0 }
 0xf8b   :  { %v3170_v1 = vpop.f32.mrb[31].mxu1  ;;  %v3175_v62 = vrot.slane %v3168_v31, %v8885_v54  ;;  %v3030_v13 = vpop.f32.mrb[37].mxu0  ;;  %v3190_v2 = vrot.slane %v3168_v31, %v8882_v47  ;;  %v3205_v16 = vrot.slane %v3168_v31, %v8888_v24  ;;  %v3220_v7 = vrot.slane %v3168_v31, %v8891_v55 }
 0xf8c   :  { %v3239_v34 = vrot.slane %v3028_v18, %v8894_v59 }
 0xf8d   :  { %3181 = vbcast.lane.b32.xlu1 %v3175_v62, 264  ;;  %3177 = vbcast.lane.b32.xlu0 %v3175_v62, 256 }
 0xf8e   :  { %v3240_v23 = vcombine.high %v3239_v34, %v3239_v34  ;;  %v3247_v17 = vrot.slane %v3239_v34, %v8894_v59 }
 0xf90   :  { %v3254_v43 = vrot.slane %v3240_v23, %v8894_v59  ;;  %v3260_v8 = vrot.slane %v3247_v17, %v8885_v54  ;;  %v3255_v10 = vcombine.high %v3247_v17, %v3247_v17  ;;  %v9496_v59 = vld [vmem:[%s11993_s0 + $0x70] sm:$0xff] }
 0xf91   :  { %3192 = vbcast.lane.b32.xlu1 %v3190_v2, 256  ;;  %3185 = vbcast.lane.b32.xlu0 %v3175_v62, 272 }
 0xf92   :  { %v3264_v33 = vrot.slane %v3254_v43, %v8885_v54  ;;  %v3256_v6 = vcombine.high %v3254_v43, %v3254_v43  ;;  %v3268_v39 = vrot.slane %v3255_v10, %v8885_v54 }
 0xf94   :  { %v3272_v13 = vrot.slane %v3256_v6, %v8885_v54 }
 0xf95   :  { %3200 = vbcast.lane.b32.xlu1 %v3190_v2, 272  ;;  %3196 = vbcast.lane.b32.xlu0 %v3190_v2, 264 }
 0xf99   :  { %3211 = vbcast.lane.b32.xlu1 %v3205_v16, 264  ;;  %3207 = vbcast.lane.b32.xlu0 %v3205_v16, 256 }
 0xf9d   :  { %3222 = vbcast.lane.b32.xlu1 %v3220_v7, 256  ;;  %3215 = vbcast.lane.b32.xlu0 %v3205_v16, 272 }
 0xfa1   :  { %3230 = vbcast.lane.b32.xlu1 %v3220_v7, 272  ;;  %3226 = vbcast.lane.b32.xlu0 %v3220_v7, 264 }
 0xfff   :  { %v3182_v9 = vpop.permute.xlu1 %3181  ;;  %v3178_v32 = vpop.permute.xlu0 %3177 }
0x1000   :  { %v3278_v61 = vadd.f32 %v3260_v8, %v3182_v9  ;;  %v3277_v51 = vadd.f32 %v3260_v8, %v3178_v32 }
0x1002   :  { %vm3290_vm1 = vcmp.gt.f32.partialorder %v3278_v61, 0.0  ;;  %v3302_v55 = vmul.f32 0.2, %v3278_v61  ;;  %vm3289_vm8 = vcmp.gt.f32.partialorder %v3277_v51, 0.0  ;;  %v3301_v50 = vmul.f32 0.2, %v3277_v51 }
0x1003   :  { %v3193_v14 = vpop.permute.xlu1 %3192  ;;  %v3186_v0 = vpop.permute.xlu0 %3185 }
0x1004   :  { %v3280_v15 = vadd.f32 %v3264_v33, %v3193_v14  ;;  %v3279_v38 = vadd.f32 %v3260_v8, %v3186_v0  ;;  %v3314_v19 = vsel %vm3290_vm1, %v3278_v61, %v3302_v55  ;;  %v3313_v25 = vsel %vm3289_vm8, %v3277_v51, %v3301_v50 }
0x1005   :  { %v9499_v20 = vadd.f32 %v9496_v59, %v3314_v19  ;;  %v9507_v3 = vadd.f32 %v9504_v21, %v3313_v25 }
0x1006   :  { %vm3292_vm9 = vcmp.gt.f32.partialorder %v3280_v15, 0.0  ;;  %v3304_v27 = vmul.f32 0.2, %v3280_v15  ;;  %vm3291_vm11 = vcmp.gt.f32.partialorder %v3279_v38, 0.0  ;;  %v3303_v49 = vmul.f32 0.2, %v3279_v38 }
0x1007   :  { %v3201_v36 = vpop.permute.xlu1 %3200  ;;  %v3197_v63 = vpop.permute.xlu0 %3196  ;;  %v3340_v26 = vsel %vm1154_vm10, %v9499_v20, -inf  ;;  %v3337_v28 = vsel %vm1154_vm10, %v9507_v3, -inf }
0x1008   :  { %v3282_v29 = vadd.f32 %v3264_v33, %v3201_v36  ;;  %v3281_v37 = vadd.f32 %v3264_v33, %v3197_v63  ;;  %3341 = vmax.xlane.f32.xlu1 %v3340_v26  ;;  %3338 = vmax.xlane.f32.xlu0 %v3337_v28  ;;  %v3315_v35 = vsel %vm3291_vm11, %v3279_v38, %v3303_v49 }
0x1009   :  { %v9520_v46 = vadd.f32 %v9517_v30, %v3315_v35  ;;  %v3316_v53 = vsel %vm3292_vm9, %v3280_v15, %v3304_v27 }
0x100a   :  { %vm3294_vm12 = vcmp.gt.f32.partialorder %v3282_v29, 0.0  ;;  %v3306_v56 = vmul.f32 0.2, %v3282_v29  ;;  %vm3293_vm13 = vcmp.gt.f32.partialorder %v3281_v37, 0.0  ;;  %v3305_v57 = vmul.f32 0.2, %v3281_v37 }
0x100b   :  { %v3212_v58 = vpop.permute.xlu1 %3211  ;;  %v3208_v48 = vpop.permute.xlu0 %3207  ;;  %v3343_v60 = vsel %vm1154_vm10, %v9520_v46, -inf  ;;  %v9526_v42 = vadd.f32 %v9504_v21, %v3316_v53 }
0x100c   :  { %v3284_v31 = vadd.f32 %v3268_v39, %v3212_v58  ;;  %v3283_v18 = vadd.f32 %v3268_v39, %v3208_v48  ;;  %3344 = vmax.xlane.f32.xlu0 %v3343_v60  ;;  %v3317_v1 = vsel %vm3293_vm13, %v3281_v37, %v3305_v57  ;;  %v3318_v62 = vsel %vm3294_vm12, %v3282_v29, %v3306_v56 }
0x100d   :  { %v9530_v2 = vadd.f32 %v9496_v59, %v3317_v1  ;;  %v3346_v17 = vsel %vm1154_vm10, %v9526_v42, -inf  ;;  %v9537_v8 = vadd.f32 %v9517_v30, %v3318_v62 }
0x100e   :  { %vm3296_vm14 = vcmp.gt.f32.partialorder %v3284_v31, 0.0  ;;  %v3308_v16 = vmul.f32 0.2, %v3284_v31  ;;  %vm3295_vm15 = vcmp.gt.f32.partialorder %v3283_v18, 0.0  ;;  %v3307_v7 = vmul.f32 0.2, %v3283_v18 }
0x100f   :  { %v3223_v34 = vpop.permute.xlu1 %3222  ;;  %v3216_v23 = vpop.permute.xlu0 %3215  ;;  %v3349_v43 = vsel %vm1154_vm10, %v9530_v2, -inf  ;;  %v3352_v15 = vsel %vm1154_vm10, %v9537_v8, -inf }
0x1010   :  { %v3286_v9 = vadd.f32 %v3272_v13, %v3223_v34  ;;  %v3285_v32 = vadd.f32 %v3268_v39, %v3216_v23  ;;  %3347 = vmax.xlane.f32.xlu0 %v3346_v17  ;;  %3350 = vmax.xlane.f32.xlu1 %v3349_v43  ;;  %v3319_v61 = vsel %vm3295_vm15, %v3283_v18, %v3307_v7 }
0x1011   :  { %v3331_v51 = vadd.f32 %v9504_v21, %v3319_v61  ;;  %v3320_v33 = vsel %vm3296_vm14, %v3284_v31, %v3308_v16 }
0x1012   :  { %vm3298_vm2 = vcmp.gt.f32.partialorder %v3286_v9, 0.0  ;;  %v3310_v55 = vmul.f32 0.2, %v3286_v9  ;;  %vm3297_vm3 = vcmp.gt.f32.partialorder %v3285_v32, 0.0  ;;  %v3309_v50 = vmul.f32 0.2, %v3285_v32 }
0x1013   :  { %v3231_v14 = vpop.permute.xlu1 %3230  ;;  %v3227_v0 = vpop.permute.xlu0 %3226  ;;  %v3355_v38 = vsel %vm1154_vm10, %v3331_v51, -inf  ;;  %v9544_v19 = vadd.f32 %v9496_v59, %v3320_v33 }
0x1014   :  { %v3288_v25 = vadd.f32 %v3272_v13, %v3231_v14  ;;  %v3287_v10 = vadd.f32 %v3272_v13, %v3227_v0  ;;  %3353 = vmax.xlane.f32.xlu0 %v3352_v15  ;;  %3356 = vmax.xlane.f32.xlu1 %v3355_v38  ;;  %v3321_v27 = vsel %vm3297_vm3, %v3285_v32, %v3309_v50 }
0x1015   :  { %v3333_v49 = vadd.f32 %v9517_v30, %v3321_v27  ;;  %v3322_v36 = vsel %vm3298_vm2, %v3286_v9, %v3310_v55  ;;  %v3358_v28 = vsel %vm1154_vm10, %v9544_v19, -inf }
0x1016   :  { %vm3300_vm4 = vcmp.gt.f32.partialorder %v3288_v25, 0.0  ;;  %v3312_v63 = vmul.f32 0.2, %v3288_v25  ;;  %vm3299_vm5 = vcmp.gt.f32.partialorder %v3287_v10, 0.0  ;;  %v3311_v26 = vmul.f32 0.2, %v3287_v10 }
0x1017   :  { %v3361_v29 = vsel %vm1154_vm10, %v3333_v49, -inf  ;;  %v9551_v37 = vadd.f32 %v9504_v21, %v3322_v36 }
0x1018   :  { %3359 = vmax.xlane.f32.xlu0 %v3358_v28  ;;  %3362 = vmax.xlane.f32.xlu1 %v3361_v29  ;;  %v3323_v35 = vsel %vm3299_vm5, %v3287_v10, %v3311_v26  ;;  %v3324_v6 = vsel %vm3300_vm4, %v3288_v25, %v3312_v63 }
0x1019   :  { %v3335_v39 = vadd.f32 %v9496_v59, %v3323_v35  ;;  %v3364_v53 = vsel %vm1154_vm10, %v9551_v37, -inf  ;;  %v9558_v57 = vadd.f32 %v9517_v30, %v3324_v6 }
0x101b   :  { %v3367_v56 = vsel %vm1154_vm10, %v3335_v39, -inf  ;;  %v3370_v21 = vsel %vm1154_vm10, %v9558_v57, -inf }
0x101c   :  { %3365 = vmax.xlane.f32.xlu0 %v3364_v53  ;;  %3368 = vmax.xlane.f32.xlu1 %v3367_v56 }
0x1020   :  { %3371 = vmax.xlane.f32.xlu0 %v3370_v21 }
0x1095   :  { %v3342_v58 = vpop.xlane.xlu1 %3341  ;;  %v3339_v48 = vpop.xlane.xlu0 %3338 }
0x1096   :  { %v3374_v60 = vsub.f32 %v9499_v20, %v3342_v58  ;;  %v3373_v59 = vsub.f32 %v9507_v3, %v3339_v48 }
0x1098   :  { %v3387_v31 = vmul.f32 1.442695, %v3374_v60  ;;  %v3385_v18 = vmul.f32 1.442695, %v3373_v59 }
0x1099   :  { %v3345_v1 = vpop.xlane.xlu0 %3344 }
0x109a   :  { %8510 = vpow2.f32 %v3387_v31  ;;  %v3375_v62 = vsub.f32 %v9520_v46, %v3345_v1 }
0x109b   :  { %8512 = vpow2.f32 %v3385_v18 }
0x109c   :  { %v3389_v30 = vmul.f32 1.442695, %v3375_v62 }
0x109d   :  { %v3351_v13 = vpop.xlane.xlu1 %3350  ;;  %v3348_v16 = vpop.xlane.xlu0 %3347 }
0x109e   :  { %8514 = vpow2.f32 %v3389_v30  ;;  %v3377_v7 = vsub.f32 %v9530_v2, %v3351_v13  ;;  %v3376_v34 = vsub.f32 %v9526_v42, %v3348_v16 }
0x10a0   :  { %v3393_v23 = vmul.f32 1.442695, %v3377_v7  ;;  %v3391_v17 = vmul.f32 1.442695, %v3376_v34 }
0x10a1   :  { %v3357_v20 = vpop.xlane.xlu1 %3356  ;;  %v3354_v43 = vpop.xlane.xlu0 %3353 }
0x10a2   :  { %8516 = vpow2.f32 %v3393_v23  ;;  %v3379_v3 = vsub.f32 %v3331_v51, %v3357_v20  ;;  %v3378_v9 = vsub.f32 %v9537_v8, %v3354_v43 }
0x10a3   :  { %8518 = vpow2.f32 %v3391_v17 }
0x10a4   :  { %v9568_v32 = vpop.eup %8510  ;;  %v3397_v46 = vmul.f32 1.442695, %v3379_v3  ;;  %v3395_v61 = vmul.f32 1.442695, %v3378_v9 }
0x10a5   :  { %v9570_v33 = vpop.eup %8512  ;;  %v3363_v55 = vpop.xlane.xlu1 %3362  ;;  %v3412_v42 = vsel %vm1154_vm10, %v9568_v32, 0.0 }
0x10a6   :  { %v3360_v50 = vpop.xlane.xlu0 %3359  ;;  %8520 = vpow2.f32 %v3397_v46  ;;  %v3381_v2 = vsub.f32 %v3333_v49, %v3363_v55  ;;  %3413 = vadd.xlane.f32.xlu0 %v3412_v42  ;;  %v3409_v8 = vsel %vm1154_vm10, %v9570_v33, 0.0 }
0x10a7   :  { %v3380_v14 = vsub.f32 %v9544_v19, %v3360_v50  ;;  %8522 = vpow2.f32 %v3395_v61  ;;  %3410 = vadd.xlane.f32.xlu1 %v3409_v8 }
0x10a8   :  { %v9577_v51 = vpop.eup %8514  ;;  %v3401_v0 = vmul.f32 1.442695, %v3381_v2 }
0x10a9   :  { %v3399_v15 = vmul.f32 1.442695, %v3380_v14  ;;  %v3369_v38 = vpop.xlane.xlu1 %3368  ;;  %v3415_v10 = vsel %vm1154_vm10, %v9577_v51, 0.0 }
0x10aa   :  { %v3366_v25 = vpop.xlane.xlu0 %3365  ;;  %8524 = vpow2.f32 %v3401_v0  ;;  %v3383_v27 = vsub.f32 %v3335_v39, %v3369_v38 }
0x10ab   :  { %v3382_v49 = vsub.f32 %v9551_v37, %v3366_v25  ;;  %8526 = vpow2.f32 %v3399_v15  ;;  %3416 = vadd.xlane.f32.xlu1 %v3415_v10 }
0x10ac   :  { %v9582_v19 = vpop.eup %8516  ;;  %v3405_v36 = vmul.f32 1.442695, %v3383_v27 }
0x10ad   :  { %v3403_v63 = vmul.f32 1.442695, %v3382_v49  ;;  %v9584_v26 = vpop.eup %8518  ;;  %v3421_v29 = vsel %vm1154_vm10, %v9582_v19, 0.0 }
0x10ae   :  { %v3372_v28 = vpop.xlane.xlu0 %3371  ;;  %8528 = vpow2.f32 %v3405_v36  ;;  %v3418_v6 = vsel %vm1154_vm10, %v9584_v26, 0.0 }
0x10af   :  { %v3384_v35 = vsub.f32 %v9558_v57, %v3372_v28  ;;  %8530 = vpow2.f32 %v3403_v63  ;;  %3422 = vadd.xlane.f32.xlu1 %v3421_v29  ;;  %3419 = vadd.xlane.f32.xlu0 %v3418_v6 }
0x10b0   :  { %v9591_v37 = vpop.eup %8520 }
0x10b1   :  { %v3407_v39 = vmul.f32 1.442695, %v3384_v35  ;;  %v9593_v53 = vpop.eup %8522  ;;  %v3427_v56 = vsel %vm1154_vm10, %v9591_v37, 0.0 }
0x10b2   :  { %v3424_v21 = vsel %vm1154_vm10, %v9593_v53, 0.0 }
0x10b3   :  { %8532 = vpow2.f32 %v3407_v39  ;;  %3428 = vadd.xlane.f32.xlu1 %v3427_v56  ;;  %3425 = vadd.xlane.f32.xlu0 %v3424_v21 }
0x10b4   :  { %v9599_v57 = vpop.eup %8524 }
0x10b5   :  { %v9601_v58 = vpop.eup %8526  ;;  %v3433_v48 = vsel %vm1154_vm10, %v9599_v57, 0.0 }
0x10b6   :  { %v3430_v60 = vsel %vm1154_vm10, %v9601_v58, 0.0 }
0x10b7   :  { %3434 = vadd.xlane.f32.xlu1 %v3433_v48  ;;  %3431 = vadd.xlane.f32.xlu0 %v3430_v60  ;;  %v4049_v48 = vld [vmem:[%s11995_s3] sm:$0xff] }
0x10b8   :  { %v9607_v59 = vpop.eup %8528 }
0x10b9   :  { %v9609_v31 = vpop.eup %8530  ;;  %v3439_v18 = vsel %vm1154_vm10, %v9607_v59, 0.0 }
0x10ba   :  { %v3436_v1 = vsel %vm1154_vm10, %v9609_v31, 0.0 }
0x10bb   :  { %3440 = vadd.xlane.f32.xlu1 %v3439_v18  ;;  %3437 = vadd.xlane.f32.xlu0 %v3436_v1  ;;  %v4059_v18 = vld [vmem:[%s11995_s3 + $0x50] sm:$0xff] }
0x10bd   :  { %v9615_v62 = vpop.eup %8532 }
0x10be   :  { %v3442_v30 = vsel %vm1154_vm10, %v9615_v62, 0.0 }
0x10bf   :  { %3443 = vadd.xlane.f32.xlu0 %v3442_v30  ;;  %v4055_v30 = vld [vmem:[%s11995_s3 + $0x30] sm:$0xff] }
0x1133   :  { %v3414_v13 = vpop.xlane.xlu0 %3413 }
0x1134   :  { %v3411_v16 = vpop.xlane.xlu1 %3410  ;;  %8534 = vrcp.f32 %v3414_v13  ;;  %v4058_v13 = vld [vmem:[%s11995_s3 + $0x48] sm:$0xff] }
0x1135   :  { %8536 = vrcp.f32 %v3411_v16  ;;  %v4062_v16 = vld [vmem:[%s11995_s3 + $0x68] sm:$0xff] }
0x1138   :  { %v3417_v7 = vpop.xlane.xlu1 %3416 }
0x1139   :  { %8538 = vrcp.f32 %v3417_v7  ;;  %v4065_v7 = vld [vmem:[%s11995_s3 + $0x80] sm:$0xff] }
0x113c   :  { %v3423_v34 = vpop.xlane.xlu1 %3422  ;;  %v3420_v23 = vpop.xlane.xlu0 %3419 }
0x113d   :  { %8540 = vrcp.f32 %v3423_v34  ;;  %v7551_v34 = vpack.c.bf16 %v4058_v13, %v4055_v30  ;;  %v4113_v30 = vld [vmem:[%s11995_s3 + $0x200] sm:$0xff] }
0x113e   :  { %v8535_v17 = vpop.eup %8534  ;;  %8542 = vrcp.f32 %v3420_v23  ;;  %v7553_v23 = vpack.c.bf16 %v4065_v7, %v4062_v16  ;;  %v4109_v7 = vld [vmem:[%s11995_s3 + $0x1e0] sm:$0xff] }
0x113f   :  { %v8537_v20 = vpop.eup %8536  ;;  %v3458_v43 = vmul.f32 %v8535_v17, %v9568_v32  ;;  %v36_v32 = vld [vmem:[%s11993_s0 + $0x80] sm:$0xff] }
0x1140   :  { %v3429_v3 = vpop.xlane.xlu1 %3428  ;;  %v3426_v9 = vpop.xlane.xlu0 %3425  ;;  %v3457_v46 = vmul.f32 %v8537_v20, %v9570_v33  ;;  %v4061_v17 = vld [vmem:[%s11995_s3 + $0x60] sm:$0xff]  ;;  %v4064_v20 = vld [vmem:[%s11995_s3 + $0x78] sm:$0xff] }
0x1141   :  { %8544 = vrcp.f32 %v3426_v9  ;;  %v7555_v9 = vpack.c.bf16 %v4064_v20, %v4061_v17  ;;  %v4119_v17 = vld [vmem:[%s11995_s3 + $0x230] sm:$0xff] }
0x1142   :  { %v7522_v61 = vpack.c.bf16 %v3458_v43, %v3457_v46  ;;  %8546 = vrcp.f32 %v3429_v3  ;;  %v4068_v43 = vld [vmem:[%s11995_s3 + $0x98] sm:$0xff]  ;;  %v4071_v3 = vld [vmem:[%s11995_s3 + $0xb0] sm:$0xff] }
0x1143   :  { %v8539_v55 = vpop.eup %8538  ;;  %v7557_v46 = vpack.c.bf16 %v4071_v3, %v4068_v43  ;;  %v4115_v3 = vld [vmem:[%s11995_s3 + $0x210] sm:$0xff] }
0x1144   :  { %v3435_v50 = vpop.xlane.xlu1 %3434  ;;  %7523 = vmatpush3.bf16.msra.mxu0 %v7522_v61  ;;  %v3432_v42 = vpop.xlane.xlu0 %3431  ;;  %v3459_v2 = vmul.f32 %v8539_v55, %v9577_v51  ;;  %v4067_v61 = vld [vmem:[%s11995_s3 + $0x90] sm:$0xff]  ;;  %v4070_v55 = vld [vmem:[%s11995_s3 + $0xa8] sm:$0xff] }
0x1145   :  { %7154 = vmatprep.subr.mxu0 %v8573_v41  ;;  %8548 = vrcp.f32 %v3432_v42  ;;  %v4077_v42 = vld [vmem:[%s11995_s3 + $0xe0] sm:$0xff] }
0x1146   :  { %8550 = vrcp.f32 %v3435_v50  ;;  %v4074_v50 = vld [vmem:[%s11995_s3 + $0xc8] sm:$0xff] }
0x1147   :  { %v8541_v14 = vpop.eup %8540 }
0x1148   :  { %v8543_v8 = vpop.eup %8542  ;;  %v3441_v33 = vpop.xlane.xlu1 %3440  ;;  %7155 = vmatpush3.msra.mxu0 %v3459_v2  ;;  %v3461_v15 = vmul.f32 %v8541_v14, %v9582_v19  ;;  %v7559_v2 = vpack.c.bf16 %v4070_v55, %v4067_v61  ;;  %v4073_v14 = vld [vmem:[%s11995_s3 + $0xc0] sm:$0xff] }
0x1149   :  { %v3438_v0 = vpop.xlane.xlu0 %3437  ;;  %8552 = vrcp.f32 %v3441_v33  ;;  %7524 = vmatprep.subr.bf16.mxu0 %v8574_v11  ;;  %7157 = vmatmul.mubr.msk.f32.vlgmr.msra.gmra.mrb[38].mxu0 %vm1154_vm10, %v36_v32  ;;  %v3460_v38 = vmul.f32 %v8543_v8, %v9584_v26  ;;  %v4076_v8 = vld [vmem:[%s11995_s3 + $0xd8] sm:$0xff]  ;;  %v4125_v61 = vld [vmem:[%s11995_s3 + $0x260] sm:$0xff] }
0x114a   :  { %8554 = vrcp.f32 %v3438_v0  ;;  %7165 = vmatprep.mubr.msk.f32.mxu0 %vm8575_vm7, %v8573_v41  ;;  %v4080_v33 = vld [vmem:[%s11995_s3 + $0xf8] sm:$0xff]  ;;  %v4083_v0 = vld [vmem:[%s11995_s3 + $0x110] sm:$0xff] }
0x114b   :  { %v7525_v51 = vpack.c.bf16 %v3461_v15, %v3460_v38  ;;  %v8545_v25 = vpop.eup %8544  ;;  %v7563_v15 = vpack.c.bf16 %v4076_v8, %v4073_v14  ;;  %v7565_v38 = vpack.c.bf16 %v4083_v0, %v4080_v33  ;;  %v4131_v14 = vld [vmem:[%s11995_s3 + $0x290] sm:$0xff] }
0x114c   :  { %v8547_v27 = vpop.eup %8546  ;;  %v3462_v49 = vmul.f32 %v8545_v25, %v9593_v53  ;;  %v4082_v25 = vld [vmem:[%s11995_s3 + $0x108] sm:$0xff]  ;;  %v4127_v0 = vld [vmem:[%s11995_s3 + $0x270] sm:$0xff] }
0x114d   :  { %7526 = vmatpush3.bf16.msra.mxu0 %v7525_v51  ;;  %v3444_v10 = vpop.xlane.xlu0 %3443  ;;  %v3463_v36 = vmul.f32 %v8547_v27, %v9591_v37  ;;  %v4079_v51 = vld [vmem:[%s11995_s3 + $0xf0] sm:$0xff]  ;;  %v4089_v27 = vld [vmem:[%s11995_s3 + $0x140] sm:$0xff] }
0x114e   :  { %7163 = vmatprep.subr.mxu0 %v8573_v41  ;;  %8556 = vrcp.f32 %v3444_v10  ;;  %v4086_v10 = vld [vmem:[%s11995_s3 + $0x128] sm:$0xff] }
0x114f   :  { %v8549_v19 = vpop.eup %8548 }
0x1150   :  { %v3464_v63 = vmul.f32 %v8549_v19, %v9601_v58  ;;  %v8551_v26 = vpop.eup %8550  ;;  %v4053_v58 = vld [vmem:[%s11995_s3 + $0x20] sm:$0xff]  ;;  %v7569_v19 = vpack.c.bf16 %v4089_v27, %v4086_v10 }
0x1151   :  { %7164 = vmatpush3.msra.mxu0 %v3462_v49  ;;  %v3465_v37 = vmul.f32 %v8551_v26, %v9599_v57  ;;  %v4050_v57 = vld [vmem:[%s11995_s3 + $0x8] sm:$0xff]  ;;  %v7567_v49 = vpack.c.bf16 %v4082_v25, %v4079_v51  ;;  %v4092_v26 = vld [vmem:[%s11995_s3 + $0x158] sm:$0xff]  ;;  %v4137_v51 = vld [vmem:[%s11995_s3 + $0x2c0] sm:$0xff] }
0x1152   :  { %7166 = vmatmul.mubr.msk.f32.vlgmr.msra.gmra.mrb[40].mxu0 %vm1154_vm10, %v36_v32  ;;  %7533 = vmatprep.subr.bf16.mxu0 %v8574_v11  ;;  %v7534_v29 = vpack.c.bf16 %v3464_v63, %v3463_v36  ;;  %v7545_v60 = vpack.c.bf16 %v4053_v58, %v4050_v57  ;;  %v4085_v36 = vld [vmem:[%s11995_s3 + $0x120] sm:$0xff]  ;;  %v4088_v63 = vld [vmem:[%s11995_s3 + $0x138] sm:$0xff] }
0x1153   :  { %v8553_v28 = vpop.eup %8552  ;;  %7192 = vmatprep.mubr.msk.f32.mxu0 %vm8575_vm7, %v8573_v41  ;;  %v4097_v57 = vld [vmem:[%s11995_s3 + $0x180] sm:$0xff]  ;;  %v4100_v58 = vld [vmem:[%s11995_s3 + $0x198] sm:$0xff] }
0x1154   :  { %v8555_v35 = vpop.eup %8554  ;;  %7535 = vmatpush3.bf16.msra.mxu0 %v7534_v29  ;;  %v3467_v39 = vmul.f32 %v8553_v28, %v9607_v59  ;;  %v4052_v59 = vld [vmem:[%s11995_s3 + $0x18] sm:$0xff]  ;;  %v4095_v28 = vld [vmem:[%s11995_s3 + $0x170] sm:$0xff]  ;;  %v7571_v29 = vpack.c.bf16 %v4088_v63, %v4085_v36  ;;  %v4133_v27 = vld [vmem:[%s11995_s3 + $0x2a0] sm:$0xff] }
0x1155   :  { %v3466_v6 = vmul.f32 %v8555_v35, %v9609_v31  ;;  %7190 = vmatprep.subr.mxu0 %v8573_v41  ;;  %v4056_v31 = vld [vmem:[%s11995_s3 + $0x38] sm:$0xff]  ;;  %v7547_v1 = vpack.c.bf16 %v4052_v59, %v4049_v48  ;;  %v7573_v35 = vpack.c.bf16 %v4095_v28, %v4092_v26  ;;  %v7579_v59 = vpack.c.bf16 %v4100_v58, %v4097_v57  ;;  %v4057_v57 = vld [vmem:[%s11995_s3 + $0x40] sm:$0xff] }
0x1156   :  { %v4104_v48 = vld [vmem:[%s11995_s3 + $0x1b8] sm:$0xff] }
0x1157   :  { %v7540_v53 = vpack.c.bf16 %v3467_v39, %v3466_v6  ;;  %v4091_v6 = vld [vmem:[%s11995_s3 + $0x150] sm:$0xff]  ;;  %v4094_v39 = vld [vmem:[%s11995_s3 + $0x168] sm:$0xff]  ;;  %v4060_v58 = vld [vmem:[%s11995_s3 + $0x58] sm:$0xff] }
0x1158   :  { %7191 = vmatpush3.msra.mxu0 %v3465_v37  ;;  %v8557_v56 = vpop.eup %8556  ;;  %v4098_v37 = vld [vmem:[%s11995_s3 + $0x188] sm:$0xff] }
0x1159   :  { %7539 = vmatprep.subr.bf16.mxu0 %v8574_v11  ;;  %7193 = vmatmul.mubr.msk.f32.vlgmr.msra.gmra.mrb[42].mxu0 %vm1154_vm10, %v36_v32  ;;  %v3468_v21 = vmul.f32 %v8557_v56, %v9615_v62  ;;  %v7549_v62 = vpack.c.bf16 %v4059_v18, %v4056_v31  ;;  %v7575_v56 = vpack.c.bf16 %v4094_v39, %v4091_v6  ;;  %v4103_v18 = vld [vmem:[%s11995_s3 + $0x1b0] sm:$0xff]  ;;  %v4102_v39 = vld [vmem:[%s11995_s3 + $0x1a8] sm:$0xff] }
0x115a   :  { %7541 = vmatpush3.bf16.msra.mxu0 %v7540_v53  ;;  %7210 = vmatprep.mubr.msk.f32.mxu0 %vm8575_vm7, %v8573_v41  ;;  %v4101_v53 = vld [vmem:[%s11995_s3 + $0x1a0] sm:$0xff] }
0x115b   :  { %7208 = vmatprep.subr.mxu0 %v8573_v41 }
0x115e   :  { %7209 = vmatpush3.msra.mxu0 %v3468_v21  ;;  %v7577_v21 = vpack.c.bf16 %v4101_v53, %v4098_v37  ;;  %v4054_v37 = vld [vmem:[%s11995_s3 + $0x28] sm:$0xff]  ;;  %v4105_v53 = vld [vmem:[%s11995_s3 + $0x1c0] sm:$0xff] }
0x115f   :  { %7211 = vmatmul.mubr.msk.f32.vlgmr.msra.gmra.mrb[44].mxu0 %vm1154_vm10, %v36_v32  ;;  %7546 = vmatprep.subr.bf16.mxu0 %v7545_v60  ;;  %v7561_v32 = vpack.c.bf16 %v4077_v42, %v4074_v50  ;;  %v4107_v60 = vld [vmem:[%s11995_s3 + $0x1d0] sm:$0xff]  ;;  %v4121_v42 = vld [vmem:[%s11995_s3 + $0x240] sm:$0xff] }
0x1160   :  { %7548 = vmatpush1.bf16.msra.mxu0 %v7547_v1  ;;  %v7581_v31 = vpack.c.bf16 %v4107_v60, %v4104_v48  ;;  %v4106_v1 = vld [vmem:[%s11995_s3 + $0x1c8] sm:$0xff]  ;;  %v4111_v48 = vld [vmem:[%s11995_s3 + $0x1f0] sm:$0xff] }
0x1161   :  { %7550 = vmatprep.subr.bf16.mxu0 %v7549_v62  ;;  %v4110_v62 = vld [vmem:[%s11995_s3 + $0x1e8] sm:$0xff]  ;;  %v7583_v13 = vpack.c.bf16 %v4106_v1, %v4103_v18  ;;  %v4117_v1 = vld [vmem:[%s11995_s3 + $0x220] sm:$0xff] }
0x1162   :  { %v7585_v16 = vpack.c.bf16 %v4113_v30, %v4110_v62  ;;  %v4114_v60 = vld [vmem:[%s11995_s3 + $0x208] sm:$0xff]  ;;  %v4120_v62 = vld [vmem:[%s11995_s3 + $0x238] sm:$0xff] }
0x1163   :  { %v4066_v18 = vld [vmem:[%s11995_s3 + $0x88] sm:$0xff] }
0x1164   :  { %7552 = vmatpush1.bf16.msra.mxu0 %v7551_v34  ;;  %v4112_v34 = vld [vmem:[%s11995_s3 + $0x1f8] sm:$0xff] }
0x1165   :  { %7554 = vmatprep.subr.bf16.mxu0 %v7553_v23  ;;  %v4116_v23 = vld [vmem:[%s11995_s3 + $0x218] sm:$0xff]  ;;  %v7587_v20 = vpack.c.bf16 %v4112_v34, %v4109_v7  ;;  %v4123_v34 = vld [vmem:[%s11995_s3 + $0x250] sm:$0xff] }
0x1166   :  { %v7589_v43 = vpack.c.bf16 %v4119_v17, %v4116_v23  ;;  %v4072_v7 = vld [vmem:[%s11995_s3 + $0xb8] sm:$0xff]  ;;  %v4126_v23 = vld [vmem:[%s11995_s3 + $0x268] sm:$0xff] }
0x1168   :  { %7556 = vmatpush1.bf16.msra.mxu0 %v7555_v9  ;;  %v4118_v9 = vld [vmem:[%s11995_s3 + $0x228] sm:$0xff] }
0x1169   :  { %7558 = vmatprep.subr.bf16.mxu0 %v7557_v46  ;;  %v4122_v46 = vld [vmem:[%s11995_s3 + $0x248] sm:$0xff]  ;;  %v7591_v55 = vpack.c.bf16 %v4118_v9, %v4115_v3  ;;  %v4129_v9 = vld [vmem:[%s11995_s3 + $0x280] sm:$0xff] }
0x116a   :  { %v7593_v50 = vpack.c.bf16 %v4125_v61, %v4122_v46  ;;  %v4078_v3 = vld [vmem:[%s11995_s3 + $0xe8] sm:$0xff]  ;;  %v4132_v46 = vld [vmem:[%s11995_s3 + $0x298] sm:$0xff] }
0x116c   :  { %7560 = vmatpush1.bf16.msra.mxu0 %v7559_v2  ;;  %v4124_v2 = vld [vmem:[%s11995_s3 + $0x258] sm:$0xff] }
0x116d   :  { %7562 = vmatprep.subr.bf16.mxu0 %v7561_v32  ;;  %v4128_v32 = vld [vmem:[%s11995_s3 + $0x278] sm:$0xff]  ;;  %v7595_v8 = vpack.c.bf16 %v4124_v2, %v4121_v42  ;;  %v4135_v2 = vld [vmem:[%s11995_s3 + $0x2b0] sm:$0xff] }
0x116e   :  { %v7597_v33 = vpack.c.bf16 %v4131_v14, %v4128_v32  ;;  %v4084_v42 = vld [vmem:[%s11995_s3 + $0x118] sm:$0xff]  ;;  %v4138_v32 = vld [vmem:[%s11995_s3 + $0x2c8] sm:$0xff] }
0x1170   :  { %7564 = vmatpush1.bf16.msra.mxu0 %v7563_v15  ;;  %v4130_v15 = vld [vmem:[%s11995_s3 + $0x288] sm:$0xff] }
0x1171   :  { %7566 = vmatprep.subr.bf16.mxu0 %v7565_v38  ;;  %v4134_v38 = vld [vmem:[%s11995_s3 + $0x2a8] sm:$0xff]  ;;  %v7599_v25 = vpack.c.bf16 %v4130_v15, %v4127_v0 }
0x1172   :  { %v7601_v10 = vpack.c.bf16 %v4137_v51, %v4134_v38  ;;  %v4090_v0 = vld [vmem:[%s11995_s3 + $0x148] sm:$0xff]  ;;  %v4140_v38 = vld [vmem:[%s11995_s3 + $0x2d8] sm:$0xff]  ;;  %v4143_v51 = vld [vmem:[%s11995_s3 + $0x2f0] sm:$0xff] }
0x1174   :  { %7568 = vmatpush1.bf16.msra.mxu0 %v7567_v49  ;;  %v4136_v49 = vld [vmem:[%s11995_s3 + $0x2b8] sm:$0xff] }
0x1175   :  { %7570 = vmatprep.subr.bf16.mxu0 %v7569_v19  ;;  %v7603_v19 = vpack.c.bf16 %v4136_v49, %v4133_v27  ;;  %v4144_v27 = vld [vmem:[%s11995_s3 + $0x2f8] sm:$0xff]  ;;  %v4139_v49 = vld [vmem:[%s11995_s3 + $0x2d0] sm:$0xff] }
0x1178   :  { %7572 = vmatpush1.bf16.msra.mxu0 %v7571_v29 }
0x1179   :  { %7574 = vmatprep.subr.bf16.mxu0 %v7573_v35 }
0x117c   :  { %7576 = vmatpush1.bf16.msra.mxu0 %v7575_v56 }
0x117d   :  { %7578 = vmatprep.subr.bf16.mxu0 %v7577_v21 }
0x1180   :  { %7580 = vmatpush1.bf16.msra.mxu0 %v7579_v59  ;;  %v7649_v59 = vpack.c.bf16 %v4114_v60, %v4111_v48  ;;  %v4155_v48 = vld [vmem:[%s11995_s3 + $0x350] sm:$0xff] }
0x1181   :  { %7582 = vmatprep.subr.bf16.mxu0 %v7581_v31  ;;  %v4063_v31 = vld [vmem:[%s11995_s3 + $0x70] sm:$0xff] }
0x1182   :  { %v7651_v30 = vpack.c.bf16 %v4066_v18, %v4063_v31  ;;  %v4151_v31 = vld [vmem:[%s11995_s3 + $0x330] sm:$0xff] }
0x1184   :  { %7584 = vmatpush1.bf16.msra.mxu0 %v7583_v13  ;;  %v7653_v13 = vpack.c.bf16 %v4120_v62, %v4117_v1  ;;  %v4154_v62 = vld [vmem:[%s11995_s3 + $0x348] sm:$0xff] }
0x1185   :  { %7586 = vmatprep.subr.bf16.mxu0 %v7585_v16  ;;  %v4069_v16 = vld [vmem:[%s11995_s3 + $0xa0] sm:$0xff] }
0x1186   :  { %v7655_v17 = vpack.c.bf16 %v4072_v7, %v4069_v16  ;;  %v4161_v16 = vld [vmem:[%s11995_s3 + $0x380] sm:$0xff]  ;;  %v7615_v7 = vpack.c.bf16 %v4154_v62, %v4151_v31  ;;  %v4190_v31 = vld [vmem:[%s11995_s3 + $0x468] sm:$0xff] }
0x1187   :  { %v4189_v62 = vld [vmem:[%s11995_s3 + $0x460] sm:$0xff] }
0x1188   :  { %7588 = vmatpush1.bf16.msra.mxu0 %v7587_v20  ;;  %v7657_v20 = vpack.c.bf16 %v4126_v23, %v4123_v34  ;;  %v4157_v23 = vld [vmem:[%s11995_s3 + $0x360] sm:$0xff] }
0x1189   :  { %7590 = vmatprep.subr.bf16.mxu0 %v7589_v43  ;;  %v4075_v43 = vld [vmem:[%s11995_s3 + $0xd0] sm:$0xff] }
0x118a   :  { %v7659_v61 = vpack.c.bf16 %v4078_v3, %v4075_v43  ;;  %v4159_v43 = vld [vmem:[%s11995_s3 + $0x370] sm:$0xff]  ;;  %v4162_v3 = vld [vmem:[%s11995_s3 + $0x388] sm:$0xff] }
0x118c   :  { %7592 = vmatpush1.bf16.msra.mxu0 %v7591_v55  ;;  %v7661_v55 = vpack.c.bf16 %v4132_v46, %v4129_v9  ;;  %v4164_v9 = vld [vmem:[%s11995_s3 + $0x398] sm:$0xff]  ;;  %v4167_v46 = vld [vmem:[%s11995_s3 + $0x3b0] sm:$0xff] }
0x118d   :  { %7594 = vmatprep.subr.bf16.mxu0 %v7593_v50  ;;  %v4081_v50 = vld [vmem:[%s11995_s3 + $0x100] sm:$0xff] }
0x118e   :  { %v7663_v14 = vpack.c.bf16 %v4084_v42, %v4081_v50  ;;  %v4163_v50 = vld [vmem:[%s11995_s3 + $0x390] sm:$0xff]  ;;  %v7621_v42 = vpack.c.bf16 %v4167_v46, %v4164_v9  ;;  %v4196_v9 = vld [vmem:[%s11995_s3 + $0x498] sm:$0xff] }
0x118f   :  { %v4195_v46 = vld [vmem:[%s11995_s3 + $0x490] sm:$0xff] }
0x1190   :  { %7596 = vmatpush1.bf16.msra.mxu0 %v7595_v8  ;;  %v7665_v8 = vpack.c.bf16 %v4138_v32, %v4135_v2  ;;  %v4166_v2 = vld [vmem:[%s11995_s3 + $0x3a8] sm:$0xff]  ;;  %v4165_v32 = vld [vmem:[%s11995_s3 + $0x3a0] sm:$0xff] }
0x1191   :  { %7598 = vmatprep.subr.bf16.mxu0 %v7597_v33  ;;  %v4087_v33 = vld [vmem:[%s11995_s3 + $0x130] sm:$0xff] }
0x1192   :  { %v7667_v15 = vpack.c.bf16 %v4090_v0, %v4087_v33  ;;  %v4173_v33 = vld [vmem:[%s11995_s3 + $0x3e0] sm:$0xff]  ;;  %v7623_v0 = vpack.c.bf16 %v4166_v2, %v4163_v50 }
0x1193   :  { %v4249_v50 = vld [vmem:[%s11995_s3 + $0x640] sm:$0xff] }
0x1194   :  { %7600 = vmatpush1.bf16.msra.mxu0 %v7599_v25  ;;  %v4141_v25 = vld [vmem:[%s11995_s3 + $0x2e0] sm:$0xff] }
0x1195   :  { %7602 = vmatprep.subr.bf16.mxu0 %v7601_v10  ;;  %v7605_v10 = vpack.c.bf16 %v4143_v51, %v4140_v38  ;;  %v4169_v38 = vld [vmem:[%s11995_s3 + $0x3c0] sm:$0xff] }
0x1198   :  { %7604 = vmatpush1.bf16.msra.mxu0 %v7603_v19  ;;  %v4142_v19 = vld [vmem:[%s11995_s3 + $0x2e8] sm:$0xff] }
0x1199   :  { %7606 = vmatprep.subr.bf16.mxu0 %v7605_v10  ;;  %v4171_v10 = vld [vmem:[%s11995_s3 + $0x3d0] sm:$0xff] }
0x121c   :  { %v3538_v36 = vpop.f32.mrb[38].mxu0 }
0x121d   :  { %v7158_v63 = vpop.f32.mrb[39].mxu0 }
0x121e   :  { %v7607_v63 = vpack.c.bf16 %v4142_v19, %v4139_v49  ;;  %v4176_v49 = vld [vmem:[%s11995_s3 + $0x3f8] sm:$0xff]  ;;  %v4179_v19 = vld [vmem:[%s11995_s3 + $0x410] sm:$0xff] }
0x1220   :  { %7608 = vmatpush1.bf16.msra.mxu0 %v7607_v63 }
0x1225   :  { %v3608_v26 = vpop.f32.mrb[40].mxu0 }
0x1226   :  { %7175 = vmatmul.mubr.msk.f32.vlgmr.msra.gmra.mrb[32].mxu1 %vm1154_vm10, %v3608_v26  ;;  %v7167_v28 = vpop.f32.mrb[41].mxu0  ;;  %v4093_v26 = vld [vmem:[%s11995_s3 + $0x160] sm:$0xff] }
0x1227   :  { %7532 = vmatpush3.bf16.msra.mxu1 %v9434_v22  ;;  %7183 = vmatprep.mubr.msk.f32.mxu1 %vm8575_vm7, %v8573_v41  ;;  %v4096_v28 = vld [vmem:[%s11995_s3 + $0x178] sm:$0xff] }
0x1228   :  { %7181 = vmatprep.subr.mxu1 %v8573_v41 }
0x122b   :  { %7182 = vmatpush3.msra.mxu1 %v9436_v5  ;;  %v4099_v5 = vld [vmem:[%s11995_s3 + $0x190] sm:$0xff] }
0x122c   :  { %7536 = vmatprep.subr.bf16.mxu1 %v8574_v11  ;;  %v3824_v29 = vpop.f32.mrb[42].mxu0 }
0x122d   :  { %v7194_v35 = vpop.f32.mrb[43].mxu0 }
0x122e   :  { %7184 = vmatmul.mubr.msk.f32.vlgmr.msra.gmra.mrb[32].mxu1 %vm1154_vm10, %v3538_v36  ;;  %v7669_v36 = vpack.c.bf16 %v4144_v27, %v4141_v25  ;;  %v4146_v35 = vld [vmem:[%s11995_s3 + $0x308] sm:$0xff]  ;;  %v4172_v25 = vld [vmem:[%s11995_s3 + $0x3d8] sm:$0xff] }
0x122f   :  { %7538 = vmatpush3.bf16.msra.mxu1 %v9440_v52  ;;  %7201 = vmatprep.mubr.msk.f32.mxu1 %vm8575_vm7, %v8573_v41  ;;  %v7641_v52 = vpack.c.bf16 %v4102_v39, %v4099_v5  ;;  %v9970_v5 = vld [vmem:[%s11992_s1 + $0x1a0] ss:$8 sm:$0x3] }
0x1230   :  { %7199 = vmatprep.subr.mxu1 %v8573_v41  ;;  %v4047_v39 = vld [vmem:[%s11994_s2 + $0x280] ss:$0 sm:$0xff]  ;;  %v4174_v27 = vld [vmem:[%s11995_s3 + $0x3e8] sm:$0xff] }
0x1231   :  { %v7686_v63 = vpack.c.bf16 %v4174_v27, %v4171_v10  ;;  %v4255_v10 = vld [vmem:[%s11995_s3 + $0x670] sm:$0xff]  ;;  %v4258_v27 = vld [vmem:[%s11995_s3 + $0x688] sm:$0xff] }
0x1232   :  { %v3968_v22 = vpop.f32.mrb[44].mxu0 }
0x1233   :  { %7200 = vmatpush3.msra.mxu1 %v9452_v4  ;;  %v7212_v6 = vpop.f32.mrb[45].mxu0  ;;  %v4051_v4 = vld [vmem:[%s11995_s3 + $0x10] sm:$0xff] }
0x1234   :  { %7542 = vmatprep.subr.bf16.mxu1 %v8574_v11  ;;  %v7643_v56 = vpack.c.bf16 %v4054_v37, %v4051_v4  ;;  %v665_v4 = vrot.slane %v9970_v5, %v8885_v54 }
0x1236   :  { %7202 = vmatmul.mubr.msk.f32.vlgmr.msra.gmra.mrb[32].mxu1 %vm1154_vm10, %v3824_v29  ;;  %v7671_v29 = vpack.c.bf16 %v4096_v28, %v4093_v26  ;;  %v10001_v18 = vadd.f32 %v8877_v40, %v665_v4  ;;  %v4158_v40 = vld [vmem:[%s11995_s3 + $0x368] sm:$0xff]  ;;  %v4175_v26 = vld [vmem:[%s11995_s3 + $0x3f0] sm:$0xff]  ;;  %v7629_v28 = vpack.c.bf16 %v4179_v19, %v4176_v49 }
0x1237   :  { %7544 = vmatpush3.bf16.msra.mxu1 %v9444_v12  ;;  %7219 = vmatprep.mubr.msk.f32.mxu1 %vm8575_vm7, %v8573_v41  ;;  %v4108_v12 = vld [vmem:[%s11995_s3 + $0x1d8] sm:$0xff] }
0x1238   :  { %7217 = vmatprep.subr.mxu1 %v8573_v41  ;;  %v7645_v21 = vpack.c.bf16 %v4108_v12, %v4105_v53  ;;  %v4148_v53 = vld [vmem:[%s11995_s3 + $0x318] sm:$0xff]  ;;  %v4147_v12 = vld [vmem:[%s11995_s3 + $0x310] sm:$0xff] }
0x123b   :  { %7218 = vmatpush3.msra.mxu1 %v9456_v44  ;;  %v7647_v44 = vpack.c.bf16 %v4060_v58, %v4057_v57  ;;  %v4152_v58 = vld [vmem:[%s11995_s3 + $0x338] sm:$0xff] }
0x123c   :  { %7642 = vmatprep.subr.bf16.mxu1 %v7641_v52  ;;  %v4145_v52 = vld [vmem:[%s11995_s3 + $0x300] sm:$0xff]  ;;  %v7613_v1 = vpack.c.bf16 %v4155_v48, %v4152_v58  ;;  %v4191_v58 = vld [vmem:[%s11995_s3 + $0x470] sm:$0xff] }
0x123e   :  { %7220 = vmatmul.mubr.msk.f32.vlgmr.msra.gmra.mrb[32].mxu1 %vm1154_vm10, %v3968_v22  ;;  %v4149_v22 = vld [vmem:[%s11995_s3 + $0x320] sm:$0xff]  ;;  %vm5072_vm10 = vcmask 130048  }
0x123f   :  { %7644 = vmatpush3.bf16.msra.mxu1 %v7643_v56  ;;  %v7609_v6 = vpack.c.bf16 %v4149_v22, %v4146_v35  ;;  %v4150_v56 = vld [vmem:[%s11995_s3 + $0x328] sm:$0xff]  ;;  %v4177_v35 = vld [vmem:[%s11995_s3 + $0x400] sm:$0xff]  ;;  %v4180_v22 = vld [vmem:[%s11995_s3 + $0x418] sm:$0xff] }
0x1240   :  { %7646 = vmatprep.subr.bf16.mxu1 %v7645_v21  ;;  %v7689_v4 = vpack.c.bf16 %v4180_v22, %v4177_v35  ;;  %v4212_v35 = vld [vmem:[%s11995_s3 + $0x518] sm:$0xff]  ;;  %v4215_v22 = vld [vmem:[%s11995_s3 + $0x530] sm:$0xff] }
0x1241   :  { %7610 = vmatprep.subr.bf16.mxu0 %v7609_v6  ;;  %v4182_v6 = vld [vmem:[%s11995_s3 + $0x428] sm:$0xff] }
0x1243   :  { %7648 = vmatpush3.bf16.msra.mxu1 %v7647_v44  ;;  %v7611_v44 = vpack.c.bf16 %v4148_v53, %v4145_v52 }
0x1244   :  { %7650 = vmatprep.subr.bf16.mxu1 %v7649_v59  ;;  %v7674_v59 = vpack.c.bf16 %v4150_v56, %v4147_v12  ;;  %v4184_v12 = vld [vmem:[%s11995_s3 + $0x438] sm:$0xff]  ;;  %v4183_v56 = vld [vmem:[%s11995_s3 + $0x430] sm:$0xff] }
0x1247   :  { %7652 = vmatpush3.bf16.msra.mxu1 %v7651_v30  ;;  %v4153_v30 = vld [vmem:[%s11995_s3 + $0x340] sm:$0xff] }
0x1248   :  { %7654 = vmatprep.subr.bf16.mxu1 %v7653_v13  ;;  %v4156_v13 = vld [vmem:[%s11995_s3 + $0x358] sm:$0xff] }
0x1249   :  { %v7677_v34 = vpack.c.bf16 %v4156_v13, %v4153_v30  ;;  %v4192_v30 = vld [vmem:[%s11995_s3 + $0x478] sm:$0xff]  ;;  %v4194_v13 = vld [vmem:[%s11995_s3 + $0x488] sm:$0xff] }
0x124b   :  { %7656 = vmatpush3.bf16.msra.mxu1 %v7655_v17  ;;  %v7617_v17 = vpack.c.bf16 %v4161_v16, %v4158_v40  ;;  %v4197_v40 = vld [vmem:[%s11995_s3 + $0x4a0] sm:$0xff]  ;;  %v4243_v16 = vld [vmem:[%s11995_s3 + $0x610] sm:$0xff] }
0x124c   :  { %7658 = vmatprep.subr.bf16.mxu1 %v7657_v20  ;;  %v4160_v20 = vld [vmem:[%s11995_s3 + $0x378] sm:$0xff] }
0x124f   :  { %7660 = vmatpush3.bf16.msra.mxu1 %v7659_v61  ;;  %v7619_v61 = vpack.c.bf16 %v4160_v20, %v4157_v23  ;;  %v7695_v23 = vpack.c.bf16 %v4192_v30, %v4189_v62  ;;  %v7697_v20 = vpack.c.bf16 %v4197_v40, %v4194_v13  ;;  %v4217_v30 = vld [vmem:[%s11995_s3 + $0x540] sm:$0xff]  ;;  %v4220_v13 = vld [vmem:[%s11995_s3 + $0x558] sm:$0xff]  ;;  %v4219_v40 = vld [vmem:[%s11995_s3 + $0x550] sm:$0xff] }
0x1250   :  { %7662 = vmatprep.subr.bf16.mxu1 %v7661_v55  ;;  %v7680_v55 = vpack.c.bf16 %v4162_v3, %v4159_v43  ;;  %v4193_v3 = vld [vmem:[%s11995_s3 + $0x480] sm:$0xff] }
0x1251   :  { %v7699_v2 = vpack.c.bf16 %v4196_v9, %v4193_v3 }
0x1253   :  { %7664 = vmatpush3.bf16.msra.mxu1 %v7663_v14  ;;  %v4168_v14 = vld [vmem:[%s11995_s3 + $0x3b8] sm:$0xff] }
0x1254   :  { %7666 = vmatprep.subr.bf16.mxu1 %v7665_v8  ;;  %v4170_v8 = vld [vmem:[%s11995_s3 + $0x3c8] sm:$0xff] }
0x1255   :  { %v7625_v51 = vpack.c.bf16 %v4173_v33, %v4170_v8  ;;  %v4199_v8 = vld [vmem:[%s11995_s3 + $0x4b0] sm:$0xff]  ;;  %v4202_v33 = vld [vmem:[%s11995_s3 + $0x4c8] sm:$0xff] }
0x1256   :  { %v7703_v49 = vpack.c.bf16 %v4202_v33, %v4199_v8  ;;  %v4282_v8 = vld [vmem:[%s11995_s3 + $0x748] sm:$0xff] }
0x1257   :  { %7668 = vmatpush3.bf16.msra.mxu1 %v7667_v15  ;;  %v7683_v15 = vpack.c.bf16 %v4168_v14, %v4165_v32 }
0x1258   :  { %7670 = vmatprep.subr.bf16.mxu1 %v7669_v36  ;;  %v7627_v36 = vpack.c.bf16 %v4172_v25, %v4169_v38  ;;  %v4209_v25 = vld [vmem:[%s11995_s3 + $0x500] sm:$0xff] }
0x125b   :  { %7672 = vmatpush3.bf16.msra.mxu1 %v7671_v29  ;;  %v4178_v29 = vld [vmem:[%s11995_s3 + $0x408] sm:$0xff] }
0x125c   :  { %7673 = vmatprep.subr.bf16.mxu1 %v8574_v11  ;;  %v7631_v52 = vpack.c.bf16 %v4178_v29, %v4175_v26  ;;  %v4208_v26 = vld [vmem:[%s11995_s3 + $0x4f8] sm:$0xff]  ;;  %v7801_v29 = vpack.c.bf16 %v4258_v27, %v4255_v10  ;;  %v4234_v10 = vld [vmem:[%s11995_s3 + $0x5c8] sm:$0xff] }
0x125d   :  { %v4236_v27 = vld [vmem:[%s11995_s3 + $0x5d8] sm:$0xff] }
0x1311   :  { %v4041_v37 = vpop.f32.mrb[32].mxu1 }
0x1312   :  { %v4046_v21 = vmul.f32 0.25, %v4041_v37  ;;  %v7221_v57 = vpop.f32.mrb[33].mxu1  ;;  %v4181_v37 = vld [vmem:[%s11995_s3 + $0x420] sm:$0xff] }
0x1313   :  { %v4188_v57 = vld [vmem:[%s11995_s3 + $0x458] sm:$0xff]  ;;  %v7635_v48 = vpack.c.bf16 %v4184_v12, %v4181_v37  ;;  %v7709_v37 = vpack.c.bf16 %v4215_v22, %v4212_v35  ;;  %v4214_v12 = vld [vmem:[%s11995_s3 + $0x528] sm:$0xff]  ;;  %v4237_v35 = vld [vmem:[%s11995_s3 + $0x5e0] sm:$0xff] }
0x1314   :  { %v9995_v60 = vadd.f32 %v4047_v39, %v4046_v21  ;;  %v4185_v39 = vld [vmem:[%s11995_s3 + $0x440] sm:$0xff]  ;;  %v4186_v21 = vld [vmem:[%s11995_s3 + $0x448] sm:$0xff] }
0x1315   :  { %v7633_v53 = vpack.c.bf16 %v4185_v39, %v4182_v6  ;;  %v4261_v6 = vld [vmem:[%s11995_s3 + $0x6a0] sm:$0xff]  ;;  %v4264_v39 = vld [vmem:[%s11995_s3 + $0x6b8] sm:$0xff] }
0x1316   :  { %4547 = vmatprep.mubr.f32.mxu0 %v9995_v60  ;;  %4689 = vmatprep.mubr.f32.mxu1 %v9995_v60 }
0x1317   :  { %4548 = vmatmul.mubr.f32.vlgmr.msra.gmra.mrb[46].mxu0 %v10001_v18  ;;  %4690 = vmatmul.mubr.f32.vlgmr.msra.gmra.mrb[34].mxu1 %v10001_v18 }
0x1318   :  { %7612 = vmatpush1.bf16.msra.mxu0 %v7611_v44  ;;  %7675 = vmatpush3.bf16.msra.mxu1 %v7674_v59  ;;  %v7692_v44 = vpack.c.bf16 %v4186_v21, %v4183_v56  ;;  %v4187_v59 = vld [vmem:[%s11995_s3 + $0x450] sm:$0xff]  ;;  %v4213_v56 = vld [vmem:[%s11995_s3 + $0x520] sm:$0xff]  ;;  %v7805_v21 = vpack.c.bf16 %v4264_v39, %v4261_v6  ;;  %v4240_v6 = vld [vmem:[%s11995_s3 + $0x5f8] sm:$0xff] }
0x1319   :  { %7614 = vmatprep.subr.bf16.mxu0 %v7613_v1  ;;  %7676 = vmatprep.subr.bf16.mxu1 %v8574_v11  ;;  %v7637_v1 = vpack.c.bf16 %v4191_v58, %v4188_v57  ;;  %v4216_v57 = vld [vmem:[%s11995_s3 + $0x538] sm:$0xff]  ;;  %v4218_v58 = vld [vmem:[%s11995_s3 + $0x548] sm:$0xff] }
0x131a   :  { %4618 = vmatprep.mubr.f32.mxu0 %v8573_v41  ;;  %7254 = vmatprep.mubr.msk.f32.mxu1 %vm8575_vm7, %v8573_v41  ;;  %v4242_v39 = vld [vmem:[%s11995_s3 + $0x608] sm:$0xff] }
0x131c   :  { %7616 = vmatpush1.bf16.msra.mxu0 %v7615_v7  ;;  %7678 = vmatpush3.bf16.msra.mxu1 %v7677_v34  ;;  %v4246_v7 = vld [vmem:[%s11995_s3 + $0x628] sm:$0xff]  ;;  %v7639_v34 = vpack.c.bf16 %v4190_v31, %v4187_v59 }
0x131d   :  { %7618 = vmatprep.subr.bf16.mxu0 %v7617_v17  ;;  %7679 = vmatprep.subr.bf16.mxu1 %v8574_v11  ;;  %v669_v17 = vrot.slane %v9970_v5, %v8882_v47  ;;  %v7793_v43 = vpack.c.bf16 %v4246_v7, %v4243_v16  ;;  %v4198_v5 = vld [vmem:[%s11995_s3 + $0x4a8] sm:$0xff] }
0x131e   :  { %v7795_v14 = vpack.c.bf16 %v4198_v5, %v4195_v46  ;;  %v4270_v59 = vld [vmem:[%s11995_s3 + $0x6e8] sm:$0xff]  ;;  %v4223_v46 = vld [vmem:[%s11995_s3 + $0x570] sm:$0xff] }
0x131f   :  { %v10173_v32 = vadd.f32 %v8879_v45, %v669_v17  ;;  %v4204_v45 = vld [vmem:[%s11995_s3 + $0x4d8] sm:$0xff]  ;;  %v4222_v7 = vld [vmem:[%s11995_s3 + $0x568] sm:$0xff]  ;;  %v4273_v17 = vld [vmem:[%s11995_s3 + $0x700] sm:$0xff] }
0x1320   :  { %7620 = vmatpush1.bf16.msra.mxu0 %v7619_v61  ;;  %7681 = vmatpush3.bf16.msra.mxu1 %v7680_v55  ;;  %v4200_v61 = vld [vmem:[%s11995_s3 + $0x4b8] sm:$0xff]  ;;  %v4203_v55 = vld [vmem:[%s11995_s3 + $0x4d0] sm:$0xff]  ;;  %v7811_v3 = vpack.c.bf16 %v4222_v7, %v4219_v40  ;;  %v4226_v5 = vld [vmem:[%s11995_s3 + $0x588] sm:$0xff] }
0x1321   :  { %7622 = vmatprep.subr.bf16.mxu0 %v7621_v42  ;;  %7682 = vmatprep.subr.bf16.mxu1 %v8574_v11  ;;  %v4252_v42 = vld [vmem:[%s11995_s3 + $0x658] sm:$0xff]  ;;  %v7719_v33 = vpack.c.bf16 %v4226_v5, %v4223_v46  ;;  %v4254_v40 = vld [vmem:[%s11995_s3 + $0x668] sm:$0xff]  ;;  %v4263_v46 = vld [vmem:[%s11995_s3 + $0x6b0] sm:$0xff] }
0x1322   :  { %v7797_v38 = vpack.c.bf16 %v4252_v42, %v4249_v50  ;;  %v4228_v50 = vld [vmem:[%s11995_s3 + $0x598] sm:$0xff]  ;;  %v4230_v42 = vld [vmem:[%s11995_s3 + $0x5a8] sm:$0xff] }
0x1324   :  { %7624 = vmatpush1.bf16.msra.mxu0 %v7623_v0  ;;  %7684 = vmatpush3.bf16.msra.mxu1 %v7683_v15  ;;  %v4201_v0 = vld [vmem:[%s11995_s3 + $0x4c0] sm:$0xff]  ;;  %v7701_v15 = vpack.c.bf16 %v4203_v55, %v4200_v61 }
0x1325   :  { %7626 = vmatprep.subr.bf16.mxu0 %v7625_v51  ;;  %7685 = vmatprep.subr.bf16.mxu1 %v8574_v11  ;;  %v4206_v51 = vld [vmem:[%s11995_s3 + $0x4e8] sm:$0xff]  ;;  %v7799_v19 = vpack.c.bf16 %v4204_v45, %v4201_v0  ;;  %v4225_v61 = vld [vmem:[%s11995_s3 + $0x580] sm:$0xff]  ;;  %v4232_v45 = vld [vmem:[%s11995_s3 + $0x5b8] sm:$0xff] }
0x1326   :  { %v7815_v0 = vpack.c.bf16 %v4228_v50, %v4225_v61  ;;  %v4259_v50 = vld [vmem:[%s11995_s3 + $0x690] sm:$0xff] }
0x1328   :  { %7628 = vmatpush1.bf16.msra.mxu0 %v7627_v36  ;;  %7687 = vmatpush3.bf16.msra.mxu1 %v7686_v63  ;;  %v7705_v36 = vpack.c.bf16 %v4209_v25, %v4206_v51  ;;  %v4205_v63 = vld [vmem:[%s11995_s3 + $0x4e0] sm:$0xff]  ;;  %v4231_v51 = vld [vmem:[%s11995_s3 + $0x5b0] sm:$0xff] }
0x1329   :  { %7630 = vmatprep.subr.bf16.mxu0 %v7629_v28  ;;  %7688 = vmatprep.subr.bf16.mxu1 %v8574_v11  ;;  %v4207_v28 = vld [vmem:[%s11995_s3 + $0x4f0] sm:$0xff] }
0x132c   :  { %7632 = vmatpush1.bf16.msra.mxu0 %v7631_v52  ;;  %7690 = vmatpush3.bf16.msra.mxu1 %v7689_v4  ;;  %v7707_v52 = vpack.c.bf16 %v4208_v26, %v4205_v63  ;;  %v7819_v26 = vpack.c.bf16 %v4234_v10, %v4231_v51  ;;  %v4268_v51 = vld [vmem:[%s11995_s3 + $0x6d8] sm:$0xff]  ;;  %v4318_v10 = vld [vmem:[%s11995_s3 + $0x868] sm:$0xff] }
0x132d   :  { %7634 = vmatprep.subr.bf16.mxu0 %v7633_v53  ;;  %7691 = vmatprep.subr.bf16.mxu1 %v8574_v11  ;;  %v4211_v53 = vld [vmem:[%s11995_s3 + $0x510] sm:$0xff] }
0x132e   :  { %v7711_v31 = vpack.c.bf16 %v4214_v12, %v4211_v53  ;;  %v4241_v12 = vld [vmem:[%s11995_s3 + $0x600] sm:$0xff] }
0x1330   :  { %7636 = vmatpush1.bf16.msra.mxu0 %v7635_v48  ;;  %7693 = vmatpush3.bf16.msra.mxu1 %v7692_v44  ;;  %v4221_v48 = vld [vmem:[%s11995_s3 + $0x560] sm:$0xff]  ;;  %v4267_v44 = vld [vmem:[%s11995_s3 + $0x6d0] sm:$0xff] }
0x1331   :  { %7638 = vmatprep.subr.bf16.mxu0 %v7637_v1  ;;  %7694 = vmatprep.subr.bf16.mxu1 %v8574_v11  ;;  %v7807_v1 = vpack.c.bf16 %v4216_v57, %v4213_v56  ;;  %v7713_v62 = vpack.c.bf16 %v4221_v48, %v4218_v58  ;;  %v7809_v16 = vpack.c.bf16 %v4270_v59, %v4267_v44  ;;  %v4244_v56 = vld [vmem:[%s11995_s3 + $0x618] sm:$0xff]  ;;  %v4294_v57 = vld [vmem:[%s11995_s3 + $0x7a8] sm:$0xff]  ;;  %v4251_v48 = vld [vmem:[%s11995_s3 + $0x650] sm:$0xff] }
0x1332   :  { %v4248_v58 = vld [vmem:[%s11995_s3 + $0x638] sm:$0xff]  ;;  %v7731_v44 = vpack.c.bf16 %v4244_v56, %v4241_v12  ;;  %v4330_v12 = vld [vmem:[%s11995_s3 + $0x8c8] sm:$0xff] }
0x1333   :  { %v4284_v56 = vld [vmem:[%s11995_s3 + $0x758] sm:$0xff] }
0x1334   :  { %7640 = vmatpush1.bf16.msra.mxu0 %v7639_v34  ;;  %7696 = vmatpush3.bf16.msra.mxu1 %v7695_v23  ;;  %v4224_v34 = vld [vmem:[%s11995_s3 + $0x578] sm:$0xff]  ;;  %v4227_v23 = vld [vmem:[%s11995_s3 + $0x590] sm:$0xff] }
0x1335   :  { %7698 = vmatprep.subr.bf16.mxu1 %v7697_v20  ;;  %7794 = vmatprep.subr.bf16.mxu0 %v7793_v43  ;;  %v4276_v20 = vld [vmem:[%s11995_s3 + $0x718] sm:$0xff]  ;;  %v7715_v43 = vpack.c.bf16 %v4220_v13, %v4217_v30  ;;  %v7717_v9 = vpack.c.bf16 %v4227_v23, %v4224_v34  ;;  %v4297_v30 = vld [vmem:[%s11995_s3 + $0x7c0] sm:$0xff] }
0x1336   :  { %v7813_v55 = vpack.c.bf16 %v4276_v20, %v4273_v17  ;;  %v4300_v13 = vld [vmem:[%s11995_s3 + $0x7d8] sm:$0xff]  ;;  %v4253_v17 = vld [vmem:[%s11995_s3 + $0x660] sm:$0xff] }
0x1337   :  { %4619 = vmatmul.mubr.f32.vlgmr.msra.gmra.mrb[46].mxu0 %v10173_v32  ;;  %7255 = vmatmul.mubr.f32.vlgmr.msra.gmra.mrb[36].mxu1 %v10173_v32  ;;  %v7829_v34 = vpack.c.bf16 %v4300_v13, %v4297_v30  ;;  %v4256_v20 = vld [vmem:[%s11995_s3 + $0x678] sm:$0xff]  ;;  %v4293_v30 = vld [vmem:[%s11995_s3 + $0x7a0] sm:$0xff] }
0x1338   :  { %7700 = vmatpush1.bf16.msra.mxu1 %v7699_v2  ;;  %4829 = vmatprep.mubr.f32.mxu1 %v9995_v60  ;;  %v4233_v2 = vld [vmem:[%s11995_s3 + $0x5c0] sm:$0xff]  ;;  %v7739_v5 = vpack.c.bf16 %v4256_v20, %v4253_v17  ;;  %v4299_v17 = vld [vmem:[%s11995_s3 + $0x7d0] sm:$0xff] }
0x1339   :  { %7796 = vmatpush3.bf16.msra.mxu0 %v7795_v14  ;;  %4971 = vmatprep.mubr.f32.mxu0 %v9995_v60  ;;  %v4210_v60 = vld [vmem:[%s11995_s3 + $0x508] sm:$0xff]  ;;  %v4279_v14 = vld [vmem:[%s11995_s3 + $0x730] sm:$0xff] }
0x133a   :  { %7702 = vmatprep.subr.bf16.mxu1 %v7701_v15  ;;  %7798 = vmatprep.subr.bf16.mxu0 %v7797_v38  ;;  %v7803_v4 = vpack.c.bf16 %v4210_v60, %v4207_v28  ;;  %v7721_v15 = vpack.c.bf16 %v4233_v2, %v4230_v42  ;;  %v4229_v38 = vld [vmem:[%s11995_s3 + $0x5a0] sm:$0xff]  ;;  %v7817_v25 = vpack.c.bf16 %v4282_v8, %v4279_v14  ;;  %v4238_v60 = vld [vmem:[%s11995_s3 + $0x5e8] sm:$0xff]  ;;  %v4312_v14 = vld [vmem:[%s11995_s3 + $0x838] sm:$0xff] }
0x133b   :  { %v7723_v63 = vpack.c.bf16 %v4232_v45, %v4229_v38  ;;  %v4262_v42 = vld [vmem:[%s11995_s3 + $0x6a8] sm:$0xff]  ;;  %v4309_v2 = vld [vmem:[%s11995_s3 + $0x820] sm:$0xff] }
0x133c   :  { %7704 = vmatpush1.bf16.msra.mxu1 %v7703_v49  ;;  %v4239_v49 = vld [vmem:[%s11995_s3 + $0x5f0] sm:$0xff]  ;;  %v4266_v8 = vld [vmem:[%s11995_s3 + $0x6c8] sm:$0xff]  ;;  %v4265_v45 = vld [vmem:[%s11995_s3 + $0x6c0] sm:$0xff] }
0x133d   :  { %7800 = vmatpush3.bf16.msra.mxu0 %v7799_v19  ;;  %7706 = vmatprep.subr.bf16.mxu1 %v7705_v36  ;;  %v4285_v19 = vld [vmem:[%s11995_s3 + $0x760] sm:$0xff]  ;;  %v4288_v36 = vld [vmem:[%s11995_s3 + $0x778] sm:$0xff]  ;;  %v7725_v28 = vpack.c.bf16 %v4239_v49, %v4236_v27  ;;  %v4275_v49 = vld [vmem:[%s11995_s3 + $0x710] sm:$0xff] }
0x133e   :  { %7802 = vmatprep.subr.bf16.mxu0 %v7801_v29  ;;  %v4235_v29 = vld [vmem:[%s11995_s3 + $0x5d0] sm:$0xff]  ;;  %v7821_v22 = vpack.c.bf16 %v4288_v36, %v4285_v19  ;;  %v4272_v27 = vld [vmem:[%s11995_s3 + $0x6f8] sm:$0xff]  ;;  %v7747_v19 = vpack.c.bf16 %v4268_v51, %v4265_v45 }
0x1340   :  { %7708 = vmatpush1.bf16.msra.mxu1 %v7707_v52  ;;  %v4245_v52 = vld [vmem:[%s11995_s3 + $0x620] sm:$0xff] }
0x1341   :  { %7804 = vmatpush3.bf16.msra.mxu0 %v7803_v4  ;;  %7710 = vmatprep.subr.bf16.mxu1 %v7709_v37  ;;  %v7727_v4 = vpack.c.bf16 %v4238_v60, %v4235_v29  ;;  %v7823_v37 = vpack.c.bf16 %v4240_v6, %v4237_v35  ;;  %v7729_v53 = vpack.c.bf16 %v4245_v52, %v4242_v39  ;;  %v4321_v29 = vld [vmem:[%s11995_s3 + $0x880] sm:$0xff]  ;;  %v4324_v60 = vld [vmem:[%s11995_s3 + $0x898] sm:$0xff]  ;;  %v4278_v35 = vld [vmem:[%s11995_s3 + $0x728] sm:$0xff] }
0x1342   :  { %7806 = vmatprep.subr.bf16.mxu0 %v7805_v21  ;;  %v4291_v21 = vld [vmem:[%s11995_s3 + $0x790] sm:$0xff]  ;;  %v7841_v39 = vpack.c.bf16 %v4324_v60, %v4321_v29  ;;  %v4329_v29 = vld [vmem:[%s11995_s3 + $0x8c0] sm:$0xff] }
0x1343   :  { %v7826_v59 = vpack.c.bf16 %v4294_v57, %v4291_v21  ;;  %v4287_v21 = vld [vmem:[%s11995_s3 + $0x770] sm:$0xff] }
0x1344   :  { %7712 = vmatpush1.bf16.msra.mxu1 %v7711_v31  ;;  %v7733_v31 = vpack.c.bf16 %v4251_v48, %v4248_v58  ;;  %v7757_v48 = vpack.c.bf16 %v4287_v21, %v4284_v56 }
0x1345   :  { %7808 = vmatpush3.bf16.msra.mxu0 %v7807_v1  ;;  %7714 = vmatprep.subr.bf16.mxu1 %v7713_v62  ;;  %v4247_v1 = vld [vmem:[%s11995_s3 + $0x630] sm:$0xff]  ;;  %v4250_v62 = vld [vmem:[%s11995_s3 + $0x648] sm:$0xff] }
0x1346   :  { %7810 = vmatprep.subr.bf16.mxu0 %v7809_v16  ;;  %v4257_v16 = vld [vmem:[%s11995_s3 + $0x680] sm:$0xff]  ;;  %v7735_v7 = vpack.c.bf16 %v4250_v62, %v4247_v1  ;;  %v4336_v1 = vld [vmem:[%s11995_s3 + $0x8f8] sm:$0xff]  ;;  %v4290_v62 = vld [vmem:[%s11995_s3 + $0x788] sm:$0xff] }
0x1347   :  { %v7737_v23 = vpack.c.bf16 %v4257_v16, %v4254_v40  ;;  %v7761_v16 = vpack.c.bf16 %v4293_v30, %v4290_v62  ;;  %v4389_v62 = vld [vmem:[%s11995_s3 + $0xa90] sm:$0xff]  ;;  %v4392_v30 = vld [vmem:[%s11995_s3 + $0xaa8] sm:$0xff] }
0x1348   :  { %7716 = vmatpush1.bf16.msra.mxu1 %v7715_v43  ;;  %v4303_v43 = vld [vmem:[%s11995_s3 + $0x7f0] sm:$0xff] }
0x1349   :  { %7812 = vmatpush3.bf16.msra.mxu0 %v7811_v3  ;;  %7718 = vmatprep.subr.bf16.mxu1 %v7717_v9  ;;  %v4306_v3 = vld [vmem:[%s11995_s3 + $0x808] sm:$0xff]  ;;  %v4260_v9 = vld [vmem:[%s11995_s3 + $0x698] sm:$0xff] }
0x134a   :  { %7814 = vmatprep.subr.bf16.mxu0 %v7813_v55  ;;  %v7832_v61 = vpack.c.bf16 %v4306_v3, %v4303_v43  ;;  %v7741_v55 = vpack.c.bf16 %v4263_v46, %v4260_v9  ;;  %v4295_v3 = vld [vmem:[%s11995_s3 + $0x7b0] sm:$0xff]  ;;  %v4298_v9 = vld [vmem:[%s11995_s3 + $0x7c8] sm:$0xff] }
0x134b   :  { %v4302_v46 = vld [vmem:[%s11995_s3 + $0x7e8] sm:$0xff] }
0x134c   :  { %7720 = vmatpush1.bf16.msra.mxu1 %v7719_v33  ;;  %v4269_v33 = vld [vmem:[%s11995_s3 + $0x6e0] sm:$0xff] }
0x134d   :  { %7816 = vmatpush3.bf16.msra.mxu0 %v7815_v0  ;;  %7722 = vmatprep.subr.bf16.mxu1 %v7721_v15  ;;  %v7743_v0 = vpack.c.bf16 %v4262_v42, %v4259_v50  ;;  %v7835_v15 = vpack.c.bf16 %v4312_v14, %v4309_v2  ;;  %v7745_v38 = vpack.c.bf16 %v4269_v33, %v4266_v8  ;;  %v4301_v50 = vld [vmem:[%s11995_s3 + $0x7e0] sm:$0xff]  ;;  %v4304_v42 = vld [vmem:[%s11995_s3 + $0x7f8] sm:$0xff]  ;;  %v4311_v2 = vld [vmem:[%s11995_s3 + $0x830] sm:$0xff] }
0x134e   :  { %7818 = vmatprep.subr.bf16.mxu0 %v7817_v25  ;;  %v4315_v25 = vld [vmem:[%s11995_s3 + $0x850] sm:$0xff]  ;;  %v7771_v14 = vpack.c.bf16 %v4304_v42, %v4301_v50  ;;  %v4407_v50 = vld [vmem:[%s11995_s3 + $0xb20] sm:$0xff]  ;;  %v4410_v42 = vld [vmem:[%s11995_s3 + $0xb38] sm:$0xff] }
0x134f   :  { %v7838_v36 = vpack.c.bf16 %v4318_v10, %v4315_v25  ;;  %v4307_v33 = vld [vmem:[%s11995_s3 + $0x810] sm:$0xff]  ;;  %v4313_v25 = vld [vmem:[%s11995_s3 + $0x840] sm:$0xff]  ;;  %v4316_v10 = vld [vmem:[%s11995_s3 + $0x858] sm:$0xff] }
0x1350   :  { %7724 = vmatpush1.bf16.msra.mxu1 %v7723_v63  ;;  %v7749_v63 = vpack.c.bf16 %v4275_v49, %v4272_v27  ;;  %v4320_v27 = vld [vmem:[%s11995_s3 + $0x878] sm:$0xff]  ;;  %v4323_v49 = vld [vmem:[%s11995_s3 + $0x890] sm:$0xff] }
0x1351   :  { %7820 = vmatpush3.bf16.msra.mxu0 %v7819_v26  ;;  %7726 = vmatprep.subr.bf16.mxu1 %v7725_v28  ;;  %v4271_v26 = vld [vmem:[%s11995_s3 + $0x6f0] sm:$0xff]  ;;  %v4274_v28 = vld [vmem:[%s11995_s3 + $0x708] sm:$0xff] }
0x1352   :  { %7822 = vmatprep.subr.bf16.mxu0 %v7821_v22  ;;  %v4281_v22 = vld [vmem:[%s11995_s3 + $0x740] sm:$0xff]  ;;  %v7751_v6 = vpack.c.bf16 %v4274_v28, %v4271_v26  ;;  %v4322_v26 = vld [vmem:[%s11995_s3 + $0x888] sm:$0xff] }
0x1353   :  { %v7753_v52 = vpack.c.bf16 %v4281_v22, %v4278_v35  ;;  %v4326_v28 = vld [vmem:[%s11995_s3 + $0x8a8] sm:$0xff]  ;;  %v4325_v22 = vld [vmem:[%s11995_s3 + $0x8a0] sm:$0xff] }
0x1354   :  { %7728 = vmatpush1.bf16.msra.mxu1 %v7727_v4  ;;  %v4277_v4 = vld [vmem:[%s11995_s3 + $0x720] sm:$0xff]  ;;  %v7785_v35 = vpack.c.bf16 %v4329_v29, %v4326_v28  ;;  %v4425_v29 = vld [vmem:[%s11995_s3 + $0xbb0] sm:$0xff] }
0x1355   :  { %7824 = vmatpush3.bf16.msra.mxu0 %v7823_v37  ;;  %7730 = vmatprep.subr.bf16.mxu1 %v7729_v53  ;;  %v4280_v37 = vld [vmem:[%s11995_s3 + $0x738] sm:$0xff]  ;;  %v4327_v53 = vld [vmem:[%s11995_s3 + $0x8b0] sm:$0xff] }
0x1356   :  { %7825 = vmatprep.subr.bf16.mxu0 %v8574_v11  ;;  %v7755_v57 = vpack.c.bf16 %v4280_v37, %v4277_v4  ;;  %v7844_v58 = vpack.c.bf16 %v4330_v12, %v4327_v53  ;;  %v4331_v53 = vld [vmem:[%s11995_s3 + $0x8d0] sm:$0xff]  ;;  %v4334_v12 = vld [vmem:[%s11995_s3 + $0x8e8] sm:$0xff] }
0x1357   :  { %v7791_v56 = vpack.c.bf16 %v4334_v12, %v4331_v53  ;;  %v4383_v53 = vld [vmem:[%s11995_s3 + $0xa60] sm:$0xff]  ;;  %v4386_v12 = vld [vmem:[%s11995_s3 + $0xa78] sm:$0xff] }
0x1358   :  { %4972 = vmatmul.mubr.f32.vlgmr.msra.gmra.mrb[48].mxu0 %v10001_v18  ;;  %7732 = vmatpush1.bf16.msra.mxu1 %v7731_v44  ;;  %v4283_v44 = vld [vmem:[%s11995_s3 + $0x750] sm:$0xff] }
0x1359   :  { %7827 = vmatpush3.bf16.msra.mxu0 %v7826_v59  ;;  %7734 = vmatprep.subr.bf16.mxu1 %v7733_v31  ;;  %v4286_v59 = vld [vmem:[%s11995_s3 + $0x768] sm:$0xff]  ;;  %v4333_v31 = vld [vmem:[%s11995_s3 + $0x8e0] sm:$0xff] }
0x135a   :  { %7828 = vmatprep.subr.bf16.mxu0 %v8574_v11  ;;  %7289 = vmatprep.mubr.msk.f32.mxu0 %vm8575_vm7, %v8573_v41  ;;  %v7759_v13 = vpack.c.bf16 %v4286_v59, %v4283_v44  ;;  %v7847_v40 = vpack.c.bf16 %v4336_v1, %v4333_v31 }
0x135c   :  { %7736 = vmatpush1.bf16.msra.mxu1 %v7735_v7  ;;  %v4289_v7 = vld [vmem:[%s11995_s3 + $0x780] sm:$0xff] }
0x135d   :  { %7830 = vmatpush3.bf16.msra.mxu0 %v7829_v34  ;;  %7738 = vmatprep.subr.bf16.mxu1 %v7737_v23  ;;  %v4292_v34 = vld [vmem:[%s11995_s3 + $0x798] sm:$0xff] }
0x135e   :  { %7831 = vmatprep.subr.bf16.mxu0 %v8574_v11  ;;  %v4296_v23 = vld [vmem:[%s11995_s3 + $0x7b8] sm:$0xff]  ;;  %v7763_v20 = vpack.c.bf16 %v4292_v34, %v4289_v7  ;;  %v4395_v7 = vld [vmem:[%s11995_s3 + $0xac0] sm:$0xff] }
0x135f   :  { %v7765_v43 = vpack.c.bf16 %v4299_v17, %v4296_v23  ;;  %v4398_v34 = vld [vmem:[%s11995_s3 + $0xad8] sm:$0xff]  ;;  %v4347_v17 = vld [vmem:[%s11995_s3 + $0x940] sm:$0xff] }
0x1360   :  { %7740 = vmatpush1.bf16.msra.mxu1 %v7739_v5  ;;  %v4305_v5 = vld [vmem:[%s11995_s3 + $0x800] sm:$0xff]  ;;  %v7956_v23 = vpack.c.bf16 %v4398_v34, %v4395_v7 }
0x1361   :  { %7833 = vmatpush3.bf16.msra.mxu0 %v7832_v61  ;;  %7742 = vmatprep.subr.bf16.mxu1 %v7741_v55  ;;  %v7767_v61 = vpack.c.bf16 %v4298_v9, %v4295_v3  ;;  %v7769_v55 = vpack.c.bf16 %v4305_v5, %v4302_v46  ;;  %v4401_v3 = vld [vmem:[%s11995_s3 + $0xaf0] sm:$0xff]  ;;  %v4404_v9 = vld [vmem:[%s11995_s3 + $0xb08] sm:$0xff] }
0x1362   :  { %7834 = vmatprep.subr.bf16.mxu0 %v8574_v11  ;;  %v7960_v46 = vpack.c.bf16 %v4404_v9, %v4401_v3  ;;  %v4353_v5 = vld [vmem:[%s11995_s3 + $0x970] sm:$0xff]  ;;  %v4343_v3 = vld [vmem:[%s11995_s3 + $0x920] sm:$0xff]  ;;  %v37_v9 = vld [vmem:[%s11993_s0 + $0x88] sm:$0x3] }
0x1364   :  { %7744 = vmatpush1.bf16.msra.mxu1 %v7743_v0  ;;  %v4310_v0 = vld [vmem:[%s11995_s3 + $0x828] sm:$0xff] }
0x1365   :  { %7836 = vmatpush3.bf16.msra.mxu0 %v7835_v15  ;;  %7746 = vmatprep.subr.bf16.mxu1 %v7745_v38  ;;  %v4314_v15 = vld [vmem:[%s11995_s3 + $0x848] sm:$0xff]  ;;  %v4317_v38 = vld [vmem:[%s11995_s3 + $0x860] sm:$0xff]  ;;  %v7775_v45 = vpack.c.bf16 %v4310_v0, %v4307_v33  ;;  %v4413_v33 = vld [vmem:[%s11995_s3 + $0xb50] sm:$0xff] }
0x1366   :  { %7837 = vmatprep.subr.bf16.mxu0 %v8574_v11  ;;  %v7777_v51 = vpack.c.bf16 %v4317_v38, %v4314_v15  ;;  %v4416_v0 = vld [vmem:[%s11995_s3 + $0xb68] sm:$0xff] }
0x1367   :  { %v7968_v38 = vpack.c.bf16 %v4416_v0, %v4413_v33  ;;  %v4352_v33 = vld [vmem:[%s11995_s3 + $0x968] sm:$0xff]  ;;  %v4355_v0 = vld [vmem:[%s11995_s3 + $0x980] sm:$0xff] }
0x1368   :  { %7748 = vmatpush1.bf16.msra.mxu1 %v7747_v19  ;;  %v7779_v19 = vpack.c.bf16 %v4316_v10, %v4313_v25  ;;  %v4365_v25 = vld [vmem:[%s11995_s3 + $0x9d0] sm:$0xff]  ;;  %v4368_v10 = vld [vmem:[%s11995_s3 + $0x9e8] sm:$0xff] }
0x1369   :  { %7839 = vmatpush3.bf16.msra.mxu0 %v7838_v36  ;;  %7750 = vmatprep.subr.bf16.mxu1 %v7749_v63  ;;  %v7781_v36 = vpack.c.bf16 %v4323_v49, %v4320_v27  ;;  %v4319_v63 = vld [vmem:[%s11995_s3 + $0x870] sm:$0xff]  ;;  %v7970_v27 = vpack.c.bf16 %v4368_v10, %v4365_v25  ;;  %v4419_v49 = vld [vmem:[%s11995_s3 + $0xb80] sm:$0xff]  ;;  %v4358_v25 = vld [vmem:[%s11995_s3 + $0x998] sm:$0xff] }
0x136a   :  { %7840 = vmatprep.subr.bf16.mxu0 %v8574_v11  ;;  %v7783_v60 = vpack.c.bf16 %v4322_v26, %v4319_v63  ;;  %v4371_v63 = vld [vmem:[%s11995_s3 + $0xa00] sm:$0xff]  ;;  %v4374_v26 = vld [vmem:[%s11995_s3 + $0xa18] sm:$0xff]  ;;  %v4361_v10 = vld [vmem:[%s11995_s3 + $0x9b0] sm:$0xff] }
0x136b   :  { %v7974_v28 = vpack.c.bf16 %v4374_v26, %v4371_v63  ;;  %v4364_v63 = vld [vmem:[%s11995_s3 + $0x9c8] sm:$0xff]  ;;  %v4367_v26 = vld [vmem:[%s11995_s3 + $0x9e0] sm:$0xff] }
0x136c   :  { %7752 = vmatpush1.bf16.msra.mxu1 %v7751_v6  ;;  %v4328_v6 = vld [vmem:[%s11995_s3 + $0x8b8] sm:$0xff] }
0x136d   :  { %7842 = vmatpush3.bf16.msra.mxu0 %v7841_v39  ;;  %7754 = vmatprep.subr.bf16.mxu1 %v7753_v52  ;;  %v4332_v39 = vld [vmem:[%s11995_s3 + $0x8d8] sm:$0xff]  ;;  %v4335_v52 = vld [vmem:[%s11995_s3 + $0x8f0] sm:$0xff]  ;;  %v7787_v4 = vpack.c.bf16 %v4328_v6, %v4325_v22  ;;  %v4380_v6 = vld [vmem:[%s11995_s3 + $0xa48] sm:$0xff] }
0x136e   :  { %7843 = vmatprep.subr.bf16.mxu0 %v8574_v11  ;;  %v7789_v37 = vpack.c.bf16 %v4335_v52, %v4332_v39  ;;  %v4377_v22 = vld [vmem:[%s11995_s3 + $0xa30] sm:$0xff]  ;;  %v4431_v52 = vld [vmem:[%s11995_s3 + $0xbe0] sm:$0xff] }
0x136f   :  { %v7978_v39 = vpack.c.bf16 %v4380_v6, %v4377_v22  ;;  %v4370_v22 = vld [vmem:[%s11995_s3 + $0x9f8] sm:$0xff]  ;;  %v4373_v6 = vld [vmem:[%s11995_s3 + $0xa10] sm:$0xff] }
0x1370   :  { %7756 = vmatpush1.bf16.msra.mxu1 %v7755_v57 }
0x1371   :  { %7845 = vmatpush3.bf16.msra.mxu0 %v7844_v58  ;;  %7758 = vmatprep.subr.bf16.mxu1 %v7757_v48 }
0x1372   :  { %7846 = vmatprep.subr.bf16.mxu0 %v8574_v11 }
0x1374   :  { %7760 = vmatpush1.bf16.msra.mxu1 %v7759_v13  ;;  %v4341_v13 = vld [vmem:[%s11995_s3 + $0x910] sm:$0xff] }
0x1375   :  { %7848 = vmatpush3.bf16.msra.mxu0 %v7847_v40  ;;  %7762 = vmatprep.subr.bf16.mxu1 %v7761_v16  ;;  %v4344_v40 = vld [vmem:[%s11995_s3 + $0x928] sm:$0xff] }
0x1376   :  { %v7954_v16 = vpack.c.bf16 %v4344_v40, %v4341_v13 }
0x1377   :  { %4830 = vmatmul.mubr.f32.vlgmr.msra.gmra.mrb[38].mxu1 %v10001_v18  ;;  %v4308_v18 = vld [vmem:[%s11995_s3 + $0x818] sm:$0xff] }
0x1378   :  { %7290 = vmatmul.mubr.f32.vlgmr.msra.gmra.mrb[50].mxu0 %v10173_v32  ;;  %7764 = vmatpush1.bf16.msra.mxu1 %v7763_v20  ;;  %v7773_v8 = vpack.c.bf16 %v4311_v2, %v4308_v18  ;;  %v4350_v20 = vld [vmem:[%s11995_s3 + $0x958] sm:$0xff]  ;;  %v7964_v18 = vpack.c.bf16 %v4410_v42, %v4407_v50  ;;  %v4359_v2 = vld [vmem:[%s11995_s3 + $0x9a0] sm:$0xff]  ;;  %v4349_v42 = vld [vmem:[%s11995_s3 + $0x950] sm:$0xff] }
0x1379   :  { %7766 = vmatprep.subr.bf16.mxu1 %v7765_v43  ;;  %4900 = vmatprep.mubr.f32.mxu1 %v8573_v41  ;;  %v7958_v43 = vpack.c.bf16 %v4350_v20, %v4347_v17  ;;  %v4346_v50 = vld [vmem:[%s11995_s3 + $0x938] sm:$0xff] }
0x137a   :  { %5140 = vmatprep.mubr.f32.mxu0 %v8573_v41 }
0x137c   :  { %7768 = vmatpush1.bf16.msra.mxu1 %v7767_v61  ;;  %v4356_v61 = vld [vmem:[%s11995_s3 + $0x988] sm:$0xff] }
0x137d   :  { %7770 = vmatprep.subr.bf16.mxu1 %v7769_v55  ;;  %v7962_v55 = vpack.c.bf16 %v4356_v61, %v4353_v5  ;;  %v4339_v5 = vld [vmem:[%s11995_s3 + $0x900] sm:$0xff]  ;;  %v4342_v61 = vld [vmem:[%s11995_s3 + $0x918] sm:$0xff] }
0x1380   :  { %7772 = vmatpush1.bf16.msra.mxu1 %v7771_v14  ;;  %v4362_v14 = vld [vmem:[%s11995_s3 + $0x9b8] sm:$0xff] }
0x1381   :  { %7774 = vmatprep.subr.bf16.mxu1 %v7773_v8  ;;  %v7966_v8 = vpack.c.bf16 %v4362_v14, %v4359_v2  ;;  %v7860_v2 = vpack.c.bf16 %v4349_v42, %v4346_v50  ;;  %v4345_v14 = vld [vmem:[%s11995_s3 + $0x930] sm:$0xff]  ;;  %v4399_v42 = vld [vmem:[%s11995_s3 + $0xae0] sm:$0xff] }
0x1384   :  { %7776 = vmatpush1.bf16.msra.mxu1 %v7775_v45 }
0x1385   :  { %7778 = vmatprep.subr.bf16.mxu1 %v7777_v51 }
0x1388   :  { %7780 = vmatpush1.bf16.msra.mxu1 %v7779_v19  ;;  %v4422_v19 = vld [vmem:[%s11995_s3 + $0xb98] sm:$0xff] }
0x1389   :  { %7782 = vmatprep.subr.bf16.mxu1 %v7781_v36  ;;  %v7972_v36 = vpack.c.bf16 %v4422_v19, %v4419_v49  ;;  %v7868_v49 = vpack.c.bf16 %v4361_v10, %v4358_v25  ;;  %v4357_v19 = vld [vmem:[%s11995_s3 + $0x990] sm:$0xff]  ;;  %v4411_v10 = vld [vmem:[%s11995_s3 + $0xb40] sm:$0xff] }
0x138c   :  { %7784 = vmatpush1.bf16.msra.mxu1 %v7783_v60  ;;  %v4428_v60 = vld [vmem:[%s11995_s3 + $0xbc8] sm:$0xff] }
0x138d   :  { %7786 = vmatprep.subr.bf16.mxu1 %v7785_v35  ;;  %v7976_v35 = vpack.c.bf16 %v4428_v60, %v4425_v29  ;;  %v7872_v29 = vpack.c.bf16 %v4367_v26, %v4364_v63  ;;  %v4363_v60 = vld [vmem:[%s11995_s3 + $0x9c0] sm:$0xff]  ;;  %v4417_v26 = vld [vmem:[%s11995_s3 + $0xb70] sm:$0xff] }
0x1390   :  { %7788 = vmatpush1.bf16.msra.mxu1 %v7787_v4  ;;  %v4434_v4 = vld [vmem:[%s11995_s3 + $0xbf8] sm:$0xff] }
0x1391   :  { %7790 = vmatprep.subr.bf16.mxu1 %v7789_v37  ;;  %v7980_v37 = vpack.c.bf16 %v4434_v4, %v4431_v52  ;;  %v7876_v52 = vpack.c.bf16 %v4373_v6, %v4370_v22  ;;  %v4369_v4 = vld [vmem:[%s11995_s3 + $0x9f0] sm:$0xff]  ;;  %v4423_v6 = vld [vmem:[%s11995_s3 + $0xba0] sm:$0xff] }
0x1394   :  { %7792 = vmatpush1.bf16.msra.mxu1 %v7791_v56  ;;  %v7982_v56 = vpack.c.bf16 %v4386_v12, %v4383_v53  ;;  %v4376_v53 = vld [vmem:[%s11995_s3 + $0xa28] sm:$0xff]  ;;  %v4379_v12 = vld [vmem:[%s11995_s3 + $0xa40] sm:$0xff] }
0x1397   :  { %4901 = vmatmul.mubr.f32.vlgmr.msra.gmra.mrb[38].mxu1 %v10173_v32  ;;  %v7952_v32 = vpack.c.bf16 %v4392_v30, %v4389_v62 }
0x1399   :  { %7953 = vmatprep.subr.bf16.mxu1 %v7952_v32 }
0x139a   :  { %7955 = vmatpush3.bf16.msra.mxu1 %v7954_v16 }
0x139b   :  { %7957 = vmatprep.subr.bf16.mxu1 %v7956_v23 }
0x139e   :  { %7959 = vmatpush3.bf16.msra.mxu1 %v7958_v43 }
0x139f   :  { %7961 = vmatprep.subr.bf16.mxu1 %v7960_v46 }
0x13a2   :  { %7963 = vmatpush3.bf16.msra.mxu1 %v7962_v55 }
0x13a3   :  { %7965 = vmatprep.subr.bf16.mxu1 %v7964_v18  ;;  %v7858_v18 = vpack.c.bf16 %v4342_v61, %v4339_v5  ;;  %v4400_v5 = vld [vmem:[%s11995_s3 + $0xae8] sm:$0xff]  ;;  %v4403_v61 = vld [vmem:[%s11995_s3 + $0xb00] sm:$0xff] }
0x13a4   :  { %v7896_v50 = vpack.c.bf16 %v4403_v61, %v4400_v5 }
0x13a6   :  { %7967 = vmatpush3.bf16.msra.mxu1 %v7966_v8  ;;  %v4348_v8 = vld [vmem:[%s11995_s3 + $0x948] sm:$0xff] }
0x13a7   :  { %7969 = vmatprep.subr.bf16.mxu1 %v7968_v38  ;;  %v7864_v38 = vpack.c.bf16 %v4355_v0, %v4352_v33  ;;  %v4405_v0 = vld [vmem:[%s11995_s3 + $0xb10] sm:$0xff] }
0x13aa   :  { %7971 = vmatpush3.bf16.msra.mxu1 %v7970_v27 }
0x13ab   :  { %7973 = vmatprep.subr.bf16.mxu1 %v7972_v36  ;;  %v4360_v36 = vld [vmem:[%s11995_s3 + $0x9a8] sm:$0xff] }
0x13ae   :  { %7975 = vmatpush3.bf16.msra.mxu1 %v7974_v28  ;;  %v7870_v28 = vpack.c.bf16 %v4360_v36, %v4357_v19  ;;  %v4421_v19 = vld [vmem:[%s11995_s3 + $0xb90] sm:$0xff] }
0x13af   :  { %7977 = vmatprep.subr.bf16.mxu1 %v7976_v35  ;;  %v4366_v35 = vld [vmem:[%s11995_s3 + $0x9d8] sm:$0xff] }
0x13b2   :  { %7979 = vmatpush3.bf16.msra.mxu1 %v7978_v39  ;;  %v7874_v39 = vpack.c.bf16 %v4366_v35, %v4363_v60  ;;  %v4427_v60 = vld [vmem:[%s11995_s3 + $0xbc0] sm:$0xff] }
0x13b3   :  { %7981 = vmatprep.subr.bf16.mxu1 %v7980_v37  ;;  %v4372_v37 = vld [vmem:[%s11995_s3 + $0xa08] sm:$0xff] }
0x13b6   :  { %7983 = vmatpush3.bf16.msra.mxu1 %v7982_v56  ;;  %v7878_v56 = vpack.c.bf16 %v4372_v37, %v4369_v4  ;;  %v4433_v4 = vld [vmem:[%s11995_s3 + $0xbf0] sm:$0xff] }
0x13b7   :  { %7984 = vmatprep.subr.bf16.mxu1 %v8574_v11 }
0x13ea   :  { %v6733_v21 = vpop.f32.mrb[34].mxu1 }
0x13eb   :  { %v6734_v57 = vpop.f32.mrb[35].mxu1 }
0x13ec   :  { %v6735_v58 = vadd.f32 %v6734_v57, %v6733_v21 }
0x140a   :  { %v10591_v48 = vpop.f32.mrb[46].mxu0  ;;  %v4761_v44 = vpop.f32.mrb[36].mxu1 }
0x140b   :  { %v10593_v59 = vadd.f32 %v6735_v58, %v4761_v44  ;;  %v10595_v31 = vpop.f32.mrb[47].mxu0  ;;  %v7256_v1 = vpop.f32.mrb[37].mxu1 }
0x140c   :  { %v6538_v1 = vld [vmem:[%s11995_s3 + $0xd80] ss:$8 sm:$0x7] }
0x140d   :  { %v5054_v62 = vrot.slane %v6538_v1, %v8885_v54  ;;  %v5058_v32 = vrot.slane %v6538_v1, %v8882_v47  ;;  %v5062_v13 = vrot.slane %v6538_v1, %v8888_v24  ;;  %v4385_v1 = vld [vmem:[%s11995_s3 + $0xa70] sm:$0xff] }
0x142b   :  { %v6785_v15 = vpop.f32.mrb[48].mxu0 }
0x142c   :  { %v6786_v45 = vpop.f32.mrb[49].mxu0 }
0x142d   :  { %v6787_v51 = vadd.f32 %v6786_v45, %v6785_v15  ;;  %v7862_v15 = vpack.c.bf16 %v4348_v8, %v4345_v14  ;;  %v4351_v45 = vld [vmem:[%s11995_s3 + $0x960] sm:$0xff]  ;;  %v4409_v14 = vld [vmem:[%s11995_s3 + $0xb30] sm:$0xff] }
0x144b   :  { %v5043_v21 = vpop.f32.mrb[50].mxu0 }
0x144c   :  { %v5044_v57 = vadd.f32 %v6787_v51, %v5043_v21  ;;  %v7291_v58 = vpop.f32.mrb[51].mxu0  ;;  %v4354_v51 = vld [vmem:[%s11995_s3 + $0x978] sm:$0xff]  ;;  %v7880_v21 = vpack.c.bf16 %v4379_v12, %v4376_v53  ;;  %v4429_v12 = vld [vmem:[%s11995_s3 + $0xbd0] sm:$0xff] }
0x144d   :  { %v7866_v27 = vpack.c.bf16 %v4354_v51, %v4351_v45  ;;  %v4378_v58 = vld [vmem:[%s11995_s3 + $0xa38] sm:$0xff]  ;;  %v4415_v45 = vld [vmem:[%s11995_s3 + $0xb60] sm:$0xff] }
0x144e   :  { %v5049_v44 = vmax.f32 %v10593_v59, %v5044_v57  ;;  %v4375_v57 = vld [vmem:[%s11995_s3 + $0xa20] sm:$0xff] }
0x1450   :  { %v10707_v59 = vadd.f32 %v5062_v13, %v5049_v44  ;;  %v4382_v44 = vld [vmem:[%s11995_s3 + $0xa58] sm:$0xff]  ;;  %v4384_v13 = vld [vmem:[%s11995_s3 + $0xa68] sm:$0xff] }
0x1452   :  { %v5071_v24 = vmul.f32 %v10707_v59, %v10707_v59 }
0x1454   :  { %v7854_v55 = vpack.c.bf16 %v5071_v24, %v10707_v59  ;;  %v4394_v24 = vld [vmem:[%s11995_s3 + $0xab8] sm:$0xff] }
0x146a   :  { %v4902_v30 = vpop.f32.mrb[38].mxu1 }
0x146b   :  { %v5047_v40 = vmax.f32 %v10591_v48, %v4902_v30  ;;  %v4904_v16 = vpop.f32.mrb[39].mxu1  ;;  %v7884_v30 = vpack.c.bf16 %v4385_v1, %v4382_v44  ;;  %v4435_v1 = vld [vmem:[%s11995_s3 + $0xc00] sm:$0xff] }
0x146c   :  { %v5048_v7 = vmax.f32 %v10595_v31, %v4904_v16  ;;  %v4340_v31 = vld [vmem:[%s11995_s3 + $0x908] sm:$0xff]  ;;  %v4391_v16 = vld [vmem:[%s11995_s3 + $0xaa0] sm:$0xff] }
0x146d   :  { %v10703_v34 = vadd.f32 %v5054_v62, %v5047_v40  ;;  %v7856_v46 = vpack.c.bf16 %v4343_v3, %v4340_v31  ;;  %v7882_v62 = vpack.c.bf16 %v4378_v58, %v4375_v57  ;;  %v4388_v40 = vld [vmem:[%s11995_s3 + $0xa88] sm:$0xff]  ;;  %v4439_v58 = vld [vmem:[%s11995_s3 + $0xc20] sm:$0xff] }
0x146e   :  { %v10705_v23 = vadd.f32 %v5058_v32, %v5048_v7  ;;  %v4381_v32 = vld [vmem:[%s11995_s3 + $0xa50] sm:$0xff]  ;;  %v4436_v57 = vld [vmem:[%s11995_s3 + $0xc08] sm:$0xff] }
0x146f   :  { %v5069_v17 = vmul.f32 %v10703_v34, %v10703_v34  ;;  %v7886_v7 = vpack.c.bf16 %v4384_v13, %v4381_v32  ;;  %v7920_v44 = vpack.c.bf16 %v4439_v58, %v4436_v57  ;;  %v4440_v32 = vld [vmem:[%s11995_s3 + $0xc28] sm:$0xff]  ;;  %v4442_v13 = vld [vmem:[%s11995_s3 + $0xc38] sm:$0xff]  ;;  %v4475_v57 = vld [vmem:[%s11995_s3 + $0xd40] sm:$0xff] }
0x1470   :  { %v5070_v20 = vmul.f32 %v10705_v23, %v10705_v23 }
0x1471   :  { %v7851_v48 = vpack.c.bf16 %v5069_v17, %v10703_v34  ;;  %v7888_v17 = vpack.c.bf16 %v4391_v16, %v4388_v40  ;;  %v4445_v40 = vld [vmem:[%s11995_s3 + $0xc50] sm:$0xff] }
0x1472   :  { %v7849_v43 = vpack.c.bf16 %v5070_v20, %v10705_v23  ;;  %v4387_v20 = vld [vmem:[%s11995_s3 + $0xa80] sm:$0xff] }
0x1474   :  { %7850 = vmatprep.subr.bf16.mxu0 %v7849_v43  ;;  %v4390_v43 = vld [vmem:[%s11995_s3 + $0xa98] sm:$0xff] }
0x1475   :  { %7852 = vmatpush1.bf16.msra.mxu0 %v7851_v48  ;;  %v4397_v48 = vld [vmem:[%s11995_s3 + $0xad0] sm:$0xff]  ;;  %v7890_v31 = vpack.c.bf16 %v4390_v43, %v4387_v20 }
0x1476   :  { %7853 = vmatprep.subr.bf16.mxu0 %v8574_v11  ;;  %v7892_v3 = vpack.c.bf16 %v4397_v48, %v4394_v24  ;;  %v4441_v20 = vld [vmem:[%s11995_s3 + $0xc30] sm:$0xff]  ;;  %v7924_v24 = vpack.c.bf16 %v4445_v40, %v4442_v13  ;;  %v4444_v48 = vld [vmem:[%s11995_s3 + $0xc48] sm:$0xff]  ;;  %v4478_v40 = vld [vmem:[%s11995_s3 + $0xd58] sm:$0xff] }
0x1477   :  { %v7926_v5 = vpack.c.bf16 %v4444_v48, %v4441_v20  ;;  %v4476_v13 = vld [vmem:[%s11995_s3 + $0xd48] sm:$0xff]  ;;  %v4477_v20 = vld [vmem:[%s11995_s3 + $0xd50] sm:$0xff]  ;;  %v4479_v48 = vld [vmem:[%s11995_s3 + $0xd60] sm:$0xff] }
0x1478   :  { %6539 = vmatmul.mubr.msk.f32.vlgmr.msra.gmra.mrb[52].mxu0 %vm5072_vm10, %v37_v9 }
0x1479   :  { %7855 = vmatpush3.bf16.msra.mxu0 %v7854_v55  ;;  %7296 = vmatprep.mubr.msk.f32.mxu0 %vm8575_vm7, %v8573_v41 }
0x147a   :  { %7857 = vmatprep.subr.bf16.mxu0 %v7856_v46  ;;  %v4396_v46 = vld [vmem:[%s11995_s3 + $0xac8] sm:$0xff] }
0x147c   :  { %7297 = vmatmul.mubr.msk.f32.vlgmr.msra.gmra.mrb[54].mxu0 %vm5072_vm10, %v37_v9  ;;  %v4393_v9 = vld [vmem:[%s11995_s3 + $0xab0] sm:$0xff] }
0x147d   :  { %7859 = vmatpush1.bf16.msra.mxu0 %v7858_v18  ;;  %v7894_v55 = vpack.c.bf16 %v4396_v46, %v4393_v9  ;;  %v4402_v18 = vld [vmem:[%s11995_s3 + $0xaf8] sm:$0xff]  ;;  %v4448_v9 = vld [vmem:[%s11995_s3 + $0xc68] sm:$0xff]  ;;  %v4451_v46 = vld [vmem:[%s11995_s3 + $0xc80] sm:$0xff] }
0x147e   :  { %7861 = vmatprep.subr.bf16.mxu0 %v7860_v2  ;;  %v4406_v2 = vld [vmem:[%s11995_s3 + $0xb18] sm:$0xff]  ;;  %v7898_v8 = vpack.c.bf16 %v4402_v18, %v4399_v42  ;;  %v7928_v42 = vpack.c.bf16 %v4451_v46, %v4448_v9  ;;  %v5653_v46 = vld [vmem:[%s11996_s4 + $0x308] sm:$0xff] }
0x147f   :  { %v7900_v33 = vpack.c.bf16 %v4409_v14, %v4406_v2  ;;  %v4450_v18 = vld [vmem:[%s11995_s3 + $0xc78] sm:$0xff]  ;;  %v4449_v2 = vld [vmem:[%s11995_s3 + $0xc70] sm:$0xff]  ;;  %v4452_v14 = vld [vmem:[%s11995_s3 + $0xc88] sm:$0xff] }
0x1480   :  { %v5559_v9 = vld [vmem:[%s11996_s4 + $0x18] sm:$0xff] }
0x1481   :  { %7863 = vmatpush1.bf16.msra.mxu0 %v7862_v15  ;;  %v4408_v15 = vld [vmem:[%s11995_s3 + $0xb28] sm:$0xff] }
0x1482   :  { %7865 = vmatprep.subr.bf16.mxu0 %v7864_v38  ;;  %v4412_v38 = vld [vmem:[%s11995_s3 + $0xb48] sm:$0xff]  ;;  %v7902_v51 = vpack.c.bf16 %v4408_v15, %v4405_v0  ;;  %v4457_v0 = vld [vmem:[%s11995_s3 + $0xcb0] sm:$0xff] }
0x1483   :  { %v7904_v25 = vpack.c.bf16 %v4415_v45, %v4412_v38  ;;  %v7991_v38 = vpack.c.bf16 %v4452_v14, %v4449_v2  ;;  %v4453_v45 = vld [vmem:[%s11995_s3 + $0xc90] sm:$0xff] }
0x1485   :  { %7867 = vmatpush1.bf16.msra.mxu0 %v7866_v27  ;;  %v4414_v27 = vld [vmem:[%s11995_s3 + $0xb58] sm:$0xff] }
0x1486   :  { %7869 = vmatprep.subr.bf16.mxu0 %v7868_v49  ;;  %v4418_v49 = vld [vmem:[%s11995_s3 + $0xb78] sm:$0xff]  ;;  %v7906_v36 = vpack.c.bf16 %v4414_v27, %v4411_v10  ;;  %v4455_v10 = vld [vmem:[%s11995_s3 + $0xca0] sm:$0xff] }
0x1487   :  { %v7908_v63 = vpack.c.bf16 %v4421_v19, %v4418_v49  ;;  %v4458_v27 = vld [vmem:[%s11995_s3 + $0xcb8] sm:$0xff]  ;;  %v4460_v49 = vld [vmem:[%s11995_s3 + $0xcc8] sm:$0xff]  ;;  %v4463_v19 = vld [vmem:[%s11995_s3 + $0xce0] sm:$0xff] }
0x1489   :  { %7871 = vmatpush1.bf16.msra.mxu0 %v7870_v28  ;;  %v4420_v28 = vld [vmem:[%s11995_s3 + $0xb88] sm:$0xff] }
0x148a   :  { %7873 = vmatprep.subr.bf16.mxu0 %v7872_v29  ;;  %v4424_v29 = vld [vmem:[%s11995_s3 + $0xba8] sm:$0xff]  ;;  %v7910_v35 = vpack.c.bf16 %v4420_v28, %v4417_v26  ;;  %v4459_v26 = vld [vmem:[%s11995_s3 + $0xcc0] sm:$0xff]  ;;  %v7936_v28 = vpack.c.bf16 %v4463_v19, %v4460_v49  ;;  %v5562_v19 = vld [vmem:[%s11996_s4 + $0x30] sm:$0xff] }
0x148b   :  { %v7912_v22 = vpack.c.bf16 %v4427_v60, %v4424_v29  ;;  %v4462_v29 = vld [vmem:[%s11995_s3 + $0xcd8] sm:$0xff]  ;;  %v4461_v60 = vld [vmem:[%s11995_s3 + $0xcd0] sm:$0xff]  ;;  %v5560_v49 = vld [vmem:[%s11996_s4 + $0x20] sm:$0xff] }
0x148d   :  { %7875 = vmatpush1.bf16.msra.mxu0 %v7874_v39  ;;  %v4426_v39 = vld [vmem:[%s11995_s3 + $0xbb8] sm:$0xff] }
0x148e   :  { %7877 = vmatprep.subr.bf16.mxu0 %v7876_v52  ;;  %v4430_v52 = vld [vmem:[%s11995_s3 + $0xbd8] sm:$0xff]  ;;  %v7914_v37 = vpack.c.bf16 %v4426_v39, %v4423_v6  ;;  %v4469_v6 = vld [vmem:[%s11995_s3 + $0xd10] sm:$0xff]  ;;  %v7938_v39 = vpack.c.bf16 %v4462_v29, %v4459_v26 }
0x148f   :  { %v7916_v53 = vpack.c.bf16 %v4433_v4, %v4430_v52  ;;  %v4465_v4 = vld [vmem:[%s11995_s3 + $0xcf0] sm:$0xff]  ;;  %v5567_v29 = vld [vmem:[%s11996_s4 + $0x58] sm:$0xff] }
0x1491   :  { %7879 = vmatpush1.bf16.msra.mxu0 %v7878_v56  ;;  %v4432_v56 = vld [vmem:[%s11995_s3 + $0xbe8] sm:$0xff] }
0x1492   :  { %7881 = vmatprep.subr.bf16.mxu0 %v7880_v21  ;;  %v7918_v21 = vpack.c.bf16 %v4432_v56, %v4429_v12  ;;  %v4467_v12 = vld [vmem:[%s11995_s3 + $0xd00] sm:$0xff]  ;;  %v4470_v56 = vld [vmem:[%s11995_s3 + $0xd18] sm:$0xff] }
0x1495   :  { %7883 = vmatpush1.bf16.msra.mxu0 %v7882_v62  ;;  %v4438_v62 = vld [vmem:[%s11995_s3 + $0xc18] sm:$0xff] }
0x1496   :  { %7885 = vmatprep.subr.bf16.mxu0 %v7884_v30  ;;  %v4437_v30 = vld [vmem:[%s11995_s3 + $0xc10] sm:$0xff] }
0x1499   :  { %7887 = vmatpush1.bf16.msra.mxu0 %v7886_v7  ;;  %v7922_v7 = vpack.c.bf16 %v4438_v62, %v4435_v1  ;;  %v4471_v1 = vld [vmem:[%s11995_s3 + $0xd20] sm:$0xff] }
0x149a   :  { %7889 = vmatprep.subr.bf16.mxu0 %v7888_v17  ;;  %v7985_v17 = vpack.c.bf16 %v4440_v32, %v4437_v30  ;;  %v4474_v30 = vld [vmem:[%s11995_s3 + $0xd38] sm:$0xff]  ;;  %v4473_v32 = vld [vmem:[%s11995_s3 + $0xd30] sm:$0xff] }
0x149d   :  { %7891 = vmatpush1.bf16.msra.mxu0 %v7890_v31  ;;  %v4443_v31 = vld [vmem:[%s11995_s3 + $0xc40] sm:$0xff] }
0x149e   :  { %7893 = vmatprep.subr.bf16.mxu0 %v7892_v3  ;;  %v4446_v3 = vld [vmem:[%s11995_s3 + $0xc58] sm:$0xff] }
0x149f   :  { %v7988_v61 = vpack.c.bf16 %v4446_v3, %v4443_v31  ;;  %v4482_v31 = vld [vmem:[%s11995_s3 + $0xd78] sm:$0xff]  ;;  %v5557_v3 = vld [vmem:[%s11996_s4 + $0x8] sm:$0xff] }
0x14a0   :  { %v8008_v2 = vpack.c.bf16 %v5559_v9, %v5557_v3  ;;  %v5574_v3 = vld [vmem:[%s11996_s4 + $0x90] sm:$0xff]  ;;  %v5668_v9 = vld [vmem:[%s11996_s4 + $0x380] sm:$0xff] }
0x14a1   :  { %7895 = vmatpush1.bf16.msra.mxu0 %v7894_v55  ;;  %v4447_v55 = vld [vmem:[%s11995_s3 + $0xc60] sm:$0xff] }
0x14a2   :  { %7897 = vmatprep.subr.bf16.mxu0 %v7896_v50  ;;  %v7930_v15 = vpack.c.bf16 %v4450_v18, %v4447_v55  ;;  %v8006_v55 = vpack.c.bf16 %v4482_v31, %v4479_v48  ;;  %v5558_v18 = vld [vmem:[%s11996_s4 + $0x10] sm:$0xff]  ;;  %v5572_v48 = vld [vmem:[%s11996_s4 + $0x80] sm:$0xff] }
0x14a5   :  { %7899 = vmatpush1.bf16.msra.mxu0 %v7898_v8 }
0x14a6   :  { %7901 = vmatprep.subr.bf16.mxu0 %v7900_v33  ;;  %v4454_v33 = vld [vmem:[%s11995_s3 + $0xc98] sm:$0xff] }
0x14a9   :  { %7903 = vmatpush1.bf16.msra.mxu0 %v7902_v51  ;;  %v7932_v51 = vpack.c.bf16 %v4457_v0, %v4454_v33  ;;  %v5654_v33 = vld [vmem:[%s11996_s4 + $0x310] sm:$0xff]  ;;  %v5561_v0 = vld [vmem:[%s11996_s4 + $0x28] sm:$0xff] }
0x14aa   :  { %7905 = vmatprep.subr.bf16.mxu0 %v7904_v25  ;;  %v4456_v25 = vld [vmem:[%s11995_s3 + $0xca8] sm:$0xff] }
0x14ad   :  { %7907 = vmatpush1.bf16.msra.mxu0 %v7906_v36  ;;  %v7934_v36 = vpack.c.bf16 %v4456_v25, %v4453_v45  ;;  %v5659_v45 = vld [vmem:[%s11996_s4 + $0x338] sm:$0xff] }
0x14ae   :  { %7909 = vmatprep.subr.bf16.mxu0 %v7908_v63  ;;  %v7994_v63 = vpack.c.bf16 %v4458_v27, %v4455_v10 }
0x14b1   :  { %7911 = vmatpush1.bf16.msra.mxu0 %v7910_v35  ;;  %v4464_v35 = vld [vmem:[%s11995_s3 + $0xce8] sm:$0xff] }
0x14b2   :  { %7913 = vmatprep.subr.bf16.mxu0 %v7912_v22  ;;  %v4466_v22 = vld [vmem:[%s11995_s3 + $0xcf8] sm:$0xff]  ;;  %v7997_v52 = vpack.c.bf16 %v4464_v35, %v4461_v60  ;;  %v5661_v60 = vld [vmem:[%s11996_s4 + $0x348] sm:$0xff] }
0x14b5   :  { %7915 = vmatpush1.bf16.msra.mxu0 %v7914_v37  ;;  %v7940_v37 = vpack.c.bf16 %v4469_v6, %v4466_v22  ;;  %v5663_v22 = vld [vmem:[%s11996_s4 + $0x358] sm:$0xff]  ;;  %v5564_v6 = vld [vmem:[%s11996_s4 + $0x40] sm:$0xff] }
0x14b6   :  { %7917 = vmatprep.subr.bf16.mxu0 %v7916_v53  ;;  %v4468_v53 = vld [vmem:[%s11995_s3 + $0xd08] sm:$0xff] }
0x14b7   :  { %v7942_v58 = vpack.c.bf16 %v4468_v53, %v4465_v4  ;;  %v5662_v53 = vld [vmem:[%s11996_s4 + $0x350] sm:$0xff] }
0x14b9   :  { %7919 = vmatpush1.bf16.msra.mxu0 %v7918_v21  ;;  %v4472_v21 = vld [vmem:[%s11995_s3 + $0xd28] sm:$0xff] }
0x14ba   :  { %7921 = vmatprep.subr.bf16.mxu0 %v7920_v44  ;;  %v8000_v44 = vpack.c.bf16 %v4470_v56, %v4467_v12  ;;  %v7944_v62 = vpack.c.bf16 %v4475_v57, %v4472_v21  ;;  %v5569_v12 = vld [vmem:[%s11996_s4 + $0x68] sm:$0xff]  ;;  %v5571_v21 = vld [vmem:[%s11996_s4 + $0x78] sm:$0xff] }
0x14bb   :  { %v5665_v57 = vld [vmem:[%s11996_s4 + $0x368] sm:$0xff] }
0x154b   :  { %v5142_v16 = vpop.f32.mrb[52].mxu0 }
0x154c   :  { %v5144_v43 = vpop.f32.mrb[53].mxu0 }
0x154d   :  { %5281 = vmatprep.mubr.f32.mxu0 %v5144_v43  ;;  %5423 = vmatprep.mubr.f32.mxu1 %v5144_v43  ;;  %v4480_v43 = vld [vmem:[%s11995_s3 + $0xd68] sm:$0xff] }
0x154e   :  { %5282 = vmatmul.mubr.f32.vlgmr.msra.gmra.mrb[56].mxu0 %v5142_v16  ;;  %5424 = vmatmul.mubr.f32.vlgmr.msra.gmra.mrb[40].mxu1 %v5142_v16  ;;  %v4481_v16 = vld [vmem:[%s11995_s3 + $0xd70] sm:$0xff] }
0x154f   :  { %7923 = vmatpush1.bf16.msra.mxu0 %v7922_v7  ;;  %7986 = vmatpush3.bf16.msra.mxu1 %v7985_v17  ;;  %v10963_v50 = vpop.f32.mrb[54].mxu0  ;;  %v7946_v7 = vpack.c.bf16 %v4474_v30, %v4471_v1  ;;  %v8003_v17 = vpack.c.bf16 %v4476_v13, %v4473_v32  ;;  %v5570_v30 = vld [vmem:[%s11996_s4 + $0x70] sm:$0xff]  ;;  %v5664_v32 = vld [vmem:[%s11996_s4 + $0x360] sm:$0xff] }
0x1550   :  { %7925 = vmatprep.subr.bf16.mxu0 %v7924_v24  ;;  %7987 = vmatprep.subr.bf16.mxu1 %v8574_v11  ;;  %v7298_v8 = vpop.f32.mrb[55].mxu0  ;;  %v7948_v24 = vpack.c.bf16 %v4481_v16, %v4478_v40  ;;  %v5666_v40 = vld [vmem:[%s11996_s4 + $0x370] sm:$0xff]  ;;  %v5573_v16 = vld [vmem:[%s11996_s4 + $0x88] sm:$0xff] }
0x1551   :  { %5352 = vmatprep.mubr.f32.mxu0 %v8573_v41  ;;  %7331 = vmatprep.mubr.msk.f32.mxu1 %vm8575_vm7, %v8573_v41  ;;  %v5652_v8 = vld [vmem:[%s11996_s4 + $0x300] sm:$0xff] }
0x1552   :  { %v8106_v25 = vpack.c.bf16 %v5654_v33, %v5652_v8  ;;  %v5576_v8 = vld [vmem:[%s11996_s4 + $0xa0] sm:$0xff]  ;;  %v5578_v33 = vld [vmem:[%s11996_s4 + $0xb0] sm:$0xff] }
0x1553   :  { %7927 = vmatpush1.bf16.msra.mxu0 %v7926_v5  ;;  %7989 = vmatpush3.bf16.msra.mxu1 %v7988_v61  ;;  %v5655_v5 = vld [vmem:[%s11996_s4 + $0x318] sm:$0xff]  ;;  %v7950_v61 = vpack.c.bf16 %v4480_v43, %v4477_v20  ;;  %v5669_v43 = vld [vmem:[%s11996_s4 + $0x388] sm:$0xff] }
0x1554   :  { %7929 = vmatprep.subr.bf16.mxu0 %v7928_v42  ;;  %7990 = vmatprep.subr.bf16.mxu1 %v8574_v11  ;;  %v5556_v42 = vld [vmem:[%s11996_s4] sm:$0xff]  ;;  %v8104_v14 = vpack.c.bf16 %v5655_v5, %v5653_v46  ;;  %v5670_v46 = vld [vmem:[%s11996_s4 + $0x390] sm:$0xff]  ;;  %v8026_v5 = vpack.c.bf16 %v5574_v3, %v5572_v48  ;;  %v5689_v48 = vld [vmem:[%s11996_s4 + $0x428] sm:$0xff] }
0x1555   :  { %v5691_v3 = vld [vmem:[%s11996_s4 + $0x438] sm:$0xff] }
0x1557   :  { %7931 = vmatpush1.bf16.msra.mxu0 %v7930_v15  ;;  %7992 = vmatpush3.bf16.msra.mxu1 %v7991_v38  ;;  %v5563_v15 = vld [vmem:[%s11996_s4 + $0x38] sm:$0xff]  ;;  %v5657_v38 = vld [vmem:[%s11996_s4 + $0x328] sm:$0xff] }
0x1558   :  { %7933 = vmatprep.subr.bf16.mxu0 %v7932_v51  ;;  %7993 = vmatprep.subr.bf16.mxu1 %v8574_v11  ;;  %v8010_v51 = vpack.c.bf16 %v5558_v18, %v5556_v42  ;;  %v8012_v10 = vpack.c.bf16 %v5563_v15, %v5561_v0  ;;  %v8108_v27 = vpack.c.bf16 %v5659_v45, %v5657_v38  ;;  %v5673_v42 = vld [vmem:[%s11996_s4 + $0x3a8] sm:$0xff]  ;;  %v5672_v15 = vld [vmem:[%s11996_s4 + $0x3a0] sm:$0xff]  ;;  %v5674_v38 = vld [vmem:[%s11996_s4 + $0x3b0] sm:$0xff] }
0x1559   :  { %v8122_v18 = vpack.c.bf16 %v5670_v46, %v5668_v9  ;;  %v5581_v45 = vld [vmem:[%s11996_s4 + $0xc8] sm:$0xff]  ;;  %v5592_v9 = vld [vmem:[%s11996_s4 + $0x120] sm:$0xff]  ;;  %v5594_v46 = vld [vmem:[%s11996_s4 + $0x130] sm:$0xff] }
0x155b   :  { %7935 = vmatpush1.bf16.msra.mxu0 %v7934_v36  ;;  %7995 = vmatpush3.bf16.msra.mxu1 %v7994_v63  ;;  %v5656_v36 = vld [vmem:[%s11996_s4 + $0x320] sm:$0xff]  ;;  %v8014_v63 = vpack.c.bf16 %v5562_v19, %v5560_v49  ;;  %v8126_v49 = vpack.c.bf16 %v5674_v38, %v5672_v15  ;;  %v5598_v38 = vld [vmem:[%s11996_s4 + $0x150] sm:$0xff] }
0x155c   :  { %7937 = vmatprep.subr.bf16.mxu0 %v7936_v28  ;;  %7996 = vmatprep.subr.bf16.mxu1 %v8574_v11  ;;  %v5565_v28 = vld [vmem:[%s11996_s4 + $0x48] sm:$0xff]  ;;  %v5596_v15 = vld [vmem:[%s11996_s4 + $0x140] sm:$0xff] }
0x155d   :  { %v8016_v35 = vpack.c.bf16 %v5567_v29, %v5565_v28  ;;  %v5678_v28 = vld [vmem:[%s11996_s4 + $0x3d0] sm:$0xff]  ;;  %v5585_v29 = vld [vmem:[%s11996_s4 + $0xe8] sm:$0xff] }
0x155f   :  { %7939 = vmatpush1.bf16.msra.mxu0 %v7938_v39  ;;  %7998 = vmatpush3.bf16.msra.mxu1 %v7997_v52  ;;  %v5566_v39 = vld [vmem:[%s11996_s4 + $0x50] sm:$0xff]  ;;  %v8112_v52 = vpack.c.bf16 %v5663_v22, %v5661_v60  ;;  %v5587_v60 = vld [vmem:[%s11996_s4 + $0xf8] sm:$0xff] }
0x1560   :  { %7941 = vmatprep.subr.bf16.mxu0 %v7940_v37  ;;  %7999 = vmatprep.subr.bf16.mxu1 %v8574_v11  ;;  %v8018_v4 = vpack.c.bf16 %v5566_v39, %v5564_v6  ;;  %v5660_v37 = vld [vmem:[%s11996_s4 + $0x340] sm:$0xff]  ;;  %v5683_v22 = vld [vmem:[%s11996_s4 + $0x3f8] sm:$0xff] }
0x1561   :  { %v8114_v56 = vpack.c.bf16 %v5662_v53, %v5660_v37  ;;  %v5586_v37 = vld [vmem:[%s11996_s4 + $0xf0] sm:$0xff]  ;;  %v5680_v53 = vld [vmem:[%s11996_s4 + $0x3e0] sm:$0xff] }
0x1563   :  { %7943 = vmatpush1.bf16.msra.mxu0 %v7942_v58  ;;  %8001 = vmatpush3.bf16.msra.mxu1 %v8000_v44  ;;  %v5667_v58 = vld [vmem:[%s11996_s4 + $0x378] sm:$0xff]  ;;  %v8020_v44 = vpack.c.bf16 %v5571_v21, %v5569_v12  ;;  %v5589_v21 = vld [vmem:[%s11996_s4 + $0x108] sm:$0xff] }
0x1564   :  { %7945 = vmatprep.subr.bf16.mxu0 %v7944_v62  ;;  %8002 = vmatprep.subr.bf16.mxu1 %v8574_v11  ;;  %v8116_v1 = vpack.c.bf16 %v5667_v58, %v5665_v57  ;;  %v5568_v62 = vld [vmem:[%s11996_s4 + $0x60] sm:$0xff]  ;;  %v5591_v57 = vld [vmem:[%s11996_s4 + $0x118] sm:$0xff]  ;;  %v5685_v58 = vld [vmem:[%s11996_s4 + $0x408] sm:$0xff] }
0x1565   :  { %v8022_v13 = vpack.c.bf16 %v5570_v30, %v5568_v62  ;;  %v8040_v30 = vpack.c.bf16 %v5591_v57, %v5589_v21 }
0x1567   :  { %7947 = vmatpush1.bf16.msra.mxu0 %v7946_v7  ;;  %8004 = vmatpush3.bf16.msra.mxu1 %v8003_v17  ;;  %v5575_v7 = vld [vmem:[%s11996_s4 + $0x98] sm:$0xff]  ;;  %v8118_v17 = vpack.c.bf16 %v5666_v40, %v5664_v32  ;;  %v5588_v32 = vld [vmem:[%s11996_s4 + $0x100] sm:$0xff] }
0x1568   :  { %7949 = vmatprep.subr.bf16.mxu0 %v7948_v24  ;;  %8005 = vmatprep.subr.bf16.mxu1 %v8574_v11  ;;  %v8024_v20 = vpack.c.bf16 %v5575_v7, %v5573_v16  ;;  %v5671_v24 = vld [vmem:[%s11996_s4 + $0x398] sm:$0xff]  ;;  %v5684_v16 = vld [vmem:[%s11996_s4 + $0x400] sm:$0xff]  ;;  %v5686_v7 = vld [vmem:[%s11996_s4 + $0x410] sm:$0xff] }
0x1569   :  { %v8120_v31 = vpack.c.bf16 %v5671_v24, %v5669_v43  ;;  %v5593_v43 = vld [vmem:[%s11996_s4 + $0x128] sm:$0xff]  ;;  %v5595_v24 = vld [vmem:[%s11996_s4 + $0x138] sm:$0xff] }
0x156b   :  { %7951 = vmatpush1.bf16.msra.mxu0 %v7950_v61  ;;  %8007 = vmatpush3.bf16.msra.mxu1 %v8006_v55  ;;  %v5577_v61 = vld [vmem:[%s11996_s4 + $0xa8] sm:$0xff]  ;;  %v5579_v55 = vld [vmem:[%s11996_s4 + $0xb8] sm:$0xff] }
0x156c   :  { %8009 = vmatprep.subr.bf16.mxu1 %v8008_v2  ;;  %8105 = vmatprep.subr.bf16.mxu0 %v8104_v14  ;;  %v8028_v2 = vpack.c.bf16 %v5579_v55, %v5577_v61  ;;  %v5675_v14 = vld [vmem:[%s11996_s4 + $0x3b8] sm:$0xff]  ;;  %v8046_v61 = vpack.c.bf16 %v5594_v46, %v5592_v9  ;;  %v5688_v55 = vld [vmem:[%s11996_s4 + $0x420] sm:$0xff]  ;;  %v5709_v9 = vld [vmem:[%s11996_s4 + $0x4c8] sm:$0xff] }
0x156d   :  { %v8124_v0 = vpack.c.bf16 %v5675_v14, %v5673_v42  ;;  %v5690_v42 = vld [vmem:[%s11996_s4 + $0x430] sm:$0xff]  ;;  %v5599_v14 = vld [vmem:[%s11996_s4 + $0x158] sm:$0xff] }
0x156e   :  { %5353 = vmatmul.mubr.f32.vlgmr.msra.gmra.mrb[56].mxu0 %v10963_v50  ;;  %7332 = vmatmul.mubr.f32.vlgmr.msra.gmra.mrb[42].mxu1 %v10963_v50  ;;  %v5658_v50 = vld [vmem:[%s11996_s4 + $0x330] sm:$0xff] }
0x156f   :  { %8011 = vmatpush1.bf16.msra.mxu1 %v8010_v51  ;;  %8107 = vmatpush1.bf16.msra.mxu0 %v8106_v25  ;;  %v8110_v26 = vpack.c.bf16 %v5658_v50, %v5656_v36  ;;  %v5583_v51 = vld [vmem:[%s11996_s4 + $0xd8] sm:$0xff]  ;;  %v5677_v25 = vld [vmem:[%s11996_s4 + $0x3c8] sm:$0xff]  ;;  %v5580_v36 = vld [vmem:[%s11996_s4 + $0xc0] sm:$0xff] }
0x1570   :  { %8013 = vmatprep.subr.bf16.mxu1 %v8012_v10  ;;  %8109 = vmatprep.subr.bf16.mxu0 %v8108_v27  ;;  %v5679_v10 = vld [vmem:[%s11996_s4 + $0x3d8] sm:$0xff]  ;;  %v8030_v27 = vpack.c.bf16 %v5578_v33, %v5576_v8  ;;  %v8032_v19 = vpack.c.bf16 %v5583_v51, %v5581_v45  ;;  %v5676_v50 = vld [vmem:[%s11996_s4 + $0x3c0] sm:$0xff]  ;;  %v5693_v8 = vld [vmem:[%s11996_s4 + $0x448] sm:$0xff]  ;;  %v8050_v51 = vpack.c.bf16 %v5598_v38, %v5596_v15 }
0x1571   :  { %v8130_v39 = vpack.c.bf16 %v5678_v28, %v5676_v50  ;;  %v5699_v50 = vld [vmem:[%s11996_s4 + $0x478] sm:$0xff]  ;;  %v5602_v28 = vld [vmem:[%s11996_s4 + $0x170] sm:$0xff]  ;;  %v5713_v15 = vld [vmem:[%s11996_s4 + $0x4e8] sm:$0xff] }
0x1573   :  { %8015 = vmatpush1.bf16.msra.mxu1 %v8014_v63  ;;  %8111 = vmatpush1.bf16.msra.mxu0 %v8110_v26  ;;  %v5582_v63 = vld [vmem:[%s11996_s4 + $0xd0] sm:$0xff]  ;;  %v8128_v26 = vpack.c.bf16 %v5679_v10, %v5677_v25  ;;  %v5692_v25 = vld [vmem:[%s11996_s4 + $0x440] sm:$0xff] }
0x1574   :  { %8017 = vmatprep.subr.bf16.mxu1 %v8016_v35  ;;  %8113 = vmatprep.subr.bf16.mxu0 %v8112_v52  ;;  %v5681_v35 = vld [vmem:[%s11996_s4 + $0x3e8] sm:$0xff]  ;;  %v8034_v6 = vpack.c.bf16 %v5582_v63, %v5580_v36  ;;  %v8036_v52 = vpack.c.bf16 %v5587_v60, %v5585_v29  ;;  %v5694_v10 = vld [vmem:[%s11996_s4 + $0x450] sm:$0xff] }
0x1575   :  { %v8132_v12 = vpack.c.bf16 %v5683_v22, %v5681_v35  ;;  %v5697_v36 = vld [vmem:[%s11996_s4 + $0x468] sm:$0xff]  ;;  %v5696_v35 = vld [vmem:[%s11996_s4 + $0x460] sm:$0xff]  ;;  %v5698_v22 = vld [vmem:[%s11996_s4 + $0x470] sm:$0xff] }
0x1576   :  { %v8148_v29 = vpack.c.bf16 %v5699_v50, %v5697_v36  ;;  %v5623_v50 = vld [vmem:[%s11996_s4 + $0x218] sm:$0xff] }
0x1577   :  { %8019 = vmatpush1.bf16.msra.mxu1 %v8018_v4  ;;  %8115 = vmatpush1.bf16.msra.mxu0 %v8114_v56  ;;  %v5584_v4 = vld [vmem:[%s11996_s4 + $0xe0] sm:$0xff]  ;;  %v5682_v56 = vld [vmem:[%s11996_s4 + $0x3f0] sm:$0xff] }
0x1578   :  { %8021 = vmatprep.subr.bf16.mxu1 %v8020_v44  ;;  %8117 = vmatprep.subr.bf16.mxu0 %v8116_v1  ;;  %v5687_v44 = vld [vmem:[%s11996_s4 + $0x418] sm:$0xff]  ;;  %v8038_v1 = vpack.c.bf16 %v5586_v37, %v5584_v4  ;;  %v8134_v62 = vpack.c.bf16 %v5682_v56, %v5680_v53  ;;  %v5701_v4 = vld [vmem:[%s11996_s4 + $0x488] sm:$0xff]  ;;  %v5606_v56 = vld [vmem:[%s11996_s4 + $0x190] sm:$0xff] }
0x1579   :  { %v8136_v40 = vpack.c.bf16 %v5687_v44, %v5685_v58  ;;  %v5703_v53 = vld [vmem:[%s11996_s4 + $0x498] sm:$0xff]  ;;  %v5700_v58 = vld [vmem:[%s11996_s4 + $0x480] sm:$0xff]  ;;  %v5702_v44 = vld [vmem:[%s11996_s4 + $0x490] sm:$0xff] }
0x157a   :  { %v8152_v21 = vpack.c.bf16 %v5703_v53, %v5701_v4 }
0x157b   :  { %8023 = vmatpush1.bf16.msra.mxu1 %v8022_v13  ;;  %8119 = vmatpush1.bf16.msra.mxu0 %v8118_v17  ;;  %v5590_v13 = vld [vmem:[%s11996_s4 + $0x110] sm:$0xff] }
0x157c   :  { %8025 = vmatprep.subr.bf16.mxu1 %v8024_v20  ;;  %8121 = vmatprep.subr.bf16.mxu0 %v8120_v31  ;;  %v8042_v17 = vpack.c.bf16 %v5590_v13, %v5588_v32  ;;  %v8138_v20 = vpack.c.bf16 %v5686_v7, %v5684_v16  ;;  %v8044_v31 = vpack.c.bf16 %v5595_v24, %v5593_v43  ;;  %v5705_v32 = vld [vmem:[%s11996_s4 + $0x4a8] sm:$0xff]  ;;  %v5608_v16 = vld [vmem:[%s11996_s4 + $0x1a0] sm:$0xff]  ;;  %v5610_v7 = vld [vmem:[%s11996_s4 + $0x1b0] sm:$0xff] }
0x157d   :  { %v5704_v43 = vld [vmem:[%s11996_s4 + $0x4a0] sm:$0xff]  ;;  %v5706_v24 = vld [vmem:[%s11996_s4 + $0x4b0] sm:$0xff] }
0x157f   :  { %8027 = vmatpush1.bf16.msra.mxu1 %v8026_v5  ;;  %8123 = vmatpush1.bf16.msra.mxu0 %v8122_v18  ;;  %v8140_v5 = vpack.c.bf16 %v5691_v3, %v5689_v48  ;;  %v8142_v18 = vpack.c.bf16 %v5690_v42, %v5688_v55  ;;  %v8158_v48 = vpack.c.bf16 %v5706_v24, %v5704_v43  ;;  %v5615_v3 = vld [vmem:[%s11996_s4 + $0x1d8] sm:$0xff]  ;;  %v5614_v55 = vld [vmem:[%s11996_s4 + $0x1d0] sm:$0xff] }
0x1580   :  { %8029 = vmatprep.subr.bf16.mxu1 %v8028_v2  ;;  %8125 = vmatprep.subr.bf16.mxu0 %v8124_v0  ;;  %v5597_v2 = vld [vmem:[%s11996_s4 + $0x148] sm:$0xff]  ;;  %v5695_v0 = vld [vmem:[%s11996_s4 + $0x458] sm:$0xff] }
0x1581   :  { %v8048_v33 = vpack.c.bf16 %v5599_v14, %v5597_v2  ;;  %v8144_v45 = vpack.c.bf16 %v5695_v0, %v5693_v8  ;;  %v5708_v2 = vld [vmem:[%s11996_s4 + $0x4c0] sm:$0xff]  ;;  %v5710_v14 = vld [vmem:[%s11996_s4 + $0x4d0] sm:$0xff]  ;;  %v5619_v0 = vld [vmem:[%s11996_s4 + $0x1f8] sm:$0xff] }
0x1582   :  { %v8162_v8 = vpack.c.bf16 %v5710_v14, %v5708_v2 }
0x1583   :  { %8031 = vmatpush1.bf16.msra.mxu1 %v8030_v27  ;;  %8127 = vmatpush1.bf16.msra.mxu0 %v8126_v49  ;;  %v8146_v27 = vpack.c.bf16 %v5694_v10, %v5692_v25  ;;  %v5601_v49 = vld [vmem:[%s11996_s4 + $0x168] sm:$0xff]  ;;  %v5618_v25 = vld [vmem:[%s11996_s4 + $0x1f0] sm:$0xff] }
0x1584   :  { %8033 = vmatprep.subr.bf16.mxu1 %v8032_v19  ;;  %8129 = vmatprep.subr.bf16.mxu0 %v8128_v26  ;;  %v5603_v19 = vld [vmem:[%s11996_s4 + $0x178] sm:$0xff]  ;;  %v5600_v26 = vld [vmem:[%s11996_s4 + $0x160] sm:$0xff] }
0x1585   :  { %v8052_v63 = vpack.c.bf16 %v5603_v19, %v5601_v49  ;;  %v8054_v60 = vpack.c.bf16 %v5602_v28, %v5600_v26  ;;  %v5712_v49 = vld [vmem:[%s11996_s4 + $0x4e0] sm:$0xff]  ;;  %v5714_v19 = vld [vmem:[%s11996_s4 + $0x4f0] sm:$0xff]  ;;  %v5717_v26 = vld [vmem:[%s11996_s4 + $0x508] sm:$0xff] }
0x1586   :  { %v8166_v36 = vpack.c.bf16 %v5714_v19, %v5712_v49  ;;  %v5631_v49 = vld [vmem:[%s11996_s4 + $0x258] sm:$0xff]  ;;  %v5725_v19 = vld [vmem:[%s11996_s4 + $0x548] sm:$0xff] }
0x1587   :  { %8035 = vmatpush1.bf16.msra.mxu1 %v8034_v6  ;;  %8131 = vmatpush1.bf16.msra.mxu0 %v8130_v39  ;;  %v8150_v6 = vpack.c.bf16 %v5698_v22, %v5696_v35  ;;  %v5605_v39 = vld [vmem:[%s11996_s4 + $0x188] sm:$0xff] }
0x1588   :  { %8037 = vmatprep.subr.bf16.mxu1 %v8036_v52  ;;  %8133 = vmatprep.subr.bf16.mxu0 %v8132_v12  ;;  %v5607_v52 = vld [vmem:[%s11996_s4 + $0x198] sm:$0xff]  ;;  %v5604_v12 = vld [vmem:[%s11996_s4 + $0x180] sm:$0xff] }
0x1589   :  { %v8056_v37 = vpack.c.bf16 %v5607_v52, %v5605_v39  ;;  %v8058_v57 = vpack.c.bf16 %v5606_v56, %v5604_v12 }
0x158b   :  { %8039 = vmatpush1.bf16.msra.mxu1 %v8038_v1  ;;  %8135 = vmatpush1.bf16.msra.mxu0 %v8134_v62  ;;  %v8154_v1 = vpack.c.bf16 %v5702_v44, %v5700_v58  ;;  %v5609_v62 = vld [vmem:[%s11996_s4 + $0x1a8] sm:$0xff] }
0x158c   :  { %8041 = vmatprep.subr.bf16.mxu1 %v8040_v30  ;;  %8137 = vmatprep.subr.bf16.mxu0 %v8136_v40  ;;  %v5611_v30 = vld [vmem:[%s11996_s4 + $0x1b8] sm:$0xff] }
0x158d   :  { %v8060_v13 = vpack.c.bf16 %v5611_v30, %v5609_v62  ;;  %v5707_v40 = vld [vmem:[%s11996_s4 + $0x4b8] sm:$0xff] }
0x158f   :  { %8043 = vmatpush1.bf16.msra.mxu1 %v8042_v17  ;;  %8139 = vmatpush1.bf16.msra.mxu0 %v8138_v20  ;;  %v8156_v17 = vpack.c.bf16 %v5707_v40, %v5705_v32  ;;  %v8062_v20 = vpack.c.bf16 %v5610_v7, %v5608_v16 }
0x1590   :  { %8045 = vmatprep.subr.bf16.mxu1 %v8044_v31  ;;  %8141 = vmatprep.subr.bf16.mxu0 %v8140_v5  ;;  %v5613_v31 = vld [vmem:[%s11996_s4 + $0x1c8] sm:$0xff]  ;;  %v5711_v5 = vld [vmem:[%s11996_s4 + $0x4d8] sm:$0xff] }
0x1591   :  { %v8064_v46 = vpack.c.bf16 %v5615_v3, %v5613_v31  ;;  %v8160_v42 = vpack.c.bf16 %v5711_v5, %v5709_v9  ;;  %v5620_v3 = vld [vmem:[%s11996_s4 + $0x200] sm:$0xff]  ;;  %v5622_v9 = vld [vmem:[%s11996_s4 + $0x210] sm:$0xff] }
0x1592   :  { %v5718_v5 = vld [vmem:[%s11996_s4 + $0x510] sm:$0xff] }
0x1593   :  { %8047 = vmatpush1.bf16.msra.mxu1 %v8046_v61  ;;  %8143 = vmatpush1.bf16.msra.mxu0 %v8142_v18  ;;  %v5612_v61 = vld [vmem:[%s11996_s4 + $0x1c0] sm:$0xff] }
0x1594   :  { %8049 = vmatprep.subr.bf16.mxu1 %v8048_v33  ;;  %8145 = vmatprep.subr.bf16.mxu0 %v8144_v45  ;;  %v8066_v18 = vpack.c.bf16 %v5614_v55, %v5612_v61  ;;  %v5617_v33 = vld [vmem:[%s11996_s4 + $0x1e8] sm:$0xff]  ;;  %v5715_v45 = vld [vmem:[%s11996_s4 + $0x4f8] sm:$0xff] }
0x1595   :  { %v8068_v38 = vpack.c.bf16 %v5619_v0, %v5617_v33  ;;  %v8164_v10 = vpack.c.bf16 %v5715_v45, %v5713_v15  ;;  %v5627_v55 = vld [vmem:[%s11996_s4 + $0x238] sm:$0xff]  ;;  %v5624_v0 = vld [vmem:[%s11996_s4 + $0x220] sm:$0xff]  ;;  %v5626_v15 = vld [vmem:[%s11996_s4 + $0x230] sm:$0xff] }
0x1597   :  { %8051 = vmatpush1.bf16.msra.mxu1 %v8050_v51  ;;  %8147 = vmatpush1.bf16.msra.mxu0 %v8146_v27  ;;  %v5616_v51 = vld [vmem:[%s11996_s4 + $0x1e0] sm:$0xff] }
0x1598   :  { %8053 = vmatprep.subr.bf16.mxu1 %v8052_v63  ;;  %8149 = vmatprep.subr.bf16.mxu0 %v8148_v29  ;;  %v8070_v27 = vpack.c.bf16 %v5618_v25, %v5616_v51  ;;  %v5621_v63 = vld [vmem:[%s11996_s4 + $0x208] sm:$0xff]  ;;  %v5719_v29 = vld [vmem:[%s11996_s4 + $0x518] sm:$0xff]  ;;  %v5720_v25 = vld [vmem:[%s11996_s4 + $0x520] sm:$0xff] }
0x1599   :  { %v8072_v28 = vpack.c.bf16 %v5623_v50, %v5621_v63  ;;  %v8078_v50 = vpack.c.bf16 %v5626_v15, %v5624_v0  ;;  %v5647_v0 = vld [vmem:[%s11996_s4 + $0x2d8] sm:$0xff]  ;;  %v5741_v15 = vld [vmem:[%s11996_s4 + $0x5c8] sm:$0xff] }
0x159b   :  { %8055 = vmatpush1.bf16.msra.mxu1 %v8054_v60  ;;  %8151 = vmatpush1.bf16.msra.mxu0 %v8150_v6  ;;  %v8168_v60 = vpack.c.bf16 %v5719_v29, %v5717_v26  ;;  %v5630_v29 = vld [vmem:[%s11996_s4 + $0x250] sm:$0xff] }
0x159c   :  { %8057 = vmatprep.subr.bf16.mxu1 %v8056_v37  ;;  %8153 = vmatprep.subr.bf16.mxu0 %v8152_v21 }
0x159f   :  { %8059 = vmatpush1.bf16.msra.mxu1 %v8058_v57  ;;  %8155 = vmatpush1.bf16.msra.mxu0 %v8154_v1 }
0x15a0   :  { %8061 = vmatprep.subr.bf16.mxu1 %v8060_v13  ;;  %8157 = vmatprep.subr.bf16.mxu0 %v8156_v17 }
0x15a3   :  { %8063 = vmatpush1.bf16.msra.mxu1 %v8062_v20  ;;  %8159 = vmatpush1.bf16.msra.mxu0 %v8158_v48 }
0x15a4   :  { %8065 = vmatprep.subr.bf16.mxu1 %v8064_v46  ;;  %8161 = vmatprep.subr.bf16.mxu0 %v8160_v42  ;;  %v5721_v42 = vld [vmem:[%s11996_s4 + $0x528] sm:$0xff] }
0x15a7   :  { %8067 = vmatpush1.bf16.msra.mxu1 %v8066_v18  ;;  %8163 = vmatpush1.bf16.msra.mxu0 %v8162_v8  ;;  %v5723_v18 = vld [vmem:[%s11996_s4 + $0x538] sm:$0xff]  ;;  %v8074_v8 = vpack.c.bf16 %v5622_v9, %v5620_v3  ;;  %v5734_v3 = vld [vmem:[%s11996_s4 + $0x590] sm:$0xff]  ;;  %v5641_v9 = vld [vmem:[%s11996_s4 + $0x2a8] sm:$0xff] }
0x15a8   :  { %8069 = vmatprep.subr.bf16.mxu1 %v8068_v38  ;;  %8165 = vmatprep.subr.bf16.mxu0 %v8164_v10  ;;  %v8172_v51 = vpack.c.bf16 %v5723_v18, %v5721_v42  ;;  %v5722_v10 = vld [vmem:[%s11996_s4 + $0x530] sm:$0xff] }
0x15a9   :  { %v8174_v26 = vpack.c.bf16 %v5722_v10, %v5720_v25  ;;  %v5642_v42 = vld [vmem:[%s11996_s4 + $0x2b0] sm:$0xff]  ;;  %v5644_v25 = vld [vmem:[%s11996_s4 + $0x2c0] sm:$0xff] }
0x15aa   :  { %v5646_v10 = vld [vmem:[%s11996_s4 + $0x2d0] sm:$0xff] }
0x15ab   :  { %8071 = vmatpush1.bf16.msra.mxu1 %v8070_v27  ;;  %8167 = vmatpush1.bf16.msra.mxu0 %v8166_v36  ;;  %v5629_v27 = vld [vmem:[%s11996_s4 + $0x248] sm:$0xff]  ;;  %v5727_v36 = vld [vmem:[%s11996_s4 + $0x558] sm:$0xff] }
0x15ac   :  { %8073 = vmatprep.subr.bf16.mxu1 %v8072_v28  ;;  %8169 = vmatprep.subr.bf16.mxu0 %v8168_v60  ;;  %v5628_v28 = vld [vmem:[%s11996_s4 + $0x240] sm:$0xff]  ;;  %v8080_v60 = vpack.c.bf16 %v5631_v49, %v5629_v27 }
0x1621   :  { %v6840_v35 = vpop.f32.mrb[40].mxu1 }
0x1622   :  { %v6841_v22 = vpop.f32.mrb[41].mxu1 }
0x1623   :  { %v6842_v6 = vadd.f32 %v6841_v22, %v6840_v35  ;;  %v8176_v35 = vpack.c.bf16 %v5727_v36, %v5725_v19  ;;  %v5724_v22 = vld [vmem:[%s11996_s4 + $0x540] sm:$0xff]  ;;  %v5742_v36 = vld [vmem:[%s11996_s4 + $0x5d0] sm:$0xff] }
0x1624   :  { %v5740_v19 = vld [vmem:[%s11996_s4 + $0x5c0] sm:$0xff] }
0x1641   :  { %v5354_v39 = vpop.f32.mrb[56].mxu0  ;;  %v5495_v52 = vpop.f32.mrb[42].mxu1 }
0x1642   :  { %v5499_v4 = vmul.f32 %v5354_v39, %v5354_v39  ;;  %v11472_v37 = vadd.f32 %v6842_v6, %v5495_v52  ;;  %v5356_v53 = vpop.f32.mrb[57].mxu0  ;;  %v7333_v12 = vpop.f32.mrb[43].mxu1  ;;  %v5520_v13 = vrot.slane %v5354_v39, %v8885_v54  ;;  %v5726_v6 = vld [vmem:[%s11996_s4 + $0x550] sm:$0xff]  ;;  %v5635_v52 = vld [vmem:[%s11996_s4 + $0x278] sm:$0xff] }
0x1643   :  { %v5500_v56 = vmul.f32 %v5356_v53, %v5356_v53  ;;  %v5524_v16 = vrot.slane %v5356_v53, %v8885_v54 }
0x1644   :  { %v5505_v21 = vrot.slane %v5499_v4, 7  ;;  %v5501_v40 = vmul.f32 %v11472_v37, %v11472_v37  ;;  %v5529_v20 = vsub.f32 %v10703_v34, %v5520_v13  ;;  %v5716_v34 = vld [vmem:[%s11996_s4 + $0x500] sm:$0xff]  ;;  %v5729_v4 = vld [vmem:[%s11996_s4 + $0x568] sm:$0xff]  ;;  %v5639_v13 = vld [vmem:[%s11996_s4 + $0x298] sm:$0xff] }
0x1645   :  { %v5506_v57 = vrot.slane %v5500_v56, 7  ;;  %v5530_v48 = vsub.f32 %v10705_v23, %v5524_v16  ;;  %v5625_v23 = vld [vmem:[%s11996_s4 + $0x228] sm:$0xff]  ;;  %v8170_v33 = vpack.c.bf16 %v5718_v5, %v5716_v34  ;;  %v8082_v56 = vpack.c.bf16 %v5630_v29, %v5628_v28  ;;  %v5735_v16 = vld [vmem:[%s11996_s4 + $0x598] sm:$0xff] }
0x1646   :  { %v5511_v58 = vsub.f32 %v5354_v39, %v5505_v21  ;;  %v5507_v24 = vrot.slane %v5501_v40, 7  ;;  %v8076_v45 = vpack.c.bf16 %v5627_v55, %v5625_v23  ;;  %v5633_v39 = vld [vmem:[%s11996_s4 + $0x268] sm:$0xff]  ;;  %v8178_v21 = vpack.c.bf16 %v5726_v6, %v5724_v22  ;;  %v5739_v5 = vld [vmem:[%s11996_s4 + $0x5b8] sm:$0xff]  ;;  %v5640_v55 = vld [vmem:[%s11996_s4 + $0x2a0] sm:$0xff] }
0x1647   :  { %v5512_v44 = vsub.f32 %v5356_v53, %v5506_v57  ;;  %v5731_v53 = vld [vmem:[%s11996_s4 + $0x578] sm:$0xff]  ;;  %v5632_v57 = vld [vmem:[%s11996_s4 + $0x260] sm:$0xff]  ;;  %v5733_v40 = vld [vmem:[%s11996_s4 + $0x588] sm:$0xff]  ;;  %v8194_v22 = vpack.c.bf16 %v5742_v36, %v5740_v19 }
0x1648   :  { %v5514_v1 = vmax.f32 %v5511_v58, 0.0  ;;  %v5513_v2 = vsub.f32 %v11472_v37, %v5507_v24  ;;  %v5634_v58 = vld [vmem:[%s11996_s4 + $0x270] sm:$0xff]  ;;  %v5737_v34 = vld [vmem:[%s11996_s4 + $0x5a8] sm:$0xff]  ;;  %v5747_v29 = vld [vmem:[%s11996_s4 + $0x5f8] sm:$0xff] }
0x1649   :  { %v5515_v62 = vmax.f32 %v5512_v44, 0.0  ;;  %v8084_v44 = vpack.c.bf16 %v5635_v52, %v5633_v39  ;;  %v5745_v28 = vld [vmem:[%s11996_s4 + $0x5e8] sm:$0xff]  ;;  %v5648_v6 = vld [vmem:[%s11996_s4 + $0x2e0] sm:$0xff]  ;;  %v5764_v19 = vld [vmem:[%s11996_s4 + $0x670] sm:$0xff] }
0x164a   :  { %v5532_v30 = vadd.f32 1e-05, %v5514_v1  ;;  %v5516_v63 = vmax.f32 %v5513_v2, 0.0  ;;  %v8180_v1 = vpack.c.bf16 %v5731_v53, %v5729_v4  ;;  %v8188_v2 = vpack.c.bf16 %v5739_v5, %v5737_v34  ;;  %v5650_v4 = vld [vmem:[%s11996_s4 + $0x2f0] sm:$0xff]  ;;  %v5767_v36 = vld [vmem:[%s11996_s4 + $0x688] sm:$0xff] }
0x164b   :  { %v5533_v32 = vadd.f32 1e-05, %v5515_v62  ;;  %v5728_v62 = vld [vmem:[%s11996_s4 + $0x560] sm:$0xff]  ;;  %v8196_v52 = vpack.c.bf16 %v5747_v29, %v5745_v28  ;;  %v5746_v53 = vld [vmem:[%s11996_s4 + $0x5f0] sm:$0xff] }
0x164c   :  { %8558 = vrsqrt.f32 %v5532_v30  ;;  %v5534_v12 = vadd.f32 1e-05, %v5516_v63  ;;  %v5730_v30 = vld [vmem:[%s11996_s4 + $0x570] sm:$0xff]  ;;  %v5649_v63 = vld [vmem:[%s11996_s4 + $0x2e8] sm:$0xff]  ;;  %v5766_v28 = vld [vmem:[%s11996_s4 + $0x680] sm:$0xff] }
0x164d   :  { %8560 = vrsqrt.f32 %v5533_v32  ;;  %v5637_v32 = vld [vmem:[%s11996_s4 + $0x288] sm:$0xff]  ;;  %v5752_v34 = vld [vmem:[%s11996_s4 + $0x610] sm:$0xff] }
0x164e   :  { %8562 = vrsqrt.f32 %v5534_v12  ;;  %v8088_v24 = vpack.c.bf16 %v5639_v13, %v5637_v32  ;;  %v5768_v29 = vld [vmem:[%s11996_s4 + $0x690] sm:$0xff] }
0x1656   :  { %v8559_v7 = vpop.eup %8558 }
0x1657   :  { %v8561_v17 = vpop.eup %8560  ;;  %v5541_v43 = vrot.slane %v8559_v7, %v8882_v47  ;;  %v8086_v7 = vpack.c.bf16 %v5634_v58, %v5632_v57 }
0x1658   :  { %v5545_v31 = vrot.slane %v8561_v17, %v8882_v47  ;;  %v8182_v17 = vpack.c.bf16 %v5730_v30, %v5728_v62 }
0x1659   :  { %v5550_v46 = vmul.f32 %v5541_v43, %v5529_v20  ;;  %v5636_v20 = vld [vmem:[%s11996_s4 + $0x280] sm:$0xff]  ;;  %v5638_v43 = vld [vmem:[%s11996_s4 + $0x290] sm:$0xff] }
0x165a   :  { %v5551_v61 = vmul.f32 %v5545_v31, %v5530_v48  ;;  %v8184_v48 = vpack.c.bf16 %v5735_v16, %v5733_v40  ;;  %v5732_v31 = vld [vmem:[%s11996_s4 + $0x580] sm:$0xff]  ;;  %v8090_v23 = vpack.c.bf16 %v5638_v43, %v5636_v20 }
0x165b   :  { %v5553_v38 = vmax.f32 %v5550_v46, 0.0  ;;  %v5643_v46 = vld [vmem:[%s11996_s4 + $0x2b8] sm:$0xff] }
0x165c   :  { %v5554_v14 = vmax.f32 %v5551_v61, 0.0  ;;  %v8186_v61 = vpack.c.bf16 %v5734_v3, %v5732_v31  ;;  %v8092_v18 = vpack.c.bf16 %v5643_v46, %v5641_v9  ;;  %v5750_v46 = vld [vmem:[%s11996_s4 + $0x600] sm:$0xff] }
0x165e   :  { %5862 = vmatprep.mubr.f32.mxu1 %v5554_v14  ;;  %6004 = vmatprep.mubr.f32.mxu0 %v5554_v14  ;;  %v5736_v14 = vld [vmem:[%s11996_s4 + $0x5a0] sm:$0xff] }
0x165f   :  { %5863 = vmatmul.mubr.f32.vlgmr.msra.gmra.mrb[44].mxu1 %v5553_v38  ;;  %6005 = vmatmul.mubr.f32.vlgmr.msra.gmra.mrb[58].mxu0 %v5553_v38  ;;  %v5743_v38 = vld [vmem:[%s11996_s4 + $0x5d8] sm:$0xff] }
0x1660   :  { %8075 = vmatpush1.bf16.msra.mxu1 %v8074_v8  ;;  %8171 = vmatpush1.bf16.msra.mxu0 %v8170_v33  ;;  %v5738_v8 = vld [vmem:[%s11996_s4 + $0x5b0] sm:$0xff]  ;;  %v5645_v33 = vld [vmem:[%s11996_s4 + $0x2c8] sm:$0xff]  ;;  %v8192_v49 = vpack.c.bf16 %v5743_v38, %v5741_v15  ;;  %v5758_v38 = vld [vmem:[%s11996_s4 + $0x640] sm:$0xff] }
0x1661   :  { %8077 = vmatprep.subr.bf16.mxu1 %v8076_v45  ;;  %8173 = vmatprep.subr.bf16.mxu0 %v8172_v51  ;;  %v8094_v45 = vpack.c.bf16 %v5642_v42, %v5640_v55  ;;  %v8190_v51 = vpack.c.bf16 %v5738_v8, %v5736_v14  ;;  %v8096_v27 = vpack.c.bf16 %v5647_v0, %v5645_v33  ;;  %v5759_v14 = vld [vmem:[%s11996_s4 + $0x648] sm:$0xff]  ;;  %v5761_v8 = vld [vmem:[%s11996_s4 + $0x658] sm:$0xff] }
0x1662   :  { %5933 = vmatprep.mubr.f32.mxu1 %v8573_v41  ;;  %6075 = vmatprep.mubr.f32.mxu0 %v8573_v41  ;;  %v8206_v55 = vpack.c.bf16 %v5752_v34, %v5750_v46  ;;  %v8571_v33 = vld [vmem:[%s11993_s0 + $0x88] sm:$0x3]  ;;  %v8212_v15 = vpack.c.bf16 %v5761_v8, %v5759_v14  ;;  %v5793_v34 = vld [vmem:[%s11996_s4 + $0x758] sm:$0xff]  ;;  %v5794_v8 = vld [vmem:[%s11996_s4 + $0x760] sm:$0xff] }
0x1663   :  { %v5791_v46 = vld [vmem:[%s11996_s4 + $0x748] sm:$0xff] }
0x1664   :  { %8079 = vmatpush1.bf16.msra.mxu1 %v8078_v50  ;;  %8175 = vmatpush1.bf16.msra.mxu0 %v8174_v26  ;;  %v8563_v50 = vpop.eup %8562  ;;  %v5651_v26 = vld [vmem:[%s11996_s4 + $0x2f8] sm:$0xff] }
0x1665   :  { %8081 = vmatprep.subr.bf16.mxu1 %v8080_v60  ;;  %8177 = vmatprep.subr.bf16.mxu0 %v8176_v35  ;;  %v5528_v60 = vrot.slane %v11472_v37, %v8885_v54  ;;  %v8098_v35 = vpack.c.bf16 %v5646_v10, %v5644_v25  ;;  %v8100_v39 = vpack.c.bf16 %v5651_v26, %v5649_v63  ;;  %v5744_v37 = vld [vmem:[%s11996_s4 + $0x5e0] sm:$0xff]  ;;  %v5765_v25 = vld [vmem:[%s11996_s4 + $0x678] sm:$0xff] }
0x1666   :  { %v5549_v12 = vrot.slane %v8563_v50, %v8882_v47  ;;  %v8198_v57 = vpack.c.bf16 %v5746_v53, %v5744_v37  ;;  %v5769_v63 = vld [vmem:[%s11996_s4 + $0x698] sm:$0xff] }
0x1667   :  { %v8220_v26 = vpack.c.bf16 %v5769_v63, %v5767_v36  ;;  %v5777_v37 = vld [vmem:[%s11996_s4 + $0x6d8] sm:$0xff]  ;;  %v6288_v36 = vld [vmem:[%s11996_s4 + $0x7f0] sm:$0xff]  ;;  %v6289_v63 = vld [vmem:[%s11996_s4 + $0x800] sm:$0xff] }
0x1668   :  { %8083 = vmatpush1.bf16.msra.mxu1 %v8082_v56  ;;  %8179 = vmatpush1.bf16.msra.mxu0 %v8178_v21  ;;  %v5531_v56 = vsub.f32 %v10707_v59, %v5528_v60  ;;  %v8102_v21 = vpack.c.bf16 %v5650_v4, %v5648_v6  ;;  %v6541_v59 = vld [vmem:[%s11996_s4 + $0x780] ss:$8 sm:$0x3] }
0x1669   :  { %8085 = vmatprep.subr.bf16.mxu1 %v8084_v44  ;;  %8181 = vmatprep.subr.bf16.mxu0 %v8180_v1  ;;  %v6088_v1 = vrot.slane %v6541_v59, %v8885_v54  ;;  %v6092_v32 = vrot.slane %v6541_v59, %v8882_v47  ;;  %v5771_v60 = vld [vmem:[%s11996_s4 + $0x6a8] sm:$0xff] }
0x166a   :  { %v5552_v58 = vmul.f32 %v5549_v12, %v5531_v56  ;;  %v5775_v4 = vld [vmem:[%s11996_s4 + $0x6c8] sm:$0xff]  ;;  %v5774_v56 = vld [vmem:[%s11996_s4 + $0x6c0] sm:$0xff] }
0x166b   :  { %v8228_v12 = vpack.c.bf16 %v5777_v37, %v5775_v4  ;;  %v6296_v37 = vld [vmem:[%s11996_s4 + $0x870] sm:$0xff] }
0x166c   :  { %8087 = vmatpush1.bf16.msra.mxu1 %v8086_v7  ;;  %8183 = vmatpush1.bf16.msra.mxu0 %v8182_v17  ;;  %v5555_v44 = vmax.f32 %v5552_v58, 0.0  ;;  %v5781_v58 = vld [vmem:[%s11996_s4 + $0x6f8] sm:$0xff] }
0x166d   :  { %8089 = vmatprep.subr.bf16.mxu1 %v8088_v24  ;;  %8185 = vmatprep.subr.bf16.mxu0 %v8184_v48  ;;  %v5751_v24 = vld [vmem:[%s11996_s4 + $0x608] sm:$0xff]  ;;  %v5753_v48 = vld [vmem:[%s11996_s4 + $0x618] sm:$0xff] }
0x166e   :  { %v8204_v9 = vpack.c.bf16 %v5753_v48, %v5751_v24  ;;  %v5789_v24 = vld [vmem:[%s11996_s4 + $0x738] sm:$0xff] }
0x1670   :  { %8091 = vmatpush1.bf16.msra.mxu1 %v8090_v23  ;;  %8187 = vmatpush1.bf16.msra.mxu0 %v8186_v61  ;;  %v5755_v23 = vld [vmem:[%s11996_s4 + $0x628] sm:$0xff]  ;;  %v5757_v61 = vld [vmem:[%s11996_s4 + $0x638] sm:$0xff] }
0x1671   :  { %8093 = vmatprep.subr.bf16.mxu1 %v8092_v18  ;;  %8189 = vmatprep.subr.bf16.mxu0 %v8188_v2  ;;  %v8208_v42 = vpack.c.bf16 %v5757_v61, %v5755_v23  ;;  %v5754_v18 = vld [vmem:[%s11996_s4 + $0x620] sm:$0xff]  ;;  %v5756_v2 = vld [vmem:[%s11996_s4 + $0x630] sm:$0xff]  ;;  %v8244_v23 = vpack.c.bf16 %v5793_v34, %v5791_v46 }
0x1672   :  { %v8210_v0 = vpack.c.bf16 %v5756_v2, %v5754_v18  ;;  %v5790_v61 = vld [vmem:[%s11996_s4 + $0x740] sm:$0xff]  ;;  %v5797_v18 = vld [vmem:[%s11996_s4 + $0x778] sm:$0xff] }
0x1673   :  { %v6387_v34 = vld [vmem:[%s11996_s4 + $0x980] sm:$0xff] }
0x1674   :  { %8095 = vmatpush1.bf16.msra.mxu1 %v8094_v45  ;;  %8191 = vmatpush1.bf16.msra.mxu0 %v8190_v51  ;;  %v5760_v45 = vld [vmem:[%s11996_s4 + $0x650] sm:$0xff]  ;;  %v5763_v51 = vld [vmem:[%s11996_s4 + $0x668] sm:$0xff] }
0x1675   :  { %8097 = vmatprep.subr.bf16.mxu1 %v8096_v27  ;;  %8193 = vmatprep.subr.bf16.mxu0 %v8192_v49  ;;  %v8214_v10 = vpack.c.bf16 %v5760_v45, %v5758_v38  ;;  %v8216_v27 = vpack.c.bf16 %v5765_v25, %v5763_v51  ;;  %v5762_v49 = vld [vmem:[%s11996_s4 + $0x660] sm:$0xff]  ;;  %v6284_v45 = vld [vmem:[%s11996_s4 + $0x7b0] sm:$0xff] }
0x1676   :  { %v8218_v50 = vpack.c.bf16 %v5764_v19, %v5762_v49  ;;  %v6283_v38 = vld [vmem:[%s11996_s4 + $0x7a0] sm:$0xff] }
0x1677   :  { %v6285_v25 = vld [vmem:[%s11996_s4 + $0x7c0] sm:$0xff] }
0x1678   :  { %8099 = vmatpush1.bf16.msra.mxu1 %v8098_v35  ;;  %8195 = vmatpush1.bf16.msra.mxu0 %v8194_v22  ;;  %v5773_v35 = vld [vmem:[%s11996_s4 + $0x6b8] sm:$0xff]  ;;  %v8222_v22 = vpack.c.bf16 %v5768_v29, %v5766_v28  ;;  %v6287_v49 = vld [vmem:[%s11996_s4 + $0x7e0] sm:$0xff] }
0x1679   :  { %8101 = vmatprep.subr.bf16.mxu1 %v8100_v39  ;;  %8197 = vmatprep.subr.bf16.mxu0 %v8196_v52  ;;  %v8224_v6 = vpack.c.bf16 %v5773_v35, %v5771_v60  ;;  %v5770_v39 = vld [vmem:[%s11996_s4 + $0x6a0] sm:$0xff]  ;;  %v5772_v52 = vld [vmem:[%s11996_s4 + $0x6b0] sm:$0xff] }
0x167a   :  { %v8226_v53 = vpack.c.bf16 %v5772_v52, %v5770_v39  ;;  %v6291_v28 = vld [vmem:[%s11996_s4 + $0x820] sm:$0xff]  ;;  %v6294_v52 = vld [vmem:[%s11996_s4 + $0x850] sm:$0xff] }
0x167c   :  { %8103 = vmatpush1.bf16.msra.mxu1 %v8102_v21  ;;  %8199 = vmatpush1.bf16.msra.mxu0 %v8198_v57  ;;  %v5776_v21 = vld [vmem:[%s11996_s4 + $0x6d0] sm:$0xff]  ;;  %v5779_v57 = vld [vmem:[%s11996_s4 + $0x6e8] sm:$0xff] }
0x167d   :  { %8252 = vmatprep.subr.bf16.mxu0 %v8574_v11  ;;  %v8232_v59 = vpack.c.bf16 %v5781_v58, %v5779_v57  ;;  %v6300_v58 = vld [vmem:[%s11996_s4 + $0x8b0] sm:$0xff] }
0x167f   :  { %5934 = vmatmul.mubr.f32.vlgmr.msra.gmra.mrb[44].mxu1 %v5555_v44  ;;  %6076 = vmatmul.mubr.f32.vlgmr.msra.gmra.mrb[58].mxu0 %v5555_v44  ;;  %v8230_v44 = vpack.c.bf16 %v5776_v21, %v5774_v56  ;;  %v6298_v56 = vld [vmem:[%s11996_s4 + $0x890] sm:$0xff]  ;;  %v6299_v21 = vld [vmem:[%s11996_s4 + $0x8a0] sm:$0xff] }
0x1680   :  { %6163 = vmatprep.mubr.f32.mxu1 %v8573_v41  ;;  %v8277_v57 = vpack.c.bf16 %v6299_v21, %v6298_v56  ;;  %v6397_v21 = vld [vmem:[%s11996_s4 + $0xa20] ss:$0 sm:$0xff] }
0x1752   :  { %v5935_v62 = vpop.f32.mrb[44].mxu1  ;;  %v6077_v30 = vpop.f32.mrb[58].mxu0 }
0x1753   :  { %v6082_v13 = vmax.f32 %v5935_v62, %v6077_v30  ;;  %v5937_v40 = vpop.f32.mrb[45].mxu1  ;;  %v6079_v16 = vpop.f32.mrb[59].mxu0  ;;  %v5780_v62 = vld [vmem:[%s11996_s4 + $0x6f0] sm:$0xff]  ;;  %v5783_v30 = vld [vmem:[%s11996_s4 + $0x708] sm:$0xff] }
0x1754   :  { %v6083_v7 = vmax.f32 %v5937_v40, %v6079_v16  ;;  %v5782_v16 = vld [vmem:[%s11996_s4 + $0x700] sm:$0xff] }
0x1755   :  { %v11676_v17 = vadd.f32 %v6088_v1, %v6082_v13  ;;  %v5778_v1 = vld [vmem:[%s11996_s4 + $0x6e0] sm:$0xff] }
0x1756   :  { %v11678_v20 = vadd.f32 %v6092_v32, %v6083_v7  ;;  %v5785_v32 = vld [vmem:[%s11996_s4 + $0x718] sm:$0xff]  ;;  %v8234_v13 = vpack.c.bf16 %v5780_v62, %v5778_v1  ;;  %v5784_v7 = vld [vmem:[%s11996_s4 + $0x710] sm:$0xff]  ;;  %v6303_v62 = vld [vmem:[%s11996_s4 + $0x8e0] sm:$0xff] }
0x1757   :  { %v6097_v43 = vmul.f32 %v11676_v17, %v11676_v17  ;;  %v8236_v40 = vpack.c.bf16 %v5785_v32, %v5783_v30  ;;  %v8238_v48 = vpack.c.bf16 %v5784_v7, %v5782_v16  ;;  %v6302_v1 = vld [vmem:[%s11996_s4 + $0x8d0] sm:$0xff]  ;;  %v6381_v16 = vld [vmem:[%s11996_s4 + $0x920] sm:$0xff] }
0x1758   :  { %v6098_v31 = vmul.f32 %v11678_v20, %v11678_v20  ;;  %v8283_v30 = vpack.c.bf16 %v6303_v62, %v6302_v1  ;;  %v6304_v32 = vld [vmem:[%s11996_s4 + $0x8f0] sm:$0xff] }
0x1759   :  { %v8202_v5 = vpack.c.bf16 %v6097_v43, %v11676_v17  ;;  %v5787_v43 = vld [vmem:[%s11996_s4 + $0x728] sm:$0xff]  ;;  %v6382_v7 = vld [vmem:[%s11996_s4 + $0x930] sm:$0xff] }
0x175a   :  { %v8200_v3 = vpack.c.bf16 %v6098_v31, %v11678_v20  ;;  %v8240_v31 = vpack.c.bf16 %v5789_v24, %v5787_v43  ;;  %v6383_v43 = vld [vmem:[%s11996_s4 + $0x940] sm:$0xff]  ;;  %v8289_v24 = vpack.c.bf16 %v6382_v7, %v6381_v16 }
0x175c   :  { %8201 = vmatprep.subr.bf16.mxu1 %v8200_v3  ;;  %v5786_v3 = vld [vmem:[%s11996_s4 + $0x720] sm:$0xff] }
0x175d   :  { %8203 = vmatpush1.bf16.msra.mxu1 %v8202_v5 }
0x175e   :  { %8205 = vmatprep.subr.bf16.mxu1 %v8204_v9  ;;  %v5788_v9 = vld [vmem:[%s11996_s4 + $0x730] sm:$0xff] }
0x175f   :  { %v8242_v5 = vpack.c.bf16 %v5788_v9, %v5786_v3  ;;  %v6385_v3 = vld [vmem:[%s11996_s4 + $0x960] sm:$0xff]  ;;  %v6386_v9 = vld [vmem:[%s11996_s4 + $0x970] sm:$0xff] }
0x1760   :  { %6542 = vmatmul.mubr.msk.f32.vlgmr.msra.gmra.mrb[46].mxu1 %vm5072_vm10, %v8571_v33  ;;  %v5796_v33 = vld [vmem:[%s11996_s4 + $0x770] sm:$0xff]  ;;  %v8295_v46 = vpack.c.bf16 %v6386_v9, %v6385_v3 }
0x1761   :  { %8207 = vmatpush1.bf16.msra.mxu1 %v8206_v55  ;;  %v5792_v55 = vld [vmem:[%s11996_s4 + $0x750] sm:$0xff] }
0x1762   :  { %8209 = vmatprep.subr.bf16.mxu1 %v8208_v42  ;;  %v5795_v42 = vld [vmem:[%s11996_s4 + $0x768] sm:$0xff]  ;;  %v8246_v2 = vpack.c.bf16 %v5792_v55, %v5790_v61  ;;  %v6389_v61 = vld [vmem:[%s11996_s4 + $0x9a0] sm:$0xff]  ;;  %v6390_v55 = vld [vmem:[%s11996_s4 + $0x9b0] sm:$0xff] }
0x1763   :  { %v8248_v14 = vpack.c.bf16 %v5797_v18, %v5795_v42  ;;  %v8301_v42 = vpack.c.bf16 %v6390_v55, %v6389_v61  ;;  %v6391_v18 = vld [vmem:[%s11996_s4 + $0x9c0] sm:$0xff] }
0x1765   :  { %8211 = vmatpush1.bf16.msra.mxu1 %v8210_v0  ;;  %v8250_v0 = vpack.c.bf16 %v5796_v33, %v5794_v8  ;;  %v6393_v8 = vld [vmem:[%s11996_s4 + $0x9e0] sm:$0xff]  ;;  %v6394_v33 = vld [vmem:[%s11996_s4 + $0x9f0] sm:$0xff] }
0x1766   :  { %8213 = vmatprep.subr.bf16.mxu1 %v8212_v15  ;;  %v6282_v15 = vld [vmem:[%s11996_s4 + $0x790] sm:$0xff] }
0x1767   :  { %v8253_v51 = vpack.c.bf16 %v6283_v38, %v6282_v15 }
0x1769   :  { %8215 = vmatpush1.bf16.msra.mxu1 %v8214_v10  ;;  %8254 = vmatpush1.bf16.msra.mxu0 %v8253_v51  ;;  %v8256_v10 = vpack.c.bf16 %v6285_v25, %v6284_v45 }
0x176a   :  { %8217 = vmatprep.subr.bf16.mxu1 %v8216_v27  ;;  %8255 = vmatprep.subr.bf16.mxu0 %v8574_v11  ;;  %v6286_v27 = vld [vmem:[%s11996_s4 + $0x7d0] sm:$0xff] }
0x176b   :  { %v8259_v19 = vpack.c.bf16 %v6287_v49, %v6286_v27 }
0x176d   :  { %8219 = vmatpush1.bf16.msra.mxu1 %v8218_v50  ;;  %8257 = vmatpush1.bf16.msra.mxu0 %v8256_v10  ;;  %v8262_v50 = vpack.c.bf16 %v6289_v63, %v6288_v36 }
0x176e   :  { %8221 = vmatprep.subr.bf16.mxu1 %v8220_v26  ;;  %8258 = vmatprep.subr.bf16.mxu0 %v8574_v11  ;;  %v6290_v26 = vld [vmem:[%s11996_s4 + $0x810] sm:$0xff] }
0x176f   :  { %v8265_v29 = vpack.c.bf16 %v6291_v28, %v6290_v26 }
0x1771   :  { %8223 = vmatpush1.bf16.msra.mxu1 %v8222_v22  ;;  %8260 = vmatpush1.bf16.msra.mxu0 %v8259_v19  ;;  %v6292_v22 = vld [vmem:[%s11996_s4 + $0x830] sm:$0xff] }
0x1772   :  { %8225 = vmatprep.subr.bf16.mxu1 %v8224_v6  ;;  %8261 = vmatprep.subr.bf16.mxu0 %v8574_v11  ;;  %v6293_v6 = vld [vmem:[%s11996_s4 + $0x840] sm:$0xff] }
0x1773   :  { %v8268_v39 = vpack.c.bf16 %v6293_v6, %v6292_v22 }
0x1775   :  { %8227 = vmatpush1.bf16.msra.mxu1 %v8226_v53  ;;  %8263 = vmatpush1.bf16.msra.mxu0 %v8262_v50  ;;  %v6297_v53 = vld [vmem:[%s11996_s4 + $0x880] sm:$0xff] }
0x1776   :  { %8229 = vmatprep.subr.bf16.mxu1 %v8228_v12  ;;  %8264 = vmatprep.subr.bf16.mxu0 %v8574_v11  ;;  %v8274_v12 = vpack.c.bf16 %v6297_v53, %v6296_v37 }
0x1779   :  { %8231 = vmatpush1.bf16.msra.mxu1 %v8230_v44  ;;  %8266 = vmatpush1.bf16.msra.mxu0 %v8265_v29  ;;  %v6301_v44 = vld [vmem:[%s11996_s4 + $0x8c0] sm:$0xff] }
0x177a   :  { %8233 = vmatprep.subr.bf16.mxu1 %v8232_v59  ;;  %8267 = vmatprep.subr.bf16.mxu0 %v8574_v11  ;;  %v8280_v59 = vpack.c.bf16 %v6301_v44, %v6300_v58 }
0x177d   :  { %8235 = vmatpush1.bf16.msra.mxu1 %v8234_v13  ;;  %8269 = vmatpush1.bf16.msra.mxu0 %v8268_v39  ;;  %v6305_v13 = vld [vmem:[%s11996_s4 + $0x900] sm:$0xff] }
0x177e   :  { %8237 = vmatprep.subr.bf16.mxu1 %v8236_v40  ;;  %8270 = vmatprep.subr.bf16.mxu0 %v8574_v11  ;;  %v8286_v40 = vpack.c.bf16 %v6305_v13, %v6304_v32 }
0x1781   :  { %8239 = vmatpush1.bf16.msra.mxu1 %v8238_v48  ;;  %v6384_v48 = vld [vmem:[%s11996_s4 + $0x950] sm:$0xff] }
0x1782   :  { %8241 = vmatprep.subr.bf16.mxu1 %v8240_v31  ;;  %v8292_v31 = vpack.c.bf16 %v6384_v48, %v6383_v43 }
0x1785   :  { %8243 = vmatpush1.bf16.msra.mxu1 %v8242_v5  ;;  %v6388_v5 = vld [vmem:[%s11996_s4 + $0x990] sm:$0xff] }
0x1786   :  { %8245 = vmatprep.subr.bf16.mxu1 %v8244_v23  ;;  %v8298_v23 = vpack.c.bf16 %v6388_v5, %v6387_v34 }
0x1789   :  { %8247 = vmatpush1.bf16.msra.mxu1 %v8246_v2  ;;  %v6392_v2 = vld [vmem:[%s11996_s4 + $0x9d0] sm:$0xff] }
0x178a   :  { %8249 = vmatprep.subr.bf16.mxu1 %v8248_v14  ;;  %v8304_v14 = vpack.c.bf16 %v6392_v2, %v6391_v18 }
0x178d   :  { %8251 = vmatpush1.bf16.msra.mxu1 %v8250_v0  ;;  %v8307_v0 = vpack.c.bf16 %v6394_v33, %v6393_v8 }
0x178e   :  { %8288 = vmatprep.subr.bf16.mxu1 %v8574_v11 }
0x1833   :  { %v6165_v60 = vpop.f32.mrb[46].mxu1 }
0x1834   :  { %v6167_v35 = vpop.f32.mrb[47].mxu1 }
0x1835   :  { %6543 = vmatprep.mubr.msk.f32.mxu1 %vm98_vm0, %v6167_v35 }
0x1836   :  { %6238 = vmatmul.mubr.f32.vlgmr.msra.gmra.mrb[48].mxu1 %v6165_v60 }
0x1837   :  { %7366 = vmatprep.mubr.msk.f32.mxu1 %vm8575_vm7, %v8573_v41  ;;  %v6295_v41 = vld [vmem:[%s11996_s4 + $0x860] sm:$0xff]  ;;  %8290 = vmatpush3.bf16.msra.mxu1 %v8289_v24 }
0x1838   :  { %v8271_v4 = vpack.c.bf16 %v6295_v41, %v6294_v52  ;;  %8291 = vmatprep.subr.bf16.mxu1 %v8574_v11 }
0x183a   :  { %8272 = vmatpush1.bf16.msra.mxu0 %v8271_v4 }
0x183b   :  { %8273 = vmatprep.subr.bf16.mxu0 %v8574_v11  ;;  %8293 = vmatpush3.bf16.msra.mxu1 %v8292_v31 }
0x183c   :  { %8294 = vmatprep.subr.bf16.mxu1 %v8574_v11 }
0x183e   :  { %8275 = vmatpush1.bf16.msra.mxu0 %v8274_v12 }
0x183f   :  { %8276 = vmatprep.subr.bf16.mxu0 %v8574_v11  ;;  %8296 = vmatpush3.bf16.msra.mxu1 %v8295_v46 }
0x1840   :  { %8297 = vmatprep.subr.bf16.mxu1 %v8574_v11 }
0x1842   :  { %8278 = vmatpush1.bf16.msra.mxu0 %v8277_v57 }
0x1843   :  { %8279 = vmatprep.subr.bf16.mxu0 %v8574_v11  ;;  %8299 = vmatpush3.bf16.msra.mxu1 %v8298_v23 }
0x1844   :  { %8300 = vmatprep.subr.bf16.mxu1 %v8574_v11 }
0x1846   :  { %8281 = vmatpush1.bf16.msra.mxu0 %v8280_v59 }
0x1847   :  { %8282 = vmatprep.subr.bf16.mxu0 %v8574_v11  ;;  %8302 = vmatpush3.bf16.msra.mxu1 %v8301_v42 }
0x1848   :  { %8303 = vmatprep.subr.bf16.mxu1 %v8574_v11 }
0x184a   :  { %8284 = vmatpush1.bf16.msra.mxu0 %v8283_v30 }
0x184b   :  { %8285 = vmatprep.subr.bf16.mxu0 %v8574_v11  ;;  %8305 = vmatpush3.bf16.msra.mxu1 %v8304_v14 }
0x184c   :  { %8306 = vmatprep.subr.bf16.mxu1 %v8574_v11 }
0x184e   :  { %8287 = vmatpush1.bf16.msra.mxu0 %v8286_v40 }
0x184f   :  { %8308 = vmatpush3.bf16.msra.mxu1 %v8307_v0 }
0x1850   :  { %8309 = vmatprep.subr.bf16.mxu1 %v8574_v11 }
0x1909   :  { %v6239_v15 = vpop.f32.mrb[48].mxu1 }
0x190a   :  { %v6244_v38 = vmul.f32 %v6239_v15, %v6239_v15  ;;  %v6241_v45 = vpop.f32.mrb[49].mxu1  ;;  %v6259_v26 = vrot.slane %v6239_v15, %v8885_v54 }
0x190b   :  { %v6245_v51 = vmul.f32 %v6241_v45, %v6241_v45  ;;  %v6263_v28 = vrot.slane %v6241_v45, %v8885_v54  ;;  %v6395_v54 = vld [vmem:[%s11996_s4 + $0xa00] sm:$0xff] }
0x190c   :  { %v6248_v25 = vrot.slane %v6244_v38, 7  ;;  %v6264_v60 = vsub.f32 %v11676_v17, %v6259_v26  ;;  %v6396_v17 = vld [vmem:[%s11996_s4 + $0xa10] sm:$0xff] }
0x190d   :  { %v6249_v10 = vrot.slane %v6245_v51, 7  ;;  %v6265_v22 = vsub.f32 %v11678_v20, %v6263_v28  ;;  %v8310_v37 = vpack.c.bf16 %v6396_v17, %v6395_v54 }
0x190e   :  { %v6252_v27 = vsub.f32 %v6239_v15, %v6248_v25 }
0x190f   :  { %v6253_v49 = vsub.f32 %v6241_v45, %v6249_v10  ;;  %8311 = vmatpush3.bf16.msra.mxu1 %v8310_v37 }
0x1910   :  { %v6254_v19 = vmax.f32 %v6252_v27, 0.0 }
0x1911   :  { %v6255_v36 = vmax.f32 %v6253_v49, 0.0 }
0x1912   :  { %v6266_v63 = vadd.f32 1e-05, %v6254_v19 }
0x1913   :  { %v6267_v50 = vadd.f32 1e-05, %v6255_v36 }
0x1914   :  { %8564 = vrsqrt.f32 %v6266_v63 }
0x1915   :  { %8566 = vrsqrt.f32 %v6267_v50 }
0x191e   :  { %v8565_v29 = vpop.eup %8564 }
0x191f   :  { %v8567_v11 = vpop.eup %8566  ;;  %v6273_v35 = vrot.slane %v8565_v29, %v8882_v47 }
0x1920   :  { %v6277_v6 = vrot.slane %v8567_v11, %v8882_v47  ;;  %v6306_v47 = vld [vmem:[%s11996_s4 + $0x910] ss:$0 sm:$0xff] }
0x1921   :  { %v6278_v39 = vmul.f32 %v6273_v35, %v6264_v60 }
0x1922   :  { %v6279_v52 = vmul.f32 %v6277_v6, %v6265_v22 }
0x1923   :  { %v6280_v4 = vmax.f32 %v6278_v39, 0.0 }
0x1924   :  { %v6281_v41 = vmax.f32 %v6279_v52, 0.0 }
0x1926   :  { %6544 = vmatprep.mubr.msk.f32.mxu0 %vm98_vm0, %v6281_v41 }
0x1927   :  { %6375 = vmatmul.mubr.f32.vlgmr.msra.gmra.mrb[60].mxu0 %v6280_v4 }
0x19fa   :  { %v6376_v20 = vpop.f32.mrb[60].mxu0 }
0x19fb   :  { %v6377_v53 = vadd.f32 %v6376_v20, %v6306_v47  ;;  %v6378_v12 = vpop.f32.mrb[61].mxu0 }
0x19fd   :  { %v6380_v56 = vmax.f32 %v6377_v53, 0.0 }
0x19ff   :  { %7367 = vmatmul.mubr.f32.vlgmr.msra.gmra.mrb[50].mxu1 %v6380_v56 }
0x1ad2   :  { %v6464_v57 = vpop.f32.mrb[50].mxu1 }
0x1ad3   :  { %v6465_v58 = vadd.f32 %v6464_v57, %v6397_v21  ;;  %v7368_v44 = vpop.f32.mrb[51].mxu1 }
0x1ad5   :  { %6468 = vst [vmem:[%s11997_s5] sm:$0xff] %v6465_v58 }

</bundles_post_ra>
